<compile_context>
chip_gen: v7x
topology: tpu7x:2x2x1
jax: 0.10.0
libtpu: 0.0.40
codegen_flags: <defaults>
</compile_context>

<pallas_src>
import functools

import jax
import jax.numpy as jnp
from jax import lax
from jax.experimental import pallas as pl
from jax.experimental.pallas import tpu as pltpu


# ----------------------------- tiling helpers -------------------------------

_M_TILES = (512, 256, 128, 64, 32, 16, 8)   # rows (sublane axis, mult of 8)
_N_TILES = (512, 256, 128)                  # cols (lane axis, mult of 128)
_K_TILES = (512, 256, 128)                  # contraction


def _pick_tile(dim, targets):
    """Largest target tile that exactly divides `dim`; else the full dim."""
    for t in targets:
        if dim >= t and dim % t == 0:
            return t
    return dim


def _round_up(x, m):
    return ((x + m - 1) // m) * m


# ----------------------------- Pallas kernels -------------------------------

def _fused_linear_kernel(*refs, activation, fuse_ln, has_pos, has_residual,
                         eps, nk):
    """[LN](x) @ w + b [+ gelu_tanh] [+ pos] [+ residual] with K-accumulation."""
    it = iter(refs)
    x_ref = next(it)
    w_ref = next(it)
    b_ref = next(it)
    g_ref = be_ref = pos_ref = r_ref = None
    if fuse_ln:
        g_ref = next(it)
        be_ref = next(it)
    if has_pos:
        pos_ref = next(it)
    if has_residual:
        r_ref = next(it)
    o_ref = next(it)
    acc_ref = next(it) if nk > 1 else None
    ln_ref = next(it) if fuse_ln else None

    def epilogue(y):
        y = y + b_ref[...].astype(jnp.float32)
        if activation == "gelu_tanh":            # gelu_pytorch_tanh
            c = jnp.float32(0.7978845608028654)  # sqrt(2/pi)
            y = 0.5 * y * (1.0 + jnp.tanh(c * (y + 0.044715 * y * y * y)))
        if has_pos:
            y = y + pos_ref[...].astype(jnp.float32)
        if has_residual:
            y = y + r_ref[...].astype(jnp.float32)
        o_ref[...] = y.astype(o_ref.dtype)

    if fuse_ln:
        # Compute LN once per row block (j == 0) and cache the bf16 result;
        # reuse it for every N tile of the same i (j axis is "arbitrary").
        @pl.when(pl.program_id(1) == 0)
        def _():
            xf = x_ref[...].astype(jnp.float32)
            mean = jnp.mean(xf, axis=-1, keepdims=True)
            var = jnp.mean(jnp.square(xf - mean), axis=-1, keepdims=True)
            xn = (xf - mean) * lax.rsqrt(var + eps)
            xn = (xn * g_ref[...].astype(jnp.float32)
                  + be_ref[...].astype(jnp.float32))
            ln_ref[...] = xn.astype(jnp.bfloat16)
        x = ln_ref[...]
    else:
        x = x_ref[...].astype(jnp.bfloat16)

    part = jnp.dot(x, w_ref[...].astype(jnp.bfloat16),
                   preferred_element_type=jnp.float32)

    if nk > 1:
        @pl.when(pl.program_id(2) == 0)
        def _():
            acc_ref[...] = jnp.zeros_like(acc_ref)
        acc_ref[...] += part

        @pl.when(pl.program_id(2) == nk - 1)
        def _():
            epilogue(acc_ref[...])
    else:
        epilogue(part)


def _layernorm_kernel(x_ref, g_ref, b_ref, o_ref, *, eps):
    x = x_ref[...].astype(jnp.float32)
    mean = jnp.mean(x, axis=-1, keepdims=True)
    var = jnp.mean(jnp.square(x - mean), axis=-1, keepdims=True)
    xn = (x - mean) * lax.rsqrt(var + eps)
    o_ref[...] = (xn * g_ref[...] + b_ref[...]).astype(o_ref.dtype)


def _attention_kernel(q_ref, k_ref, v_ref, o_ref, *, dh, heads_per_block):
    """Blocks are [1, S, G*Dh] column windows of the fused qkv tensor.

    The 1/sqrt(Dh) scale is already folded into the q projection weights.
    Heads are processed sequentially so the f32 score/exp temporaries stay
    [S, S] per head (VMEM-friendly on v7x).
    """
    for h in range(heads_per_block):
        lo, hi = h * dh, (h + 1) * dh
        q = q_ref[0, :, lo:hi]                                   # [S, Dh] bf16
        k = k_ref[0, :, lo:hi]
        v = v_ref[0, :, lo:hi]
        # q @ k^T without an explicit transpose: contract on the last axes.
        s = lax.dot_general(q, k, (((1,), (1,)), ((), ())),
                            preferred_element_type=jnp.float32)  # [S, S]
        m = jnp.max(s, axis=-1, keepdims=True)
        p = jnp.exp(s - m)
        denom = jnp.sum(p, axis=-1, keepdims=True)
        o = lax.dot_general(p.astype(v.dtype), v, (((1,), (0,)), ((), ())),
                            preferred_element_type=jnp.float32)  # [S, Dh]
        o = o * pl.reciprocal(denom, approx=True)                # after PV
        o_ref[0, :, lo:hi] = o.astype(o_ref.dtype)


# ----------------------------- kernel wrappers -------------------------------

def linear(x, w, b, *, ln=None, activation=None, residual=None, pos=None,
           out_dtype=jnp.bfloat16):
    """Tiled matmul with optional fused LN prologue and bias/GELU/pos/residual
    epilogue: [M, K] @ [K, N] + [N]."""
    M, K = x.shape
    _, N = w.shape
    fuse_ln = ln is not None
    has_res = residual is not None
    has_pos = pos is not None

    n_pos_blocks = 1
    if has_pos:
        s_pos = pos.shape[0]
        tm = _pick_tile(s_pos, _M_TILES)
        if tm % 8 != 0 or M % s_pos != 0:
            # Rare shapes: fall back to an un-fused positional add.
            y = linear(x, w, b, ln=ln, activation=activation,
                       residual=residual, out_dtype=out_dtype)
            return (y.reshape(M // s_pos, s_pos, N)
                    + pos[None].astype(y.dtype)).reshape(M, N)
        n_pos_blocks = s_pos // tm
    else:
        max_tm = 256 if fuse_ln else 512   # cap tm on the LN-fused path (v7x)
        tm = max_tm if M >= max_tm else _round_up(M, 8)

    Mp = _round_up(M, tm)
    if Mp != M:
        x = jnp.pad(x, ((0, Mp - M), (0, 0)))
        if has_res:
            residual = jnp.pad(residual, ((0, Mp - M), (0, 0)))

    tn = _pick_tile(N, _N_TILES)
    tk = K if fuse_ln else _pick_tile(K, _K_TILES)   # LN needs the full row
    nk = K // tk
    grid = (Mp // tm, N // tn, nk)

    in_specs = [
        pl.BlockSpec((tm, tk), lambda i, j, k: (i, k)),
        pl.BlockSpec((tk, tn), lambda i, j, k: (k, j)),
        pl.BlockSpec((1, tn), lambda i, j, k: (0, j)),
    ]
    args = [x, w, b.reshape(1, N)]
    eps = 0.0
    if fuse_ln:
        g, beta, eps = ln
        in_specs += [pl.BlockSpec((1, tk), lambda i, j, k: (0, k)),
                     pl.BlockSpec((1, tk), lambda i, j, k: (0, k))]
        args += [g.reshape(1, K), beta.reshape(1, K)]
    if has_pos:
        in_specs.append(
            pl.BlockSpec((tm, tn), lambda i, j, k: (i % n_pos_blocks, j)))
        args.append(pos)
    if has_res:
        in_specs.append(pl.BlockSpec((tm, tn), lambda i, j, k: (i, j)))
        args.append(residual)

    scratch = []
    if nk > 1:
        scratch.append(pltpu.VMEM((tm, tn), jnp.float32))   # K accumulator
    if fuse_ln:
        scratch.append(pltpu.VMEM((tm, K), jnp.bfloat16))   # cached LN rows

    # j must be sequential (per core) when the LN cache is keyed on j == 0.
    dims = (("parallel", "arbitrary", "arbitrary") if fuse_ln
            else ("parallel", "parallel", "arbitrary"))

    flops = 2 * Mp * N * K
    bytes_accessed = (x.size * x.dtype.itemsize + w.size * w.dtype.itemsize
                      + Mp * N * jnp.dtype(out_dtype).itemsize)

    out = pl.pallas_call(
        functools.partial(_fused_linear_kernel, activation=activation,
                          fuse_ln=fuse_ln, has_pos=has_pos,
                          has_residual=has_res, eps=float(eps), nk=nk),
        out_shape=jax.ShapeDtypeStruct((Mp, N), out_dtype),
        grid=grid,
        in_specs=in_specs,
        out_specs=pl.BlockSpec((tm, tn), lambda i, j, k: (i, j)),
        scratch_shapes=scratch,
        compiler_params=pltpu.CompilerParams(dimension_semantics=dims),
        cost_estimate=pl.CostEstimate(
            flops=flops,
            transcendentals=Mp * N if activation == "gelu_tanh" else 0,
            bytes_accessed=bytes_accessed),
    )(*args)
    return out[:M] if Mp != M else out


def layernorm(x, g, b, eps):
    """Standalone row-tiled LayerNorm (used only for the final LN)."""
    M, D = x.shape
    tm = _pick_tile(M, _M_TILES)
    return pl.pallas_call(
        functools.partial(_layernorm_kernel, eps=eps),
        out_shape=jax.ShapeDtypeStruct((M, D), jnp.float32),
        grid=(M // tm,),
        in_specs=[pl.BlockSpec((tm, D), lambda i: (i, 0)),
                  pl.BlockSpec((1, D), lambda i: (0, 0)),
                  pl.BlockSpec((1, D), lambda i: (0, 0))],
        out_specs=pl.BlockSpec((tm, D), lambda i: (i, 0)),
        compiler_params=pltpu.CompilerParams(
            dimension_semantics=("parallel",)),
    )(x, g.reshape(1, D), b.reshape(1, D))


def attention(qkv, num_heads, out_dtype=jnp.bfloat16):
    """Self-attention directly on the fused qkv tensor.

    qkv: [B, S, 3D] (bf16, q-scale pre-folded) -> [B, S, D] with heads already
    concatenated in the standard column order (no XLA head transposes).
    """
    B, S, three_d = qkv.shape
    D = three_d // 3
    dh = D // num_heads

    # Smallest head group whose combined lane width is a multiple of 128.
    # TODO(synk): head_dims that never reach a 128 multiple (tiny D) rely on
    # Mosaic masked layouts; add a dedicated fallback if such configs appear.
    G = num_heads
    for g in range(1, num_heads + 1):
        if num_heads % g == 0 and (g * dh) % 128 == 0:
            G = g
            break
    gdh = G * dh
    blocks_per_section = D // gdh           # == num_heads // G

    def qkv_spec(section):
        def imap(b, hg):
            return (b, 0, hg + section * blocks_per_section)
        return pl.BlockSpec((1, S, gdh), imap)

    return pl.pallas_call(
        functools.partial(_attention_kernel, dh=dh, heads_per_block=G),
        out_shape=jax.ShapeDtypeStruct((B, S, D), out_dtype),
        grid=(B, num_heads // G),
        in_specs=[qkv_spec(0), qkv_spec(1), qkv_spec(2)],
        out_specs=pl.BlockSpec((1, S, gdh), lambda b, hg: (b, 0, hg)),
        compiler_params=pltpu.CompilerParams(
            dimension_semantics=("parallel", "parallel"),
            vmem_limit_bytes=64 * 1024 * 1024),
    )(qkv, qkv, qkv)


# ------------------------------- model glue ----------------------------------

def patchify(pixel_values, patch_size):
    """NCHW -> [B, num_patches, C*P*P]; matches Conv2d(stride=P) + flatten +
    transpose(1, 2)."""
    B, C, H, W = pixel_values.shape
    P = patch_size
    x = pixel_values.reshape(B, C, H // P, P, W // P, P)
    x = x.transpose(0, 2, 4, 1, 3, 5)                  # [B, Hp, Wp, C, P, P]
    return x.reshape(B, (H // P) * (W // P), C * P * P)


def encoder_layer(x, p, num_heads, eps):
    B, S, D = x.shape
    xf = x.reshape(B * S, D)                               # bf16 residual stream

    # --- self attention: fused LN1 + QKV projection (one matmul) ---
    qkv = linear(xf, p["wqkv"], p["bqkv"],
                 ln=(p["ln1_g"], p["ln1_b"], eps),
                 out_dtype=jnp.bfloat16)                   # [B*S, 3D]
    a = attention(qkv.reshape(B, S, 3 * D), num_heads)     # [B, S, D] bf16

    # out projection with fused residual add
    x1 = linear(a.reshape(B * S, D), p["wo"], p["bo"], residual=xf,
                out_dtype=jnp.bfloat16)

    # --- MLP: fused LN2 + fc1 + tanh-GELU, then fc2 with fused residual ---
    m = linear(x1, p["w1"], p["b1"],
               ln=(p["ln2_g"], p["ln2_b"], eps),
               activation="gelu_tanh", out_dtype=jnp.bfloat16)
    x2 = linear(m, p["w2"], p["b2"], residual=x1, out_dtype=jnp.bfloat16)
    return x2.reshape(B, S, D)


def siglip_vision_forward(pixel_values, params, cfg):
    B = pixel_values.shape[0]
    P = cfg["patch_size"]
    D = cfg["dmodel"]
    S = (cfg["image_size"] // P) ** 2

    # patch embedding: conv(kernel==stride, pad 0) == patchify + matmul,
    # with the positional-embedding add fused into the matmul epilogue.
    patches = patchify(pixel_values, P).reshape(B * S, -1)
    x = linear(patches, params["patch_w"], params["patch_b"],
               pos=params["pos_emb"], out_dtype=jnp.bfloat16)   # [B*S, D]
    x = x.reshape(B, S, D)

    for lp in params["layers"]:
        x = encoder_layer(x, lp, cfg["num_heads"], cfg["layer_norm_eps"])

    x = layernorm(x.reshape(B * S, D), params["final_ln_g"],
                  params["final_ln_b"], cfg["layer_norm_eps"])
    return x.reshape(B, S, D)


# ------------------------------ param init -----------------------------------

def init_params(key, cfg):
    D = cfg["dmodel"]
    C = cfg["num_channels"]
    P = cfg["patch_size"]
    I = cfg["intermediate_size"]
    H = cfg["num_heads"]
    S = (cfg["image_size"] // P) ** 2
    q_scale = float(D // H) ** -0.5           # folded into q projection

    def nrm(k, shape, s=0.02):
        return s * jax.random.normal(k, shape, jnp.float32)

    keys = iter(jax.random.split(key, 8 + 8 * cfg["num_layers"]))

    params = {
        "patch_w": nrm(next(keys), (C * P * P, D)).astype(jnp.bfloat16),
        "patch_b": jnp.zeros((D,), jnp.float32),
        "pos_emb": nrm(next(keys), (S, D)),   # Embedding indexed by arange
        "final_ln_g": jnp.ones((D,), jnp.float32),
        "final_ln_b": jnp.zeros((D,), jnp.float32),
        "layers": [],
    }
    for _ in range(cfg["num_layers"]):
        wq = nrm(next(keys), (D, D)) * q_scale   # 1/sqrt(Dh) folded into wq
        wk = nrm(next(keys), (D, D))
        wv = nrm(next(keys), (D, D))
        bq = jnp.zeros((D,), jnp.float32) * q_scale
        lp = {
            "ln1_g": jnp.ones((D,), jnp.float32),
            "ln1_b": jnp.zeros((D,), jnp.float32),
            "wqkv": jnp.concatenate([wq, wk, wv], axis=1).astype(jnp.bfloat16),
            "bqkv": jnp.concatenate([bq, jnp.zeros((2 * D,), jnp.float32)]),
            "wo": nrm(next(keys), (D, D)).astype(jnp.bfloat16),
            "bo": jnp.zeros((D,), jnp.float32),
            "ln2_g": jnp.ones((D,), jnp.float32),
            "ln2_b": jnp.zeros((D,), jnp.float32),
            "w1": nrm(next(keys), (D, I)).astype(jnp.bfloat16),
            "b1": jnp.zeros((I,), jnp.float32),
            "w2": nrm(next(keys), (I, D)).astype(jnp.bfloat16),
            "b2": jnp.zeros((D,), jnp.float32),
        }
        params["layers"].append(lp)
    return params


# --------------------------------- main ---------------------------------------

if __name__ == "__main__":
    cfg = {
        "num_channels": 3,
        "image_size": 16,
        "patch_size": 4,        # -> 16 patches
        "dmodel": 256,
        "num_heads": 2,         # head_dim = 128 (lane-aligned head slicing)
        "intermediate_size": 1024,
        "num_layers": 2,
        "layer_norm_eps": 1e-6,
    }

    key = jax.random.PRNGKey(0)
    k_params, k_input = jax.random.split(key)
    params = init_params(k_params, cfg)

    # pixel_values in NCHW, as PyTorch Conv2d expects.
    pixel_values = jax.random.normal(
        k_input, (2, cfg["num_channels"], cfg["image_size"], cfg["image_size"]),
        jnp.float32)

    fwd = jax.jit(lambda pv, p: siglip_vision_forward(pv, p, cfg))
    out = jax.block_until_ready(fwd(pixel_values, params))

    S = (cfg["image_size"] // cfg["patch_size"]) ** 2
    assert out.shape == (2, S, cfg["dmodel"]), out.shape
    assert bool(jnp.all(jnp.isfinite(out)))
    print("KERNEL_OK")
</pallas_src>

<mosaic_0001>
module attributes {stable_mosaic.version = 11 : i64} {
  func.func @_fused_linear_kernel(%arg0: i32, %arg1: i32, %arg2: i32, %arg3: memref<16x48xf32, #tpu.memory_space<vmem>>, %arg4: memref<48x256xbf16, #tpu.memory_space<vmem>>, %arg5: memref<1x256xf32, #tpu.memory_space<vmem>>, %arg6: memref<16x256xf32, #tpu.memory_space<vmem>>, %arg7: memref<16x256xbf16, #tpu.memory_space<vmem>>) attributes {dimension_semantics = [#tpu.dimension_semantics<parallel>, #tpu.dimension_semantics<parallel>, #tpu.dimension_semantics<arbitrary>], iteration_bounds = array<i64: 2, 1, 1>, scalar_prefetch = 0 : i64, scratch_operands = 0 : i64, tpu.core_type = #tpu.core_type<tc>, window_params = [{transform_indices = @transform_0, window_bounds = array<i64: 16, 48>}, {transform_indices = @transform_1, window_bounds = array<i64: 48, 256>}, {transform_indices = @transform_2, window_bounds = array<i64: 1, 256>}, {transform_indices = @transform_3, window_bounds = array<i64: 16, 256>}, {transform_indices = @transform_4, window_bounds = array<i64: 16, 256>}]} {
    %c0 = arith.constant 0 : index
    %c0_0 = arith.constant 0 : index
    %0 = vector.load %arg3[%c0, %c0_0] : memref<16x48xf32, #tpu.memory_space<vmem>>, vector<16x48xf32>
    %1 = arith.truncf %0 : vector<16x48xf32> to vector<16x48xbf16>
    %c0_1 = arith.constant 0 : index
    %c0_2 = arith.constant 0 : index
    %2 = vector.load %arg4[%c0_1, %c0_2] : memref<48x256xbf16, #tpu.memory_space<vmem>>, vector<48x256xbf16>
    %cst = arith.constant dense<0.000000e+00> : vector<16x256xf32>
    %3 = tpu.matmul %1, %2, %cst {dimension_numbers = #tpu.dot_dimension_numbers<[1], [0], [0], [1], [0, 0, 1, 1], [], []>} : vector<16x48xbf16>, vector<48x256xbf16>, vector<16x256xf32> -> vector<16x256xf32>
    %c0_3 = arith.constant 0 : index
    %c0_4 = arith.constant 0 : index
    %4 = vector.load %arg5[%c0_3, %c0_4] : memref<1x256xf32, #tpu.memory_space<vmem>>, vector<1x256xf32>
    %5 = vector.broadcast %4 : vector<1x256xf32> to vector<16x256xf32>
    %6 = arith.addf %3, %5 : vector<16x256xf32>
    %c0_5 = arith.constant 0 : index
    %c0_6 = arith.constant 0 : index
    %7 = vector.load %arg6[%c0_5, %c0_6] : memref<16x256xf32, #tpu.memory_space<vmem>>, vector<16x256xf32>
    %8 = arith.addf %6, %7 : vector<16x256xf32>
    %9 = arith.truncf %8 : vector<16x256xf32> to vector<16x256xbf16>
    %c0_7 = arith.constant 0 : index
    %c0_8 = arith.constant 0 : index
    %10 = vector.load %arg7[%c0_7, %c0_8] : memref<16x256xbf16, #tpu.memory_space<vmem>>, vector<16x256xbf16>
    tpu.vector_store %arg7[%c0_7, %c0_8], %9 {strides = array<i32>} : memref<16x256xbf16, #tpu.memory_space<vmem>>, vector<16x256xbf16>,
    return
  }
  func.func @transform_0(%arg0: i32, %arg1: i32, %arg2: i32) -> (i32, i32) {
    %c0_i32 = arith.constant 0 : i32
    return %arg0, %arg2 : i32, i32
  }
  func.func @transform_1(%arg0: i32, %arg1: i32, %arg2: i32) -> (i32, i32) {
    %c0_i32 = arith.constant 0 : i32
    return %arg2, %arg1 : i32, i32
  }
  func.func @transform_2(%arg0: i32, %arg1: i32, %arg2: i32) -> (i32, i32) {
    %c0_i32 = arith.constant 0 : i32
    %c0_i32_0 = arith.constant 0 : i32
    return %c0_i32, %arg1 : i32, i32
  }
  func.func @transform_3(%arg0: i32, %arg1: i32, %arg2: i32) -> (i32, i32) {
    %c1_i32 = arith.constant 1 : i32
    %c0_i32 = arith.constant 0 : i32
    %0 = arith.cmpi eq, %c1_i32, %c0_i32 : i32
    %c1_i32_0 = arith.constant 1 : i32
    %1 = arith.select %0, %c1_i32_0, %c1_i32 : i32
    %2 = arith.remsi %arg0, %1 : i32
    %c0_i32_1 = arith.constant 0 : i32
    %3 = arith.cmpi ne, %2, %c0_i32_1 : i32
    %c0_i32_2 = arith.constant 0 : i32
    %4 = arith.cmpi slt, %2, %c0_i32_2 : i32
    %c0_i32_3 = arith.constant 0 : i32
    %5 = arith.cmpi slt, %1, %c0_i32_3 : i32
    %6 = arith.xori %4, %5 : i1
    %7 = arith.andi %6, %3 : i1
    %8 = arith.addi %2, %1 : i32
    %9 = arith.select %7, %8, %2 : i32
    %c0_i32_4 = arith.constant 0 : i32
    return %9, %arg1 : i32, i32
  }
  func.func @transform_4(%arg0: i32, %arg1: i32, %arg2: i32) -> (i32, i32) {
    %c0_i32 = arith.constant 0 : i32
    return %arg0, %arg1 : i32, i32
  }
}

module attributes {stable_mosaic.version = 11 : i64} {
  func.func @_attention_kernel(%arg0: i32, %arg1: i32, %arg2: memref<1x16x128xbf16, #tpu.memory_space<vmem>>, %arg3: memref<1x16x128xbf16, #tpu.memory_space<vmem>>, %arg4: memref<1x16x128xbf16, #tpu.memory_space<vmem>>, %arg5: memref<1x16x128xbf16, #tpu.memory_space<vmem>>) attributes {dimension_semantics = [#tpu.dimension_semantics<parallel>, #tpu.dimension_semantics<parallel>], iteration_bounds = array<i64: 2, 2>, scalar_prefetch = 0 : i64, scratch_operands = 0 : i64, tpu.core_type = #tpu.core_type<tc>, window_params = [{transform_indices = @transform_0, window_bounds = array<i64: 1, 16, 128>}, {transform_indices = @transform_1, window_bounds = array<i64: 1, 16, 128>}, {transform_indices = @transform_2, window_bounds = array<i64: 1, 16, 128>}, {transform_indices = @transform_3, window_bounds = array<i64: 1, 16, 128>}]} {
    %c0 = arith.constant 0 : index
    %c0_0 = arith.constant 0 : index
    %c0_1 = arith.constant 0 : index
    %0 = vector.load %arg2[%c0, %c0_0, %c0_1] : memref<1x16x128xbf16, #tpu.memory_space<vmem>>, vector<1x16x128xbf16>
    %1 = vector.shape_cast %0 : vector<1x16x128xbf16> to vector<16x128xbf16>
    %c0_2 = arith.constant 0 : index
    %c0_3 = arith.constant 0 : index
    %c0_4 = arith.constant 0 : index
    %2 = vector.load %arg3[%c0_2, %c0_3, %c0_4] : memref<1x16x128xbf16, #tpu.memory_space<vmem>>, vector<1x16x128xbf16>
    %3 = vector.shape_cast %2 : vector<1x16x128xbf16> to vector<16x128xbf16>
    %c0_5 = arith.constant 0 : index
    %c0_6 = arith.constant 0 : index
    %c0_7 = arith.constant 0 : index
    %4 = vector.load %arg4[%c0_5, %c0_6, %c0_7] : memref<1x16x128xbf16, #tpu.memory_space<vmem>>, vector<1x16x128xbf16>
    %5 = vector.shape_cast %4 : vector<1x16x128xbf16> to vector<16x128xbf16>
    %cst = arith.constant dense<0.000000e+00> : vector<16x16xf32>
    %6 = tpu.matmul %1, %3, %cst {dimension_numbers = #tpu.dot_dimension_numbers<[1], [1], [0], [0], [0, 0, 1, 0], [], []>} : vector<16x128xbf16>, vector<16x128xbf16>, vector<16x16xf32> -> vector<16x16xf32>
    %cst_8 = arith.constant dense<0xFF800000> : vector<16xf32>
    %7 = vector.multi_reduction <maximumf>, %6, %cst_8 [1] : vector<16x16xf32> to vector<16xf32>
    %8 = vector.shape_cast %7 : vector<16xf32> to vector<16x1xf32>
    %9 = vector.broadcast %8 : vector<16x1xf32> to vector<16x16xf32>
    %10 = arith.subf %6, %9 : vector<16x16xf32>
    %11 = math.exp %10 : vector<16x16xf32>
    %cst_9 = arith.constant dense<0.000000e+00> : vector<16xf32>
    %12 = vector.multi_reduction <add>, %11, %cst_9 [1] : vector<16x16xf32> to vector<16xf32>
    %13 = vector.shape_cast %12 : vector<16xf32> to vector<16x1xf32>
    %14 = arith.truncf %11 : vector<16x16xf32> to vector<16x16xbf16>
    %cst_10 = arith.constant dense<0.000000e+00> : vector<16x128xf32>
    %15 = tpu.matmul %14, %5, %cst_10 {dimension_numbers = #tpu.dot_dimension_numbers<[1], [0], [0], [1], [0, 0, 1, 1], [], []>} : vector<16x16xbf16>, vector<16x128xbf16>, vector<16x128xf32> -> vector<16x128xf32>
    %16 = tpu.reciprocal %13 {approx = true} : vector<16x1xf32> -> vector<16x1xf32>
    %17 = vector.broadcast %16 : vector<16x1xf32> to vector<16x128xf32>
    %18 = arith.mulf %15, %17 : vector<16x128xf32>
    %19 = arith.truncf %18 : vector<16x128xf32> to vector<16x128xbf16>
    %c0_11 = arith.constant 0 : index
    %c0_12 = arith.constant 0 : index
    %c0_13 = arith.constant 0 : index
    %20 = vector.load %arg5[%c0_11, %c0_12, %c0_13] : memref<1x16x128xbf16, #tpu.memory_space<vmem>>, vector<1x16x128xbf16>
    %21 = vector.shape_cast %20 : vector<1x16x128xbf16> to vector<16x128xbf16>
    %22 = vector.shape_cast %19 : vector<16x128xbf16> to vector<1x16x128xbf16>
    tpu.vector_store %arg5[%c0_11, %c0_12, %c0_13], %22 {strides = array<i32>} : memref<1x16x128xbf16, #tpu.memory_space<vmem>>, vector<1x16x128xbf16>,
    return
  }
  func.func @transform_0(%arg0: i32, %arg1: i32) -> (i32, i32, i32) {
    %c0_i32 = arith.constant 0 : i32
    %0 = arith.addi %arg1, %c0_i32 : i32
    %c0_i32_0 = arith.constant 0 : i32
    %c0_i32_1 = arith.constant 0 : i32
    return %arg0, %c0_i32_0, %0 : i32, i32, i32
  }
  func.func @transform_1(%arg0: i32, %arg1: i32) -> (i32, i32, i32) {
    %c2_i32 = arith.constant 2 : i32
    %0 = arith.addi %arg1, %c2_i32 : i32
    %c0_i32 = arith.constant 0 : i32
    %c0_i32_0 = arith.constant 0 : i32
    return %arg0, %c0_i32, %0 : i32, i32, i32
  }
  func.func @transform_2(%arg0: i32, %arg1: i32) -> (i32, i32, i32) {
    %c4_i32 = arith.constant 4 : i32
    %0 = arith.addi %arg1, %c4_i32 : i32
    %c0_i32 = arith.constant 0 : i32
    %c0_i32_0 = arith.constant 0 : i32
    return %arg0, %c0_i32, %0 : i32, i32, i32
  }
  func.func @transform_3(%arg0: i32, %arg1: i32) -> (i32, i32, i32) {
    %c0_i32 = arith.constant 0 : i32
    %c0_i32_0 = arith.constant 0 : i32
    return %arg0, %c0_i32, %arg1 : i32, i32, i32
  }
}

module attributes {stable_mosaic.version = 11 : i64} {
  func.func @_fused_linear_kernel(%arg0: i32, %arg1: i32, %arg2: i32, %arg3: memref<32x256xbf16, #tpu.memory_space<vmem>>, %arg4: memref<256x256xbf16, #tpu.memory_space<vmem>>, %arg5: memref<1x256xf32, #tpu.memory_space<vmem>>, %arg6: memref<32x256xbf16, #tpu.memory_space<vmem>>, %arg7: memref<32x256xbf16, #tpu.memory_space<vmem>>) attributes {dimension_semantics = [#tpu.dimension_semantics<parallel>, #tpu.dimension_semantics<parallel>, #tpu.dimension_semantics<arbitrary>], iteration_bounds = array<i64: 1, 1, 1>, scalar_prefetch = 0 : i64, scratch_operands = 0 : i64, tpu.core_type = #tpu.core_type<tc>, window_params = [{transform_indices = @transform_0, window_bounds = array<i64: 32, 256>}, {transform_indices = @transform_1, window_bounds = array<i64: 256, 256>}, {transform_indices = @transform_2, window_bounds = array<i64: 1, 256>}, {transform_indices = @transform_3, window_bounds = array<i64: 32, 256>}, {transform_indices = @transform_4, window_bounds = array<i64: 32, 256>}]} {
    %c0 = arith.constant 0 : index
    %c0_0 = arith.constant 0 : index
    %0 = vector.load %arg3[%c0, %c0_0] : memref<32x256xbf16, #tpu.memory_space<vmem>>, vector<32x256xbf16>
    %c0_1 = arith.constant 0 : index
    %c0_2 = arith.constant 0 : index
    %1 = vector.load %arg4[%c0_1, %c0_2] : memref<256x256xbf16, #tpu.memory_space<vmem>>, vector<256x256xbf16>
    %cst = arith.constant dense<0.000000e+00> : vector<32x256xf32>
    %2 = tpu.matmul %0, %1, %cst {dimension_numbers = #tpu.dot_dimension_numbers<[1], [0], [0], [1], [0, 0, 1, 1], [], []>} : vector<32x256xbf16>, vector<256x256xbf16>, vector<32x256xf32> -> vector<32x256xf32>
    %c0_3 = arith.constant 0 : index
    %c0_4 = arith.constant 0 : index
    %3 = vector.load %arg5[%c0_3, %c0_4] : memref<1x256xf32, #tpu.memory_space<vmem>>, vector<1x256xf32>
    %4 = vector.broadcast %3 : vector<1x256xf32> to vector<32x256xf32>
    %5 = arith.addf %2, %4 : vector<32x256xf32>
    %c0_5 = arith.constant 0 : index
    %c0_6 = arith.constant 0 : index
    %6 = vector.load %arg6[%c0_5, %c0_6] : memref<32x256xbf16, #tpu.memory_space<vmem>>, vector<32x256xbf16>
    %7 = arith.extf %6 : vector<32x256xbf16> to vector<32x256xf32>
    %8 = arith.addf %5, %7 : vector<32x256xf32>
    %9 = arith.truncf %8 : vector<32x256xf32> to vector<32x256xbf16>
    %c0_7 = arith.constant 0 : index
    %c0_8 = arith.constant 0 : index
    %10 = vector.load %arg7[%c0_7, %c0_8] : memref<32x256xbf16, #tpu.memory_space<vmem>>, vector<32x256xbf16>
    tpu.vector_store %arg7[%c0_7, %c0_8], %9 {strides = array<i32>} : memref<32x256xbf16, #tpu.memory_space<vmem>>, vector<32x256xbf16>,
    return
  }
  func.func @transform_0(%arg0: i32, %arg1: i32, %arg2: i32) -> (i32, i32) {
    %c0_i32 = arith.constant 0 : i32
    return %arg0, %arg2 : i32, i32
  }
  func.func @transform_1(%arg0: i32, %arg1: i32, %arg2: i32) -> (i32, i32) {
    %c0_i32 = arith.constant 0 : i32
    return %arg2, %arg1 : i32, i32
  }
  func.func @transform_2(%arg0: i32, %arg1: i32, %arg2: i32) -> (i32, i32) {
    %c0_i32 = arith.constant 0 : i32
    %c0_i32_0 = arith.constant 0 : i32
    return %c0_i32, %arg1 : i32, i32
  }
  func.func @transform_3(%arg0: i32, %arg1: i32, %arg2: i32) -> (i32, i32) {
    %c0_i32 = arith.constant 0 : i32
    return %arg0, %arg1 : i32, i32
  }
  func.func @transform_4(%arg0: i32, %arg1: i32, %arg2: i32) -> (i32, i32) {
    %c0_i32 = arith.constant 0 : i32
    return %arg0, %arg1 : i32, i32
  }
}

module attributes {stable_mosaic.version = 11 : i64} {
  func.func @_fused_linear_kernel(%arg0: i32, %arg1: i32, %arg2: i32, %arg3: memref<32x256xbf16, #tpu.memory_space<vmem>>, %arg4: memref<256x256xbf16, #tpu.memory_space<vmem>>, %arg5: memref<1x256xf32, #tpu.memory_space<vmem>>, %arg6: memref<1x256xf32, #tpu.memory_space<vmem>>, %arg7: memref<1x256xf32, #tpu.memory_space<vmem>>, %arg8: memref<32x256xbf16, #tpu.memory_space<vmem>>, %arg9: memref<32x256xbf16, #tpu.memory_space<vmem>>) attributes {dimension_semantics = [#tpu.dimension_semantics<parallel>, #tpu.dimension_semantics<arbitrary>, #tpu.dimension_semantics<arbitrary>], iteration_bounds = array<i64: 1, 3, 1>, scalar_prefetch = 0 : i64, scratch_operands = 1 : i64, tpu.core_type = #tpu.core_type<tc>, window_params = [{transform_indices = @transform_0, window_bounds = array<i64: 32, 256>}, {transform_indices = @transform_1, window_bounds = array<i64: 256, 256>}, {transform_indices = @transform_2, window_bounds = array<i64: 1, 256>}, {transform_indices = @transform_3, window_bounds = array<i64: 1, 256>}, {transform_indices = @transform_4, window_bounds = array<i64: 1, 256>}, {transform_indices = @transform_5, window_bounds = array<i64: 32, 256>}]} {
    %c0_i32 = arith.constant 0 : i32
    %0 = arith.cmpi eq, %arg1, %c0_i32 : i32
    %1 = arith.extui %0 : i1 to i32
    %c0_i32_0 = arith.constant 0 : i32
    %2 = arith.cmpi ne, %1, %c0_i32_0 : i32
    scf.if %2 {
      %c0_8 = arith.constant 0 : index
      %c0_9 = arith.constant 0 : index
      %11 = vector.load %arg3[%c0_8, %c0_9] : memref<32x256xbf16, #tpu.memory_space<vmem>>, vector<32x256xbf16>
      %12 = arith.extf %11 : vector<32x256xbf16> to vector<32x256xf32>
      %cst_10 = arith.constant dense<0.000000e+00> : vector<32xf32>
      %13 = vector.multi_reduction <add>, %12, %cst_10 [1] : vector<32x256xf32> to vector<32xf32>
      %14 = vector.shape_cast %13 : vector<32xf32> to vector<32x1xf32>
      %cst_11 = arith.constant 2.560000e+02 : f32
      %15 = vector.broadcast %cst_11 : f32 to vector<32x1xf32>
      %16 = arith.divf %14, %15 : vector<32x1xf32>
      %17 = vector.broadcast %16 : vector<32x1xf32> to vector<32x256xf32>
      %18 = arith.subf %12, %17 : vector<32x256xf32>
      %19 = arith.mulf %18, %18 : vector<32x256xf32>
      %cst_12 = arith.constant dense<0.000000e+00> : vector<32xf32>
      %20 = vector.multi_reduction <add>, %19, %cst_12 [1] : vector<32x256xf32> to vector<32xf32>
      %21 = vector.shape_cast %20 : vector<32xf32> to vector<32x1xf32>
      %cst_13 = arith.constant 2.560000e+02 : f32
      %22 = vector.broadcast %cst_13 : f32 to vector<32x1xf32>
      %23 = arith.divf %21, %22 : vector<32x1xf32>
      %24 = vector.broadcast %16 : vector<32x1xf32> to vector<32x256xf32>
      %25 = arith.subf %12, %24 : vector<32x256xf32>
      %cst_14 = arith.constant 9.99999997E-7 : f32
      %26 = vector.broadcast %cst_14 : f32 to vector<32x1xf32>
      %27 = arith.addf %23, %26 : vector<32x1xf32>
      %28 = math.rsqrt %27 : vector<32x1xf32>
      %29 = vector.broadcast %28 : vector<32x1xf32> to vector<32x256xf32>
      %30 = arith.mulf %25, %29 : vector<32x256xf32>
      %c0_15 = arith.constant 0 : index
      %c0_16 = arith.constant 0 : index
      %31 = vector.load %arg6[%c0_15, %c0_16] : memref<1x256xf32, #tpu.memory_space<vmem>>, vector<1x256xf32>
      %32 = vector.broadcast %31 : vector<1x256xf32> to vector<32x256xf32>
      %33 = arith.mulf %30, %32 : vector<32x256xf32>
      %c0_17 = arith.constant 0 : index
      %c0_18 = arith.constant 0 : index
      %34 = vector.load %arg7[%c0_17, %c0_18] : memref<1x256xf32, #tpu.memory_space<vmem>>, vector<1x256xf32>
      %35 = vector.broadcast %34 : vector<1x256xf32> to vector<32x256xf32>
      %36 = arith.addf %33, %35 : vector<32x256xf32>
      %37 = arith.truncf %36 : vector<32x256xf32> to vector<32x256xbf16>
      %c0_19 = arith.constant 0 : index
      %c0_20 = arith.constant 0 : index
      %38 = vector.load %arg9[%c0_19, %c0_20] : memref<32x256xbf16, #tpu.memory_space<vmem>>, vector<32x256xbf16>
      tpu.vector_store %arg9[%c0_19, %c0_20], %37 {strides = array<i32>} : memref<32x256xbf16, #tpu.memory_space<vmem>>, vector<32x256xbf16>,
    } else {
    }
    %c0 = arith.constant 0 : index
    %c0_1 = arith.constant 0 : index
    %3 = vector.load %arg9[%c0, %c0_1] : memref<32x256xbf16, #tpu.memory_space<vmem>>, vector<32x256xbf16>
    %c0_2 = arith.constant 0 : index
    %c0_3 = arith.constant 0 : index
    %4 = vector.load %arg4[%c0_2, %c0_3] : memref<256x256xbf16, #tpu.memory_space<vmem>>, vector<256x256xbf16>
    %cst = arith.constant dense<0.000000e+00> : vector<32x256xf32>
    %5 = tpu.matmul %3, %4, %cst {dimension_numbers = #tpu.dot_dimension_numbers<[1], [0], [0], [1], [0, 0, 1, 1], [], []>} : vector<32x256xbf16>, vector<256x256xbf16>, vector<32x256xf32> -> vector<32x256xf32>
    %c0_4 = arith.constant 0 : index
    %c0_5 = arith.constant 0 : index
    %6 = vector.load %arg5[%c0_4, %c0_5] : memref<1x256xf32, #tpu.memory_space<vmem>>, vector<1x256xf32>
    %7 = vector.broadcast %6 : vector<1x256xf32> to vector<32x256xf32>
    %8 = arith.addf %5, %7 : vector<32x256xf32>
    %9 = arith.truncf %8 : vector<32x256xf32> to vector<32x256xbf16>
    %c0_6 = arith.constant 0 : index
    %c0_7 = arith.constant 0 : index
    %10 = vector.load %arg8[%c0_6, %c0_7] : memref<32x256xbf16, #tpu.memory_space<vmem>>, vector<32x256xbf16>
    tpu.vector_store %arg8[%c0_6, %c0_7], %9 {strides = array<i32>} : memref<32x256xbf16, #tpu.memory_space<vmem>>, vector<32x256xbf16>,
    return
  }
  func.func @transform_0(%arg0: i32, %arg1: i32, %arg2: i32) -> (i32, i32) {
    %c0_i32 = arith.constant 0 : i32
    return %arg0, %arg2 : i32, i32
  }
  func.func @transform_1(%arg0: i32, %arg1: i32, %arg2: i32) -> (i32, i32) {
    %c0_i32 = arith.constant 0 : i32
    return %arg2, %arg1 : i32, i32
  }
  func.func @transform_2(%arg0: i32, %arg1: i32, %arg2: i32) -> (i32, i32) {
    %c0_i32 = arith.constant 0 : i32
    %c0_i32_0 = arith.constant 0 : i32
    return %c0_i32, %arg1 : i32, i32
  }
  func.func @transform_3(%arg0: i32, %arg1: i32, %arg2: i32) -> (i32, i32) {
    %c0_i32 = arith.constant 0 : i32
    %c0_i32_0 = arith.constant 0 : i32
    return %c0_i32, %arg2 : i32, i32
  }
  func.func @transform_4(%arg0: i32, %arg1: i32, %arg2: i32) -> (i32, i32) {
    %c0_i32 = arith.constant 0 : i32
    %c0_i32_0 = arith.constant 0 : i32
    return %c0_i32, %arg2 : i32, i32
  }
  func.func @transform_5(%arg0: i32, %arg1: i32, %arg2: i32) -> (i32, i32) {
    %c0_i32 = arith.constant 0 : i32
    return %arg0, %arg1 : i32, i32
  }
}

module attributes {stable_mosaic.version = 11 : i64} {
  func.func @_fused_linear_kernel(%arg0: i32, %arg1: i32, %arg2: i32, %arg3: memref<32x256xbf16, #tpu.memory_space<vmem>>, %arg4: memref<256x512xbf16, #tpu.memory_space<vmem>>, %arg5: memref<1x512xf32, #tpu.memory_space<vmem>>, %arg6: memref<1x256xf32, #tpu.memory_space<vmem>>, %arg7: memref<1x256xf32, #tpu.memory_space<vmem>>, %arg8: memref<32x512xbf16, #tpu.memory_space<vmem>>, %arg9: memref<32x256xbf16, #tpu.memory_space<vmem>>) attributes {dimension_semantics = [#tpu.dimension_semantics<parallel>, #tpu.dimension_semantics<arbitrary>, #tpu.dimension_semantics<arbitrary>], iteration_bounds = array<i64: 1, 2, 1>, scalar_prefetch = 0 : i64, scratch_operands = 1 : i64, tpu.core_type = #tpu.core_type<tc>, window_params = [{transform_indices = @transform_0, window_bounds = array<i64: 32, 256>}, {transform_indices = @transform_1, window_bounds = array<i64: 256, 512>}, {transform_indices = @transform_2, window_bounds = array<i64: 1, 512>}, {transform_indices = @transform_3, window_bounds = array<i64: 1, 256>}, {transform_indices = @transform_4, window_bounds = array<i64: 1, 256>}, {transform_indices = @transform_5, window_bounds = array<i64: 32, 512>}]} {
    %c0_i32 = arith.constant 0 : i32
    %0 = arith.cmpi eq, %arg1, %c0_i32 : i32
    %1 = arith.extui %0 : i1 to i32
    %c0_i32_0 = arith.constant 0 : i32
    %2 = arith.cmpi ne, %1, %c0_i32_0 : i32
    scf.if %2 {
      %c0_12 = arith.constant 0 : index
      %c0_13 = arith.constant 0 : index
      %24 = vector.load %arg3[%c0_12, %c0_13] : memref<32x256xbf16, #tpu.memory_space<vmem>>, vector<32x256xbf16>
      %25 = arith.extf %24 : vector<32x256xbf16> to vector<32x256xf32>
      %cst_14 = arith.constant dense<0.000000e+00> : vector<32xf32>
      %26 = vector.multi_reduction <add>, %25, %cst_14 [1] : vector<32x256xf32> to vector<32xf32>
      %27 = vector.shape_cast %26 : vector<32xf32> to vector<32x1xf32>
      %cst_15 = arith.constant 2.560000e+02 : f32
      %28 = vector.broadcast %cst_15 : f32 to vector<32x1xf32>
      %29 = arith.divf %27, %28 : vector<32x1xf32>
      %30 = vector.broadcast %29 : vector<32x1xf32> to vector<32x256xf32>
      %31 = arith.subf %25, %30 : vector<32x256xf32>
      %32 = arith.mulf %31, %31 : vector<32x256xf32>
      %cst_16 = arith.constant dense<0.000000e+00> : vector<32xf32>
      %33 = vector.multi_reduction <add>, %32, %cst_16 [1] : vector<32x256xf32> to vector<32xf32>
      %34 = vector.shape_cast %33 : vector<32xf32> to vector<32x1xf32>
      %cst_17 = arith.constant 2.560000e+02 : f32
      %35 = vector.broadcast %cst_17 : f32 to vector<32x1xf32>
      %36 = arith.divf %34, %35 : vector<32x1xf32>
      %37 = vector.broadcast %29 : vector<32x1xf32> to vector<32x256xf32>
      %38 = arith.subf %25, %37 : vector<32x256xf32>
      %cst_18 = arith.constant 9.99999997E-7 : f32
      %39 = vector.broadcast %cst_18 : f32 to vector<32x1xf32>
      %40 = arith.addf %36, %39 : vector<32x1xf32>
      %41 = math.rsqrt %40 : vector<32x1xf32>
      %42 = vector.broadcast %41 : vector<32x1xf32> to vector<32x256xf32>
      %43 = arith.mulf %38, %42 : vector<32x256xf32>
      %c0_19 = arith.constant 0 : index
      %c0_20 = arith.constant 0 : index
      %44 = vector.load %arg6[%c0_19, %c0_20] : memref<1x256xf32, #tpu.memory_space<vmem>>, vector<1x256xf32>
      %45 = vector.broadcast %44 : vector<1x256xf32> to vector<32x256xf32>
      %46 = arith.mulf %43, %45 : vector<32x256xf32>
      %c0_21 = arith.constant 0 : index
      %c0_22 = arith.constant 0 : index
      %47 = vector.load %arg7[%c0_21, %c0_22] : memref<1x256xf32, #tpu.memory_space<vmem>>, vector<1x256xf32>
      %48 = vector.broadcast %47 : vector<1x256xf32> to vector<32x256xf32>
      %49 = arith.addf %46, %48 : vector<32x256xf32>
      %50 = arith.truncf %49 : vector<32x256xf32> to vector<32x256xbf16>
      %c0_23 = arith.constant 0 : index
      %c0_24 = arith.constant 0 : index
      %51 = vector.load %arg9[%c0_23, %c0_24] : memref<32x256xbf16, #tpu.memory_space<vmem>>, vector<32x256xbf16>
      tpu.vector_store %arg9[%c0_23, %c0_24], %50 {strides = array<i32>} : memref<32x256xbf16, #tpu.memory_space<vmem>>, vector<32x256xbf16>,
    } else {
    }
    %c0 = arith.constant 0 : index
    %c0_1 = arith.constant 0 : index
    %3 = vector.load %arg9[%c0, %c0_1] : memref<32x256xbf16, #tpu.memory_space<vmem>>, vector<32x256xbf16>
    %c0_2 = arith.constant 0 : index
    %c0_3 = arith.constant 0 : index
    %4 = vector.load %arg4[%c0_2, %c0_3] : memref<256x512xbf16, #tpu.memory_space<vmem>>, vector<256x512xbf16>
    %cst = arith.constant dense<0.000000e+00> : vector<32x512xf32>
    %5 = tpu.matmul %3, %4, %cst {dimension_numbers = #tpu.dot_dimension_numbers<[1], [0], [0], [1], [0, 0, 1, 1], [], []>} : vector<32x256xbf16>, vector<256x512xbf16>, vector<32x512xf32> -> vector<32x512xf32>
    %c0_4 = arith.constant 0 : index
    %c0_5 = arith.constant 0 : index
    %6 = vector.load %arg5[%c0_4, %c0_5] : memref<1x512xf32, #tpu.memory_space<vmem>>, vector<1x512xf32>
    %7 = vector.broadcast %6 : vector<1x512xf32> to vector<32x512xf32>
    %8 = arith.addf %5, %7 : vector<32x512xf32>
    %cst_6 = arith.constant 5.000000e-01 : f32
    %9 = vector.broadcast %cst_6 : f32 to vector<32x512xf32>
    %10 = arith.mulf %9, %8 : vector<32x512xf32>
    %cst_7 = arith.constant 4.471500e-02 : f32
    %11 = vector.broadcast %cst_7 : f32 to vector<32x512xf32>
    %12 = arith.mulf %11, %8 : vector<32x512xf32>
    %13 = arith.mulf %12, %8 : vector<32x512xf32>
    %14 = arith.mulf %13, %8 : vector<32x512xf32>
    %15 = arith.addf %8, %14 : vector<32x512xf32>
    %cst_8 = arith.constant 0.797884583 : f32
    %16 = vector.broadcast %cst_8 : f32 to vector<32x512xf32>
    %17 = arith.mulf %16, %15 : vector<32x512xf32>
    %18 = math.tanh %17 : vector<32x512xf32>
    %cst_9 = arith.constant 1.000000e+00 : f32
    %19 = vector.broadcast %cst_9 : f32 to vector<32x512xf32>
    %20 = arith.addf %19, %18 : vector<32x512xf32>
    %21 = arith.mulf %10, %20 : vector<32x512xf32>
    %22 = arith.truncf %21 : vector<32x512xf32> to vector<32x512xbf16>
    %c0_10 = arith.constant 0 : index
    %c0_11 = arith.constant 0 : index
    %23 = vector.load %arg8[%c0_10, %c0_11] : memref<32x512xbf16, #tpu.memory_space<vmem>>, vector<32x512xbf16>
    tpu.vector_store %arg8[%c0_10, %c0_11], %22 {strides = array<i32>} : memref<32x512xbf16, #tpu.memory_space<vmem>>, vector<32x512xbf16>,
    return
  }
  func.func @transform_0(%arg0: i32, %arg1: i32, %arg2: i32) -> (i32, i32) {
    %c0_i32 = arith.constant 0 : i32
    return %arg0, %arg2 : i32, i32
  }
  func.func @transform_1(%arg0: i32, %arg1: i32, %arg2: i32) -> (i32, i32) {
    %c0_i32 = arith.constant 0 : i32
    return %arg2, %arg1 : i32, i32
  }
  func.func @transform_2(%arg0: i32, %arg1: i32, %arg2: i32) -> (i32, i32) {
    %c0_i32 = arith.constant 0 : i32
    %c0_i32_0 = arith.constant 0 : i32
    return %c0_i32, %arg1 : i32, i32
  }
  func.func @transform_3(%arg0: i32, %arg1: i32, %arg2: i32) -> (i32, i32) {
    %c0_i32 = arith.constant 0 : i32
    %c0_i32_0 = arith.constant 0 : i32
    return %c0_i32, %arg2 : i32, i32
  }
  func.func @transform_4(%arg0: i32, %arg1: i32, %arg2: i32) -> (i32, i32) {
    %c0_i32 = arith.constant 0 : i32
    %c0_i32_0 = arith.constant 0 : i32
    return %c0_i32, %arg2 : i32, i32
  }
  func.func @transform_5(%arg0: i32, %arg1: i32, %arg2: i32) -> (i32, i32) {
    %c0_i32 = arith.constant 0 : i32
    return %arg0, %arg1 : i32, i32
  }
}

module attributes {stable_mosaic.version = 11 : i64} {
  func.func @_layernorm_kernel(%arg0: i32, %arg1: memref<32x256xbf16, #tpu.memory_space<vmem>>, %arg2: memref<1x256xf32, #tpu.memory_space<vmem>>, %arg3: memref<1x256xf32, #tpu.memory_space<vmem>>, %arg4: memref<32x256xf32, #tpu.memory_space<vmem>>) attributes {dimension_semantics = [#tpu.dimension_semantics<parallel>], iteration_bounds = array<i64: 1>, scalar_prefetch = 0 : i64, scratch_operands = 0 : i64, tpu.core_type = #tpu.core_type<tc>, window_params = [{transform_indices = @transform_0, window_bounds = array<i64: 32, 256>}, {pipeline_mode = #tpu.pipeline_mode<synchronous>, transform_indices = @transform_1, window_bounds = array<i64: 1, 256>}, {pipeline_mode = #tpu.pipeline_mode<synchronous>, transform_indices = @transform_2, window_bounds = array<i64: 1, 256>}, {transform_indices = @transform_3, window_bounds = array<i64: 32, 256>}]} {
    %c0 = arith.constant 0 : index
    %c0_0 = arith.constant 0 : index
    %0 = vector.load %arg1[%c0, %c0_0] : memref<32x256xbf16, #tpu.memory_space<vmem>>, vector<32x256xbf16>
    %1 = arith.extf %0 : vector<32x256xbf16> to vector<32x256xf32>
    %cst = arith.constant dense<0.000000e+00> : vector<32xf32>
    %2 = vector.multi_reduction <add>, %1, %cst [1] : vector<32x256xf32> to vector<32xf32>
    %3 = vector.shape_cast %2 : vector<32xf32> to vector<32x1xf32>
    %cst_1 = arith.constant 2.560000e+02 : f32
    %4 = vector.broadcast %cst_1 : f32 to vector<32x1xf32>
    %5 = arith.divf %3, %4 : vector<32x1xf32>
    %6 = vector.broadcast %5 : vector<32x1xf32> to vector<32x256xf32>
    %7 = arith.subf %1, %6 : vector<32x256xf32>
    %8 = arith.mulf %7, %7 : vector<32x256xf32>
    %cst_2 = arith.constant dense<0.000000e+00> : vector<32xf32>
    %9 = vector.multi_reduction <add>, %8, %cst_2 [1] : vector<32x256xf32> to vector<32xf32>
    %10 = vector.shape_cast %9 : vector<32xf32> to vector<32x1xf32>
    %cst_3 = arith.constant 2.560000e+02 : f32
    %11 = vector.broadcast %cst_3 : f32 to vector<32x1xf32>
    %12 = arith.divf %10, %11 : vector<32x1xf32>
    %13 = vector.broadcast %5 : vector<32x1xf32> to vector<32x256xf32>
    %14 = arith.subf %1, %13 : vector<32x256xf32>
    %cst_4 = arith.constant 9.99999997E-7 : f32
    %15 = vector.broadcast %cst_4 : f32 to vector<32x1xf32>
    %16 = arith.addf %12, %15 : vector<32x1xf32>
    %17 = math.rsqrt %16 : vector<32x1xf32>
    %18 = vector.broadcast %17 : vector<32x1xf32> to vector<32x256xf32>
    %19 = arith.mulf %14, %18 : vector<32x256xf32>
    %c0_5 = arith.constant 0 : index
    %c0_6 = arith.constant 0 : index
    %20 = vector.load %arg2[%c0_5, %c0_6] : memref<1x256xf32, #tpu.memory_space<vmem>>, vector<1x256xf32>
    %21 = vector.broadcast %20 : vector<1x256xf32> to vector<32x256xf32>
    %22 = arith.mulf %19, %21 : vector<32x256xf32>
    %c0_7 = arith.constant 0 : index
    %c0_8 = arith.constant 0 : index
    %23 = vector.load %arg3[%c0_7, %c0_8] : memref<1x256xf32, #tpu.memory_space<vmem>>, vector<1x256xf32>
    %24 = vector.broadcast %23 : vector<1x256xf32> to vector<32x256xf32>
    %25 = arith.addf %22, %24 : vector<32x256xf32>
    %c0_9 = arith.constant 0 : index
    %c0_10 = arith.constant 0 : index
    %26 = vector.load %arg4[%c0_9, %c0_10] : memref<32x256xf32, #tpu.memory_space<vmem>>, vector<32x256xf32>
    tpu.vector_store %arg4[%c0_9, %c0_10], %25 {strides = array<i32>} : memref<32x256xf32, #tpu.memory_space<vmem>>, vector<32x256xf32>,
    return
  }
  func.func @transform_0(%arg0: i32) -> (i32, i32) {
    %c0_i32 = arith.constant 0 : i32
    %c0_i32_0 = arith.constant 0 : i32
    return %arg0, %c0_i32 : i32, i32
  }
  func.func @transform_1(%arg0: i32) -> (i32, i32) {
    %c0_i32 = arith.constant 0 : i32
    %c0_i32_0 = arith.constant 0 : i32
    %c0_i32_1 = arith.constant 0 : i32
    return %c0_i32, %c0_i32_0 : i32, i32
  }
  func.func @transform_2(%arg0: i32) -> (i32, i32) {
    %c0_i32 = arith.constant 0 : i32
    %c0_i32_0 = arith.constant 0 : i32
    %c0_i32_1 = arith.constant 0 : i32
    return %c0_i32, %c0_i32_0 : i32, i32
  }
  func.func @transform_3(%arg0: i32) -> (i32, i32) {
    %c0_i32 = arith.constant 0 : i32
    %c0_i32_0 = arith.constant 0 : i32
    return %arg0, %c0_i32 : i32, i32
  }
}

module attributes {stable_mosaic.version = 11 : i64} {
  func.func @_fused_linear_kernel(%arg0: i32, %arg1: i32, %arg2: i32, %arg3: memref<32x512xbf16, #tpu.memory_space<vmem>>, %arg4: memref<512x256xbf16, #tpu.memory_space<vmem>>, %arg5: memref<1x256xf32, #tpu.memory_space<vmem>>, %arg6: memref<32x256xbf16, #tpu.memory_space<vmem>>, %arg7: memref<32x256xbf16, #tpu.memory_space<vmem>>, %arg8: memref<32x256xf32, #tpu.memory_space<vmem>>) attributes {dimension_semantics = [#tpu.dimension_semantics<parallel>, #tpu.dimension_semantics<parallel>, #tpu.dimension_semantics<arbitrary>], iteration_bounds = array<i64: 1, 1, 2>, scalar_prefetch = 0 : i64, scratch_operands = 1 : i64, tpu.core_type = #tpu.core_type<tc>, window_params = [{transform_indices = @transform_0, window_bounds = array<i64: 32, 512>}, {transform_indices = @transform_1, window_bounds = array<i64: 512, 256>}, {transform_indices = @transform_2, window_bounds = array<i64: 1, 256>}, {transform_indices = @transform_3, window_bounds = array<i64: 32, 256>}, {transform_indices = @transform_4, window_bounds = array<i64: 32, 256>}]} {
    %c0 = arith.constant 0 : index
    %c0_0 = arith.constant 0 : index
    %0 = vector.load %arg3[%c0, %c0_0] : memref<32x512xbf16, #tpu.memory_space<vmem>>, vector<32x512xbf16>
    %c0_1 = arith.constant 0 : index
    %c0_2 = arith.constant 0 : index
    %1 = vector.load %arg4[%c0_1, %c0_2] : memref<512x256xbf16, #tpu.memory_space<vmem>>, vector<512x256xbf16>
    %cst = arith.constant dense<0.000000e+00> : vector<32x256xf32>
    %2 = tpu.matmul %0, %1, %cst {dimension_numbers = #tpu.dot_dimension_numbers<[1], [0], [0], [1], [0, 0, 1, 1], [], []>} : vector<32x512xbf16>, vector<512x256xbf16>, vector<32x256xf32> -> vector<32x256xf32>
    %c0_i32 = arith.constant 0 : i32
    %3 = arith.cmpi eq, %arg2, %c0_i32 : i32
    %4 = arith.extui %3 : i1 to i32
    %c0_i32_3 = arith.constant 0 : i32
    %5 = arith.cmpi ne, %4, %c0_i32_3 : i32
    scf.if %5 {
      %cst_9 = arith.constant 0.000000e+00 : f32
      %12 = vector.broadcast %cst_9 : f32 to vector<32x256xf32>
      %c0_10 = arith.constant 0 : index
      %c0_11 = arith.constant 0 : index
      %13 = vector.load %arg8[%c0_10, %c0_11] : memref<32x256xf32, #tpu.memory_space<vmem>>, vector<32x256xf32>
      tpu.vector_store %arg8[%c0_10, %c0_11], %12 {strides = array<i32>} : memref<32x256xf32, #tpu.memory_space<vmem>>, vector<32x256xf32>,
    } else {
    }
    %c0_4 = arith.constant 0 : index
    %c0_5 = arith.constant 0 : index
    %6 = vector.load %arg8[%c0_4, %c0_5] : memref<32x256xf32, #tpu.memory_space<vmem>>, vector<32x256xf32>
    %7 = arith.addf %6, %2 : vector<32x256xf32>
    %c0_6 = arith.constant 0 : index
    %c0_7 = arith.constant 0 : index
    %8 = vector.load %arg8[%c0_6, %c0_7] : memref<32x256xf32, #tpu.memory_space<vmem>>, vector<32x256xf32>
    tpu.vector_store %arg8[%c0_6, %c0_7], %7 {strides = array<i32>} : memref<32x256xf32, #tpu.memory_space<vmem>>, vector<32x256xf32>,
    %c1_i32 = arith.constant 1 : i32
    %9 = arith.cmpi eq, %arg2, %c1_i32 : i32
    %10 = arith.extui %9 : i1 to i32
    %c0_i32_8 = arith.constant 0 : i32
    %11 = arith.cmpi ne, %10, %c0_i32_8 : i32
    scf.if %11 {
      %c0_9 = arith.constant 0 : index
      %c0_10 = arith.constant 0 : index
      %12 = vector.load %arg8[%c0_9, %c0_10] : memref<32x256xf32, #tpu.memory_space<vmem>>, vector<32x256xf32>
      %c0_11 = arith.constant 0 : index
      %c0_12 = arith.constant 0 : index
      %13 = vector.load %arg5[%c0_11, %c0_12] : memref<1x256xf32, #tpu.memory_space<vmem>>, vector<1x256xf32>
      %14 = vector.broadcast %13 : vector<1x256xf32> to vector<32x256xf32>
      %15 = arith.addf %12, %14 : vector<32x256xf32>
      %c0_13 = arith.constant 0 : index
      %c0_14 = arith.constant 0 : index
      %16 = vector.load %arg6[%c0_13, %c0_14] : memref<32x256xbf16, #tpu.memory_space<vmem>>, vector<32x256xbf16>
      %17 = arith.extf %16 : vector<32x256xbf16> to vector<32x256xf32>
      %18 = arith.addf %15, %17 : vector<32x256xf32>
      %19 = arith.truncf %18 : vector<32x256xf32> to vector<32x256xbf16>
      %c0_15 = arith.constant 0 : index
      %c0_16 = arith.constant 0 : index
      %20 = vector.load %arg7[%c0_15, %c0_16] : memref<32x256xbf16, #tpu.memory_space<vmem>>, vector<32x256xbf16>
      tpu.vector_store %arg7[%c0_15, %c0_16], %19 {strides = array<i32>} : memref<32x256xbf16, #tpu.memory_space<vmem>>, vector<32x256xbf16>,
    } else {
    }
    return
  }
  func.func @transform_0(%arg0: i32, %arg1: i32, %arg2: i32) -> (i32, i32) {
    %c0_i32 = arith.constant 0 : i32
    return %arg0, %arg2 : i32, i32
  }
  func.func @transform_1(%arg0: i32, %arg1: i32, %arg2: i32) -> (i32, i32) {
    %c0_i32 = arith.constant 0 : i32
    return %arg2, %arg1 : i32, i32
  }
  func.func @transform_2(%arg0: i32, %arg1: i32, %arg2: i32) -> (i32, i32) {
    %c0_i32 = arith.constant 0 : i32
    %c0_i32_0 = arith.constant 0 : i32
    return %c0_i32, %arg1 : i32, i32
  }
  func.func @transform_3(%arg0: i32, %arg1: i32, %arg2: i32) -> (i32, i32) {
    %c0_i32 = arith.constant 0 : i32
    return %arg0, %arg1 : i32, i32
  }
  func.func @transform_4(%arg0: i32, %arg1: i32, %arg2: i32) -> (i32, i32) {
    %c0_i32 = arith.constant 0 : i32
    return %arg0, %arg1 : i32, i32
  }
}

</mosaic_0001>

<bundles_post_ra>
// kernel: _lambda_.12
= control target key start
LH: loop header
LB: loop body
LE: loop exit
PB: predicated region body
PF: predicated region fallthrough
CT: control target
= control target key end

     0   :  { %s696_s15 = smov 0   ;;  %s698_s16 = smov 0   ;;  %s769_s0 = inlined_call_operand.vmem [shape: f32[32,48], index: 0, kind: input, shape index: {}]   ;;  %s770_s1 = inlined_call_operand.vmem [shape: bf16[48,256], index: 1, kind: input, shape index: {}]   ;;  %s771_s2 = inlined_call_operand.vmem [shape: f32[1,256], index: 2, kind: input, shape index: {}]   ;;  %s772_s3 = inlined_call_operand.vmem [shape: f32[16,256], index: 3, kind: input, shape index: {}]   ;;  %s773_s4 = inlined_call_operand.vmem [shape: bf16[32,256], index: 4, kind: output, shape index: {}]  }
   0x1   :  { %s700_s17 = smov 0  }
   0x2 LB: > { %s33_s18 = sadd.s32 1, %s664_s16  ;;  %p592_p0 = scmp.ge.s32.totalorder %s668_s17, 1  ;;  %s668_s17 = sphi %s700_s17, %s14_s17   ;;  %s664_s16 = sphi %s698_s16, %s775_s16   ;;  %s660_s15 = sphi %s696_s15, %s774_s15  }
   0x3   : > { %p35_p1 = scmp.ge.s32.totalorder %s33_s18, 2  ;;  %p229_p2 = scmp.lt.s32.totalorder %s668_s17, 3 }
   0x5   : > { %s777_s18 = smov (%p35_p1, %s33_s18), 0  ;;  %p230_p3 = pnand %p592_p0, %p229_p2 }
   0x6   : > { %v637_v0 = vld [vmem:[%s770_s1 + $0x4] ss:$8 sps:$4 sm:$0xff] (!%p230_p3)   ;;  %s593_s21 = sshll.u32 (!%p230_p3), %s660_s15, 1  ;;  %v639_v1 = vld [vmem:[%s770_s1] ss:$8 sps:$4 sm:$0xff] (!%p230_p3)   ;;  %v670_v2 = vmov (!%p230_p3), 0   ;;  %v338_v10 = vlaneseq (!%p230_p3) }
   0x7   : > { %233 = sbr.rel (%p230_p3) target bundleno = 242 (0xf2), region = 36  ;;  %414 = vmatprep.mubr.bf16.mxu0 (!%p230_p3), %v670_v2  ;;  %p283_p4 = scmp.lt.s32.totalorder (!%p230_p3), %s593_s21, 3  ;;  %382 = vmatprep.subr.bf16.mxu0 (!%p230_p3), %v637_v0  ;;  %v640_v3 = vld [vmem:[%s770_s1 + $0x14] ss:$8 sps:$4 sm:$0xff] (!%p230_p3)   ;;  %v642_v4 = vld [vmem:[%s770_s1 + $0x10] ss:$8 sps:$4 sm:$0xff] (!%p230_p3)  }
   0x8   : > { %383 = vmatpush1.bf16.msra.mxu0 (!%p230_p3), %v639_v1  ;;  %v643_v5 = vld [vmem:[%s770_s1 + $0x24] ss:$8 sps:$4 sm:$0xff] (!%p230_p3)   ;;  %v645_v6 = vld [vmem:[%s770_s1 + $0x20] ss:$8 sps:$4 sm:$0xff] (!%p230_p3)   ;;  %vm378_vm0 = vcmask (!%p230_p3), 392192   ;;  %v339_v11 = vshrl.u32 (!%p230_p3), %v338_v10, 7 }
   0x9   : > { %384 = vmatprep.subr.bf16.mxu0 (!%p230_p3), %v640_v3  ;;  %v336_v13 = vld [vmem:[%s771_s2] sm:$0x3] (!%p230_p3)  ;;  %v426_v21 = vld [vmem:[%s772_s3 + $0x8] sm:$0xff] (!%p230_p3)  ;;  %v427_v24 = vld [vmem:[%s772_s3 + $0x10] sm:$0xff] (!%p230_p3) }
   0xa   : > { %v340_v12 = vsub.s32 (!%p230_p3), 0, %v339_v11  ;;  %v344_v14 = vsub.s32 (!%p230_p3), 1, %v339_v11  ;;  %v425_v18 = vld [vmem:[%s772_s3] sm:$0xff] (!%p230_p3)  ;;  %v428_v28 = vld [vmem:[%s772_s3 + $0x18] sm:$0xff] (!%p230_p3) }
   0xc   : > { %385 = vmatpush1.bf16.msra.mxu0 (!%p230_p3), %v642_v4  ;;  %v341_v15 = vrot.slane (!%p230_p3), %v336_v13, %v340_v12  ;;  %v345_v16 = vrot.slane (!%p230_p3), %v336_v13, %v344_v14 }
   0xd   : > { %386 = vmatprep.subr.bf16.mxu0 (!%p230_p3), %v643_v5 }
   0xe   : > { %s779_s21 = smov (!%p283_p4, %s593_s21), 3 }
   0xf   : > { %s594_s30 = sshll.u32 %s779_s21, 3 }
  0x10   : > { %s289_s7 = scalar_lea.vmem %s769_s0, %s594_s30  ;;  %387 = vmatpush1.bf16.msra.mxu0 %v645_v6  ;;  %s323_s26 = scalar_lea.vmem %s773_s4, %s594_s30 }
  0x11   : > { %v327_v7 = vld [vmem:[%s289_s7] sm:$0xff]  ;;  %v328_v8 = vld [vmem:[%s289_s7 + $0x8] sm:$0xff] }
  0x12   : > { %v329_v9 = vpack.c.bf16 %v328_v8, %v327_v7 }
  0x14   : > { %604 = vmatmul.mubr.msk.bf16.vlgmr.msra.gmra.mrb[0].mxu0 %vm378_vm0, %v329_v9 }
  0xe7   : > { %v416_v17 = vpop.f32.mrb[0].mxu0 }
  0xe8   : > { %v417_v19 = vadd.f32 %v416_v17, %v341_v15  ;;  %v418_v20 = vpop.f32.mrb[1].mxu0 }
  0xe9   : > { %v419_v22 = vadd.f32 %v418_v20, %v345_v16  ;;  %v420_v23 = vpop.f32.mrb[2].mxu0 }
  0xea   : > { %v429_v25 = vadd.f32 %v425_v18, %v417_v19  ;;  %v421_v26 = vadd.f32 %v420_v23, %v341_v15  ;;  %v422_v27 = vpop.f32.mrb[3].mxu0 }
  0xeb   : > { %v430_v29 = vadd.f32 %v426_v21, %v419_v22  ;;  %v423_v30 = vadd.f32 %v422_v27, %v345_v16 }
  0xec   : > { %v431_v31 = vadd.f32 %v427_v24, %v421_v26 }
  0xed   : > { %v610_v32 = vpack.c.bf16 %v430_v29, %v429_v25  ;;  %v432_v33 = vadd.f32 %v428_v28, %v423_v30 }
  0xef   : > { %445 = vst [vmem:[%s323_s26] sm:$0xff] %v610_v32  ;;  %v611_v34 = vpack.c.bf16 %v432_v33, %v431_v31 }
  0xf1   : > { %446 = vst [vmem:[%s323_s26 + $0x8] sm:$0xff] %v611_v34 }
  0xf2 PF: > { %s14_s17 = sadd.s32 1, %s668_s17   ;;  %s774_s15 = smov %s664_s16 }
  0xf3   : > { %p11_p5 = scmp.ge.s32.totalorder %s14_s17, 4   ;;  %s775_s16 = smov %s777_s18 }
  0xf5   :  { %13 = sbr.rel (!%p11_p5) target bundleno = 2 (0x2), region = 75 }

// kernel: _lambda_.14
= control target key start
LH: loop header
LB: loop body
LE: loop exit
PB: predicated region body
PF: predicated region fallthrough
CT: control target
= control target key end

     0   :  { %s1515_s0 = inlined_call_operand.hbm [shape: bf16[2,16,768], index: 0, kind: input, shape index: {}, may-alias: {0,1,2}]   ;;  %s1516_s1 = inlined_call_operand.hbm [shape: bf16[2,16,768], index: 1, kind: input, shape index: {}, may-alias: {0,1,2}]   ;;  %s1517_s2 = inlined_call_operand.hbm [shape: bf16[2,16,768], index: 2, kind: input, shape index: {}, may-alias: {0,1,2}]   ;;  %s1518_s3 = inlined_call_operand.hbm [shape: bf16[2,16,256], index: 3, kind: output, shape index: {}]  }
   0x1   :  { %1540 = sst [smem:[#allocation23_spill]] %s1515_s0 }
   0x2   :  { %1541 = sst [smem:[#allocation24_spill]] %s1516_s1 }
   0x3   :  { %1542 = sst [smem:[#allocation25_spill]] %s1518_s3 }
   0x4   :  { %8 = vsyncpa [#allocation3], 0 }
   0x5   :  { %10 = vsyncpa [#allocation3 + $0x1], 0 }
   0x6   :  { %11 = vsyncpa [#allocation6], 0 }
   0x7   :  { %13 = vsyncpa [#allocation6 + $0x1], 0 }
   0x8   :  { %14 = vsyncpa [#allocation4], 0 }
   0x9   :  { %16 = vsyncpa [#allocation4 + $0x1], 0  ;;  %s1078_s12 = smov 0   ;;  %s1080_s13 = smov 0  }
   0xa   :  { %s1082_s14 = smov 0   ;;  %s1084_s15 = smov 0  }
   0xb   :  { %s1086_s16 = smov 0   ;;  %s1088_s17 = smov 0  }
   0xc   :  { %s1090_s18 = smov 0   ;;  %s1092_s19 = smov 0  }
   0xd   :  { %s1094_s20 = smov 0   ;;  %s1096_s21 = smov 0  }
   0xe   :  { %s1098_s22 = smov 0   ;;  %s1100_s23 = smov 0  }
   0xf   :  { %s1102_s24 = smov 0   ;;  %s1104_s25 = smov 0  }
  0x10 LB: > { %1543 = sst [smem:[#allocation13_spill]] %s1008_s16  ;;  %s1149_s26 = sadd.s32 4294967295, %s1044_s25   ;;  %s1044_s25 = sphi %s1104_s25, %s22_s25   ;;  %s1040_s24 = sphi %s1102_s24, %s1595_s24   ;;  %s1036_s23 = sphi %s1100_s23, %s1594_s23   ;;  %s1032_s22 = sphi %s1098_s22, %s1593_s22   ;;  %s1028_s21 = sphi %s1096_s21, %s1592_s21   ;;  %s1024_s20 = sphi %s1094_s20, %s1591_s20   ;;  %s1020_s19 = sphi %s1092_s19, %s1602_s19   ;;  %s1016_s18 = sphi %s1090_s18, %s1601_s18   ;;  %s1012_s17 = sphi %s1088_s17, %s1600_s17   ;;  %s1008_s16 = sphi %s1086_s16, %s1599_s16   ;;  %s1004_s15 = sphi %s1084_s15, %s1589_s15   ;;  %s1000_s14 = sphi %s1082_s14, %s1598_s14   ;;  %s996_s13 = sphi %s1080_s13, %s1597_s13   ;;  %s992_s12 = sphi %s1078_s12, %s1596_s12  }
  0x11   : > { %1544 = sst [smem:[#allocation14_spill]] %s1024_s20  ;;  %s31_s27 = sadd.s32 1, %s1036_s23 }
  0x12   : > { %1545 = sst [smem:[#allocation15_spill]] %s1028_s21  ;;  %p32_p0 = scmp.ge.s32.totalorder %s31_s27, 2 }
  0x13   : > { %1546 = sst [smem:[#allocation16_spill]] %s1032_s22  ;;  %s34_s28 = sadd.s32 1, %s1040_s24 }
  0x14   : > { %1547 = sst [smem:[#allocation17_spill]] %s1036_s23  ;;  %p1526_p1 = scmp.eq.s32.totalorder %s1044_s25, 0 }
  0x15   : > { %1548 = sst [smem:[#allocation18_spill]] %s1040_s24  ;;  %p1525_p2 = scmp.eq.s32.totalorder %s1149_s26, 0 }
  0x16   : > { %s1604_s27 = smov (%p32_p0, %s31_s27), 0  ;;  %s1606_s28 = smov (!%p32_p0, %s34_s28), %s1040_s24 }
  0x17   : > { %1549 = sst [smem:[#allocation19_spill]] %s1604_s27  ;;  %s66_s29 = sadd.s32 2, %s1036_s23 }
  0x18   : > { %s67_s30 = sadd.s32 2, %s1604_s27  ;;  %p36_p3 = scmp.ge.s32.totalorder %s1606_s28, 2 }
  0x19   : > { %s69_s4 = ssub.s32 %s66_s29, %s67_s30  ;;  %s73_s5 = sadd.s32 1, %s1012_s17 }
  0x1a   : > { %p80_p4 = scmp.ne.s32.totalorder %s1012_s17, %s1008_s16  ;;  %s1608_s28 = smov (%p36_p3, %s1606_s28), 0 }
  0x1b   : > { %1550 = sst [smem:[#allocation20_spill]] %s1608_s28  ;;  %p86_p6 = scmp.ne.s32.totalorder %s1008_s16, %s1004_s15 }
  0x1c   : > { %p1167_p5 = por %p80_p4, %p1526_p1  ;;  %s1175_s7 = ssub.s32 %s1040_s24, %s1608_s28 }
  0x1d   : > { %s96_s8 = sadd.s32 4, %s1036_s23  ;;  %s70_s9 = sor.u32 %s69_s4, %s1175_s7 }
  0x1e   : > { %p1181_p7 = por %p86_p6, %p1525_p2  ;;  %p71_p8 = scmp.eq.s32.totalorder %s70_s9, 0 }
  0x1f   : > { %s97_s11 = sadd.s32 4, %s1604_s27  ;;  %p1524_p9 = scmp.lt.s32.totalorder %s1044_s25, 4 }
  0x20   : > { %s1552_s10 = scalar_select %p1181_p7, 1, 0 }
  0x21   : > { %s99_s29 = ssub.s32 %s96_s8, %s97_s11  ;;  %s642_s4 = smul.u32 12, %s1040_s24 }
  0x22   : > { %1553 = sst [smem:[#allocation21_spill]] %s1552_s10  ;;  %s100_s15 = sor.u32 %s99_s29, %s1175_s7 }
  0x23   : > { %s1187_s30 = scalar_select %p71_p8, %s1012_s17, %s73_s5  }
  0x24   : > { %p1191_p10 = scmp.eq.s32.totalorder %s100_s15, 0  ;;  %s177_s3 = sadd.s32 %s1036_s23, %s642_s4 }
  0x25   : > { %s1197_s21 = sshll.u32 %s177_s3, 6  ;;  %s190_s9 = sand.u32 1, %s1044_s25  }
  0x26   : > { %s192_s22 = sand.u32 1, %s1012_s17   ;;  %s1555_s1 = sld [smem:[#allocation24_spill]] }
  0x27   : > { %s599_s10 = sshll.u32 %s192_s22, 3  ;;  %p1211_p11 = pnand %p1524_p9, %p1167_p5 }
  0x28   : > { %s194_s29 = scalar_lea.vmem [#allocation5], %s599_s10  ;;  %s1219_s16 = scalar_lea.sflag [#allocation6], %s190_s9 }
  0x29   : > { %s203_s15 = sshll.u32 %s194_s29, 4  ;;  %p800_p3 = pneg %p1211_p11  ;;  %s1215_s15 = int_to_ptr.vmem [resolvable:$true] %s203_s15 }
  0x2c   : > { %s499_s5 = scalar_lea.hbm %s1555_s1, %s1197_s21  ;;  %s803_s4 = scalar_lea.hbm %s1555_s1, 1536 }
  0x2d   : > { %s1205_s11 = scalar_lea.hbm %s499_s5, 128  ;;  %s828_s22 = scalar_lea.hbm %s499_s5, 256 }
  0x2e   : > { %p799_p0 = scmp.ne.s32.totalorder %s1205_s11, %s828_s22  ;;  %p804_p5 = scmp.lt.u32.totalorder %s1205_s11, %s1555_s1 }
  0x2f   : > { %p805_p8 = scmp.lt.u32.totalorder %s803_s4, %s828_s22  ;;  %p807_p2 = scmp.lt.u32.totalorder %s828_s22, %s1205_s11 }
  0x30   : > { %p801_p4 = pnand %p800_p3, %p799_p0 }
  0x31   : > { %p806_p9 = por %p805_p8, %p804_p5 }
  0x32   : > { %p802_p6 = pneg %p801_p4 }
  0x33   : > { %p808_p1 = por %p807_p2, %p806_p9 }
  0x35   : > { %p809_p12 = pnand %p808_p1, %p802_p6 }
  0x37   : > { %812 = shalt.err (!%p809_p12)
}
  0x38   : > { %s813_s9 = scalar_lea.vmem %s1215_s15, 128  ;;  %s1046_s5 = smov [#allocation5]  }
  0x39   : > { %p814_p0 = scmp.ne.s32.totalorder %s1215_s15, %s813_s9  ;;  %s818_s6 = sshll.u32 %s1046_s5, 4  ;;  %s819_s6 = int_to_ptr.vmem [resolvable:$false] %s818_s6 }
  0x3a   : > { %s820_s10 = scalar_lea.vmem %s819_s6, 256  ;;  %p821_p7 = scmp.lt.s32.totalorder %s1215_s15, %s819_s6 }
  0x3b   : > { %p816_p4 = pnand %p814_p0, %p800_p3  ;;  %p822_p5 = scmp.lt.s32.totalorder %s820_s10, %s813_s9 }
  0x3d   : > { %p817_p13 = pneg %p816_p4  ;;  %p823_p8 = por %p822_p5, %p821_p7 }
  0x3f   : > { %p824_p2 = pnand %p823_p8, %p817_p13 }
  0x41   : > { %827 = shalt.err (!%p824_p2)
}
  0x42   : > { %s1528_s22 = smov 384   ;;  %s1530_s4 = smov 64  }
  0x43   : > { %s1532_s8 = smov 4   ;;  %p1557_p1 = scmp.lt.s32.totalorder %s1044_s25, 5 }
  0x44   : > { %657 = dma.hbm_to_vmem [thread:$0]  (!%p1211_p11), %s1205_s11, 128, %s1215_s15, %s1219_s16, %s1528_s22, %s1530_s4, %s1532_s8  }
  0x45   : > { %p1558_p7 = scmp.ge.s32.totalorder %s1044_s25, 1  ;;  %s594_s9 = sadd.s32 4294967294, %s1044_s25  }
  0x46   : > { %s39_s5 = ssub.s32 %s1036_s23, %s1604_s27  ;;  %s43_s6 = sadd.s32 1, %s1024_s20 }
  0x47   : > { %p1253_p9 = pnand %p1558_p7, %p1557_p1  ;;  %s40_s10 = sor.u32 %s39_s5, %s1175_s7 }
  0x48   : > { %p50_p12 = scmp.ne.s32.totalorder %s1024_s20, %s1020_s19  ;;  %p41_p13 = scmp.eq.s32.totalorder %s40_s10, 0 }
  0x49   : > { %s1559_s29 = scalar_select %p1253_p9, 1, 0 }
  0x4a   : > { %p56_p3 = scmp.ne.s32.totalorder %s1020_s19, %s1016_s18  ;;  %p1560_p6 = scmp.eq.s32.totalorder %s1044_s25, 0 }
  0x4b   : > { %p142_p11 = scmp.eq.s32.totalorder %s1149_s26, 3  ;;  %p1563_p4 = scmp.eq.s32.totalorder %s1149_s26, 0 }
  0x4c   : > { %p1268_p0 = por %p1560_p6, %p50_p12  ;;  %p148_p2 = scmp.eq.s32.totalorder %s594_s9, 3 }
  0x4d   : > { %s1274_s11 = scalar_select %p41_p13, %s1024_s20, %s43_s6  }
  0x4e   : > { %p1278_p5 = por %p1563_p4, %p56_p3  ;;  %p1282_p8 = por %p142_p11, %p50_p12 }
  0x4f   : > { %1562 = sst [smem:[#allocation22_spill]] %s1274_s11  ;;  %s168_s5 = sand.u32 1, %s1024_s20  }
  0x50   : > { %s1564_s15 = scalar_select %p1278_p5, 1, 0 }
  0x51   : > { %s1565_s7 = scalar_select %p1282_p8, 1, 0 }
  0x52   : > { %s597_s10 = sshll.u32 %s168_s5, 3  ;;  %p1287_p1 = por %p148_p2, %p56_p3 }
  0x53   : > { %s1567_s0 = sld [smem:[#allocation23_spill]]  ;;  %s172_s1 = scalar_lea.vmem [#allocation2], %s597_s10 }
  0x54   : > { %s1566_s22 = scalar_select %p1287_p1, 1, 0 }
  0x55   : > { %s180_s27 = sshll.u32 %s172_s1, 4  ;;  %p1568_p7 = scmp.lt.s32.totalorder %s1044_s25, 4  ;;  %s1297_s27 = int_to_ptr.vmem [resolvable:$true] %s180_s27 }
  0x56   : > { %s1307_s24 = scalar_lea.sflag [#allocation3], %s168_s5 }
  0x57   : > { %p1303_p12 = pnand %p1568_p7, %p1268_p0 }
  0x59   : > { %s1295_s6 = scalar_lea.hbm %s1567_s0, %s1197_s21  ;;  %p831_p3 = pneg %p1303_p12 }
  0x5a   : > { %s829_s4 = scalar_lea.hbm %s1295_s6, 128  ;;  %s834_s3 = scalar_lea.hbm %s1567_s0, 1536 }
  0x5b   : > { %p830_p13 = scmp.ne.s32.totalorder %s1295_s6, %s829_s4  ;;  %p835_p0 = scmp.lt.u32.totalorder %s1295_s6, %s1567_s0 }
  0x5c   : > { %p836_p4 = scmp.lt.u32.totalorder %s834_s3, %s829_s4  ;;  %p838_p7 = scmp.lt.u32.totalorder %s829_s4, %s1295_s6 }
  0x5d   : > { %p832_p6 = pnand %p831_p3, %p830_p13 }
  0x5e   : > { %p837_p2 = por %p836_p4, %p835_p0 }
  0x5f   : > { %p833_p11 = pneg %p832_p6 }
  0x60   : > { %p839_p1 = por %p838_p7, %p837_p2 }
  0x62   : > { %p840_p8 = pnand %p839_p1, %p833_p11 }
  0x64   : > { %843 = shalt.err (!%p840_p8)
}
  0x65   : > { %s844_s5 = scalar_lea.vmem %s1297_s27, 128  ;;  %s1050_s1 = smov [#allocation2]  }
  0x66   : > { %p845_p13 = scmp.ne.s32.totalorder %s1297_s27, %s844_s5  ;;  %s849_s8 = sshll.u32 %s1050_s1, 4  ;;  %s850_s8 = int_to_ptr.vmem [resolvable:$false] %s849_s8 }
  0x67   : > { %s851_s23 = scalar_lea.vmem %s850_s8, 256  ;;  %p852_p9 = scmp.lt.s32.totalorder %s1297_s27, %s850_s8 }
  0x68   : > { %p847_p6 = pnand %p845_p13, %p831_p3  ;;  %p853_p0 = scmp.lt.s32.totalorder %s851_s23, %s844_s5 }
  0x6a   : > { %p848_p5 = pneg %p847_p6  ;;  %p854_p4 = por %p853_p0, %p852_p9 }
  0x6c   : > { %p855_p2 = pnand %p854_p4, %p848_p5 }
  0x6e   : > { %858 = shalt.err (!%p855_p2)
}
  0x6f   : > { %s1570_s4 = smov 4   ;;  %s1571_s3 = smov 64  }
  0x70   : > { %s1572_s10 = smov 384   ;;  %s103_s9 = sadd.s32 1, %s1000_s14 }
  0x71   : > { %654 = dma.hbm_to_vmem [thread:$0]  (!%p1303_p12), %s1295_s6, 128, %s1297_s27, %s1307_s24, %s1572_s10, %s1571_s3, %s1570_s4  }
  0x72   : > { %s1342_s5 = scalar_select %p1191_p10, %s1000_s14, %s103_s9  }
  0x73   : > { %p110_p9 = scmp.ne.s32.totalorder %s1000_s14, %s996_s13  ;;  %p116_p5 = scmp.ne.s32.totalorder %s996_s13, %s992_s12 }
  0x74   : > { %s215_s1 = sand.u32 1, %s1000_s14   ;;  %s507_s0 = scalar_lea.hbm %s1517_s2, %s1197_s21 }
  0x75   : > { %p1573_p8 = scmp.eq.s32.totalorder %s1044_s25, 0  ;;  %p1574_p3 = scmp.eq.s32.totalorder %s1149_s26, 0 }
  0x76   : > { %s601_s20 = sshll.u32 %s215_s1, 3  ;;  %s1361_s24 = scalar_lea.hbm %s507_s0, 256 }
  0x77   : > { %p112_p1 = por %p110_p9, %p1573_p8  ;;  %p1357_p11 = por %p116_p5, %p1574_p3 }
  0x78   : > { %p1576_p12 = scmp.lt.s32.totalorder %s1044_s25, 4  ;;  %s217_s21 = scalar_lea.vmem [#allocation7], %s601_s20 }
  0x79   : > { %s226_s27 = sshll.u32 %s217_s21, 4  ;;  %s889_s28 = scalar_lea.hbm %s507_s0, 384  ;;  %s1369_s27 = int_to_ptr.vmem [resolvable:$true] %s226_s27 }
  0x7a   : > { %p1365_p10 = pnand %p1576_p12, %p112_p1  ;;  %p860_p7 = scmp.ne.s32.totalorder %s1361_s24, %s889_s28 }
  0x7b   : > { %s864_s1 = scalar_lea.hbm %s1517_s2, 1536  ;;  %p865_p4 = scmp.lt.u32.totalorder %s1361_s24, %s1517_s2 }
  0x7c   : > { %p861_p13 = pneg %p1365_p10  ;;  %p866_p2 = scmp.lt.u32.totalorder %s864_s1, %s889_s28 }
  0x7d   : > { %p868_p5 = scmp.lt.u32.totalorder %s889_s28, %s1361_s24 }
  0x7e   : > { %p862_p6 = pnand %p861_p13, %p860_p7  ;;  %p867_p9 = por %p866_p2, %p865_p4 }
  0x80   : > { %p863_p0 = pneg %p862_p6  ;;  %p869_p8 = por %p868_p5, %p867_p9 }
  0x82   : > { %p870_p1 = pnand %p869_p8, %p863_p0 }
  0x84   : > { %873 = shalt.err (!%p870_p1)
}
  0x85   : > { %s874_s0 = scalar_lea.vmem %s1369_s27, 128  ;;  %s1051_s20 = smov [#allocation7]  }
  0x86   : > { %p875_p3 = scmp.ne.s32.totalorder %s1369_s27, %s874_s0  ;;  %s879_s21 = sshll.u32 %s1051_s20, 4  ;;  %s880_s21 = int_to_ptr.vmem [resolvable:$false] %s879_s21 }
  0x87   : > { %s881_s6 = scalar_lea.vmem %s880_s21, 256  ;;  %p882_p6 = scmp.lt.s32.totalorder %s1369_s27, %s880_s21 }
  0x88   : > { %p877_p12 = pnand %p875_p3, %p861_p13  ;;  %p883_p4 = scmp.lt.s32.totalorder %s881_s6, %s874_s0 }
  0x8a   : > { %p878_p7 = pneg %p877_p12  ;;  %p884_p2 = por %p883_p4, %p882_p6 }
  0x8c   : > { %p885_p9 = pnand %p884_p2, %p878_p7 }
  0x8e   : > { %888 = shalt.err (!%p885_p9)
}
  0x8f   : > { %660 = dma.hbm_to_vmem [thread:$0]  (!%p1365_p10), %s1361_s24, 128, %s1369_s27, %s1219_s16, %s1572_s10, %s1571_s3, %s1570_s4  }
  0x90   : > { %p1578_p13 = scmp.ne.s32.totalorder %s1559_s29, 0 }
  0x91   : > { %s1402_s28 = sand.u32 (!%p1578_p13), 1, %s1020_s19   ;;  %p1579_p0 = scmp.ne.s32.totalorder (!%p1578_p13), %s1564_s15, 0 }
  0x92   : > { %238 = sbr.rel (%p1578_p13) target bundleno = 788 (0x314), region = 32  ;;  %s604_s9 = sshll.u32 (!%p1578_p13), %s1402_s28, 3 }
  0x93   : > { %s241_s1 = scalar_lea.sflag (!%p1578_p13), [#allocation3], %s1402_s28  ;;  %s244_s12 = scalar_lea.vmem (!%p1578_p13), [#allocation2], %s604_s9 }
  0x99   : > { %975 = dma.done.wait (%p1579_p0), %s241_s1, 128  }
  0x9a   : > { %977 = vsyncadd (%p1579_p0), %s241_s1, 4294967168  ;;  %s1580_s16 = sld [smem:[#allocation13_spill]]  ;;  %s1581_s29 = sld [smem:[#allocation21_spill]] }
  0x9b   : > { %s249_s4 = sand.u32 1, %s1149_s26  }
  0x9c   : > { %s250_s24 = scalar_lea.sflag [#allocation6], %s249_s4 }
  0xa0   : > { %s251_s3 = sand.u32 1, %s1580_s16   ;;  %p1582_p10 = scmp.ne.s32.totalorder %s1581_s29, 0 }
  0xa1   : > { %s605_s10 = sshll.u32 %s251_s3, 3 }
  0xa2   : > { %s253_s27 = scalar_lea.vmem [#allocation5], %s605_s10 }
  0xa3   : > { %979 = dma.done.wait (%p1582_p10), %s250_s24, 128  }
  0xa4   : > { %981 = vsyncadd (%p1582_p10), %s250_s24, 4294967168  ;;  %s260_s8 = sand.u32 1, %s996_s13  }
  0xa5   : > { %s606_s23 = sshll.u32 %s260_s8, 3 }
  0xa6   : > { %s262_s0 = scalar_lea.vmem [#allocation7], %s606_s23 }
  0xa7   : > { %983 = dma.done.wait (%p1357_p11), %s250_s24, 128  }
  0xa8   : > { %985 = vsyncadd (%p1357_p11), %s250_s24, 4294967168  ;;  %v1052_v0 = vmov 0.0   ;;  %vm1053_vm0 = vmmov 0   ;;  %v787_v1 = vld [vmem:[%s253_s27] sm:$0xff]   ;;  %v788_v2 = vld [vmem:[%s244_s12] sm:$0xff]   ;;  %vm357_vm1 = vcmask 130048  }
  0xa9   : > { %630 = vmatprep.subr.bf16.mxu0 %v1052_v0  ;;  %632 = vmatprep.mubr.msk.bf16.mxu0 %vm1053_vm0, %v1052_v0  ;;  %v789_v9 = vld [vmem:[%s262_s0] sm:$0xff]   ;;  %s1583_s26 = sld [smem:[#allocation16_spill]]  ;;  %s1584_s11 = sld [smem:[#allocation15_spill]] }
  0xaa   : > { %636 = vmatprep.subr.bf16.mxu1 %v1052_v0  ;;  %638 = vmatprep.mubr.msk.bf16.mxu1 %vm1053_vm0, %v1052_v0  ;;  %s294_s21 = scalar_lea.vmem [#allocation8], %s604_s9  ;;  %s1585_s29 = sld [smem:[#allocation25_spill]] }
  0xab   : > { %631 = vmatpush3.bf16.xpose.msra.mxu0 %v787_v1  ;;  %637 = vmatpush3.bf16.msra.mxu1 %v789_v9  ;;  %s456_s6 = sshll.u32 %s294_s21, 4  ;;  %s442_s9 = scalar_lea.sflag [#allocation4], %s1402_s28  ;;  %s1432_s6 = int_to_ptr.vmem [resolvable:$true] %s456_s6 }
  0xac   : > { %s890_s3 = scalar_lea.vmem %s1432_s6, 128  ;;  %p1586_p5 = scmp.ne.s32.totalorder %s1565_s7, 0 }
  0xad   : > { %p891_p11 = scmp.ne.s32.totalorder %s1432_s6, %s890_s3  ;;  %s1054_s10 = smov [#allocation8]  }
  0xae   : > { %s894_s24 = sshll.u32 %s1054_s10, 4  ;;  %s895_s24 = int_to_ptr.vmem [resolvable:$false] %s894_s24 }
  0xaf   : > { %s615_s15 = sshll.u32 %s1583_s26, 2  ;;  %p892_p8 = pnand %p891_p11, %p1586_p5 }
  0xb0   : > { %s453_s20 = sadd.s32 %s1584_s11, %s615_s15  ;;  %s896_s27 = scalar_lea.vmem %s895_s24, 256 }
  0xb1   : > { %s616_s1 = sshll.u32 %s453_s20, 6  ;;  %p893_p1 = pneg %p892_p8 }
  0xb2   : > { %633 = vmatmul.mubr.bf16.vlgmr.msra.gmra.mrb[0].mxu0 %v788_v2  ;;  %s1437_s4 = scalar_lea.hbm %s1585_s29, %s616_s1  ;;  %p897_p3 = scmp.lt.s32.totalorder %s1432_s6, %s895_s24 }
  0xb3   : > { %p898_p12 = scmp.lt.s32.totalorder %s896_s27, %s890_s3 }
  0xb5   : > { %p899_p7 = por %p898_p12, %p897_p3 }
  0xb7   : > { %p900_p6 = pnand %p899_p7, %p893_p1 }
 0x185   : > { %v350_v3 = vpop.f32.mrb[0].mxu0 }
 0x186   : > { %v634_v4 = vpop.f32.mrb[1].mxu0  ;;  %v358_v5 = vsel %vm357_vm1, %v350_v3, -inf }
 0x187   : > { %359 = vmax.xlane.f32.xlu0 %v358_v5  ;;  %v353_v6 = vpop.f32.mrb[2].mxu0 }
 0x188   : > { %v635_v7 = vpop.f32.mrb[3].mxu0  ;;  %v361_v8 = vsel %vm357_vm1, %v353_v6, -inf }
 0x18b   : > { %362 = vmax.xlane.f32.xlu0 %v361_v8 }
 0x214   : > { %v360_v10 = vpop.xlane.xlu0 %359 }
 0x215   : > { %v364_v11 = vsub.f32 %v350_v3, %v360_v10 }
 0x217   : > { %v366_v12 = vmul.f32 1.442695, %v364_v11 }
 0x218   : > { %v363_v13 = vpop.xlane.xlu0 %362 }
 0x219   : > { %790 = vpow2.f32 %v366_v12  ;;  %v365_v14 = vsub.f32 %v353_v6, %v363_v13 }
 0x21b   : > { %v368_v15 = vmul.f32 1.442695, %v365_v14 }
 0x21d   : > { %792 = vpow2.f32 %v368_v15 }
 0x223   : > { %v791_v16 = vpop.eup %790 }
 0x224   : > { %v370_v17 = vsel %vm357_vm1, %v791_v16, 0.0 }
 0x225   : > { %371 = vadd.xlane.f32.xlu1 %v370_v17 }
 0x227   : > { %v793_v18 = vpop.eup %792 }
 0x228   : > { %v373_v19 = vsel %vm357_vm1, %v793_v18, 0.0  ;;  %v376_v20 = vpack.c.bf16 %v793_v18, %v791_v16 }
 0x229   : > { %374 = vadd.xlane.f32.xlu1 %v373_v19 }
 0x22a   : > { %639 = vmatmul.mubr.msk.bf16.vlgmr.msra.gmra.mrb[0].mxu1 %vm357_vm1, %v376_v20 }
 0x2b2   : > { %v372_v21 = vpop.xlane.xlu1 %371 }
 0x2b3   : > { %794 = vrcp.f32 %v372_v21 }
 0x2b6   : > { %v375_v22 = vpop.xlane.xlu1 %374 }
 0x2b7   : > { %796 = vrcp.f32 %v375_v22 }
 0x2bd   : > { %v795_v24 = vpop.eup %794 }
 0x2c1   : > { %v797_v26 = vpop.eup %796 }
 0x2fd   : > { %v420_v23 = vpop.f32.mrb[0].mxu1 }
 0x2fe   : > { %v640_v25 = vpop.f32.mrb[1].mxu1  ;;  %v429_v28 = vmul.f32 %v795_v24, %v420_v23 }
 0x2ff   : > { %v423_v27 = vpop.f32.mrb[2].mxu1 }
 0x300   : > { %v430_v29 = vmul.f32 %v797_v26, %v423_v27  ;;  %v641_v30 = vpop.f32.mrb[3].mxu1 }
 0x302   : > { %v624_v31 = vpack.c.bf16 %v430_v29, %v429_v28 }
 0x304   : > { %625 = vst [vmem:[%s294_s21] sm:$0xff] %v624_v31  }
 0x305   : > { %903 = shalt.err (!%p900_p6)
}
 0x306   : > { %s904_s8 = scalar_lea.hbm %s1437_s4, 128  ;;  %s908_s26 = scalar_lea.hbm %s1585_s29, 512 }
 0x307   : > { %p905_p4 = scmp.ne.s32.totalorder %s1437_s4, %s904_s8  ;;  %p909_p13 = scmp.lt.u32.totalorder %s1437_s4, %s1585_s29 }
 0x308   : > { %p910_p0 = scmp.lt.u32.totalorder %s908_s26, %s904_s8  ;;  %p912_p11 = scmp.lt.u32.totalorder %s904_s8, %s1437_s4 }
 0x309   : > { %p906_p2 = pnand %p905_p4, %p1586_p5 }
 0x30a   : > { %p911_p10 = por %p910_p0, %p909_p13 }
 0x30b   : > { %p907_p9 = pneg %p906_p2 }
 0x30c   : > { %p913_p8 = por %p912_p11, %p911_p10 }
 0x30e   : > { %p914_p1 = pnand %p913_p8, %p907_p9 }
 0x310   : > { %917 = shalt.err (!%p914_p1)
}
 0x311   : > { %s1055_s20 = smov 64   ;;  %s1056_s21 = smov 128  }
 0x312   : > { %s1057_s1 = smov 4  }
 0x313   : > { %649 = dma.vmem_to_hbm [thread:$0]  (%p1586_p5), %s1432_s6, 128, %s1437_s4, %s442_s9, %s1055_s20, %s1056_s21, %s1057_s1  }
 0x314 PF: > { %p666_p3 = scmp.ge.s32.totalorder %s1044_s25, 2  ;;  %s471_s12 = sand.u32 1, %s1016_s18  }
 0x315   : > { %p1587_p12 = scmp.ne.s32.totalorder %s1566_s22, 0  ;;  %s472_s16 = scalar_lea.sflag [#allocation4], %s471_s12 }
 0x317   : > { %p662_p7 = pnand %p666_p3, %p1587_p12 }
 0x319   : > { %987 = dma.done.wait (!%p662_p7), %s472_s16, 128  }
 0x31a   : > { %989 = vsyncadd (!%p662_p7), %s472_s16, 4294967168  ;;  %s22_s25 = sadd.s32 1, %s1044_s25   ;;  %s1589_s15 = sld [smem:[#allocation13_spill]] }
 0x31b   : > { %p1468_p6 = scmp.ge.s32.totalorder %s22_s25, 6   ;;  %s1590_s7 = sld [smem:[#allocation14_spill]] }
 0x31c   : > { %s1591_s20 = sld [smem:[#allocation22_spill]]  ;;  %s1592_s21 = sld [smem:[#allocation17_spill]] }
 0x31d   : > { %s1593_s22 = sld [smem:[#allocation18_spill]]  ;;  %s1594_s23 = sld [smem:[#allocation19_spill]] }
 0x31e   : > { %s1595_s24 = sld [smem:[#allocation20_spill]]  ;;  %s1596_s12 = smov %s996_s13 }
 0x31f   : > { %s1597_s13 = smov %s1000_s14  ;;  %s1598_s14 = smov %s1342_s5 }
 0x320   : > { %s1599_s16 = smov %s1012_s17  ;;  %s1600_s17 = smov %s1187_s30 }
 0x321   : > { %s1601_s18 = smov %s1020_s19  ;;  %s1602_s19 = smov %s1590_s7 }
 0x322   :  { %21 = sbr.rel (!%p1468_p6) target bundleno = 16 (0x10), region = 101 }
 0x329   :  { %477 = vsyncpa [#allocation3], 1 }
 0x32a   :  { %479 = vsyncpa [#allocation3 + $0x1], 1 }
 0x32b   :  { %480 = vsyncpa [#allocation6], 1 }
 0x32c   :  { %482 = vsyncpa [#allocation6 + $0x1], 1 }
 0x32d   :  { %483 = vsyncpa [#allocation4], 1 }
 0x32e   :  { %485 = vsyncpa [#allocation4 + $0x1], 1 }

// kernel: _lambda_.15
= control target key start
LH: loop header
LB: loop body
LE: loop exit
PB: predicated region body
PF: predicated region fallthrough
CT: control target
= control target key end

     0   :  { %9 = vsyncpa [#allocation3], 0  ;;  %s750_s0 = inlined_call_operand.hbm [shape: bf16[32,256], index: 0, kind: input, shape index: {}]   ;;  %s751_s1 = inlined_call_operand.hbm [shape: bf16[256,256], index: 1, kind: input, shape index: {}]   ;;  %s752_s2 = inlined_call_operand.hbm [shape: f32[1,256], index: 2, kind: input, shape index: {}]   ;;  %s753_s3 = inlined_call_operand.hbm [shape: bf16[32,256], index: 3, kind: input, shape index: {}]   ;;  %s754_s4 = inlined_call_operand.vmem [shape: bf16[32,256], index: 4, kind: output, shape index: {}]  }
   0x1   :  { %10 = vsyncpa [#allocation5], 0 }
   0x2   :  { %11 = vsyncpa [#allocation8], 0  ;;  %s636_s15 = smov [#allocation4]   ;;  %s637_s17 = smov [#allocation2]  }
   0x3   :  { %s29_s16 = sshll.u32 %s636_s15, 4  ;;  %s17_s18 = sshll.u32 %s637_s17, 4  ;;  %s30_s16 = int_to_ptr.vmem [resolvable:$true] %s29_s16  ;;  %s667_s18 = int_to_ptr.vmem [resolvable:$true] %s17_s18 }
   0x4   :  { %s542_s21 = scalar_lea.hbm %s751_s1, 4096 }
   0x5   :  { %p543_p0 = scmp.ne.s32.totalorder %s751_s1, %s542_s21  ;;  %p546_p1 = scmp.lt.u32.totalorder %s542_s21, %s751_s1 }
   0x7   :  { %p548_p2 = pnand %p546_p1, %p543_p0 }
   0x9   :  { %551 = shalt.err (!%p548_p2)
}
   0xa   :  { %s552_s26 = scalar_lea.vmem %s30_s16, 4096  ;;  %p557_p4 = scmp.lt.s32.totalorder %s30_s16, %s30_s16 }
   0xb   :  { %p553_p3 = scmp.ne.s32.totalorder %s30_s16, %s552_s26  ;;  %p558_p5 = scmp.lt.s32.totalorder %s552_s26, %s552_s26 }
   0xd   :  { %p559_p6 = por %p558_p5, %p557_p4 }
   0xf   :  { %p560_p7 = pnand %p559_p6, %p553_p3 }
  0x11   :  { %563 = shalt.err (!%p560_p7)
}
  0x12   :  { %s638_s27 = smov 128   ;;  %s639_s28 = smov 8  }
  0x13   :  { %35 = dma.hbm_to_vmem [thread:$0]  %s751_s1, 4096, %s30_s16, [#allocation5], %s638_s27, %s638_s27, %s639_s28  }
  0x14   :  { %s564_s7 = scalar_lea.hbm %s750_s0, 512 }
  0x15   :  { %p565_p8 = scmp.ne.s32.totalorder %s750_s0, %s564_s7  ;;  %p568_p9 = scmp.lt.u32.totalorder %s564_s7, %s750_s0 }
  0x17   :  { %p570_p10 = pnand %p568_p9, %p565_p8 }
  0x19   :  { %573 = shalt.err (!%p570_p10)
}
  0x1a   :  { %s574_s12 = scalar_lea.vmem %s667_s18, 512  ;;  %p579_p12 = scmp.lt.s32.totalorder %s667_s18, %s667_s18 }
  0x1b   :  { %p575_p11 = scmp.ne.s32.totalorder %s667_s18, %s574_s12  ;;  %p580_p13 = scmp.lt.s32.totalorder %s574_s12, %s574_s12 }
  0x1d   :  { %p581_p0 = por %p580_p13, %p579_p12 }
  0x1f   :  { %p582_p1 = pnand %p581_p0, %p575_p11 }
  0x21   :  { %585 = shalt.err (!%p582_p1)
}
  0x22   :  { %23 = dma.hbm_to_vmem [thread:$0]  %s750_s0, 512, %s667_s18, [#allocation3], %s638_s27, %s638_s27, %s639_s28  }
  0x23   :  { %s640_s14 = smov [#allocation6]   ;;  %s641_s16 = smov [#allocation7]  }
  0x24   :  { %s42_s15 = sshll.u32 %s640_s14, 4  ;;  %s51_s17 = sshll.u32 %s641_s16, 4  ;;  %s43_s15 = int_to_ptr.vmem [resolvable:$true] %s42_s15  ;;  %s704_s17 = int_to_ptr.vmem [resolvable:$true] %s51_s17 }
  0x25   :  { %s586_s21 = scalar_lea.hbm %s752_s2, 32 }
  0x26   :  { %p587_p2 = scmp.ne.s32.totalorder %s752_s2, %s586_s21  ;;  %p590_p3 = scmp.lt.u32.totalorder %s586_s21, %s752_s2 }
  0x28   :  { %p592_p4 = pnand %p590_p3, %p587_p2 }
  0x2a   :  { %595 = shalt.err (!%p592_p4)
}
  0x2b   :  { %s596_s0 = scalar_lea.vmem %s43_s15, 32  ;;  %p601_p6 = scmp.lt.s32.totalorder %s43_s15, %s43_s15 }
  0x2c   :  { %p597_p5 = scmp.ne.s32.totalorder %s43_s15, %s596_s0  ;;  %p602_p7 = scmp.lt.s32.totalorder %s596_s0, %s596_s0 }
  0x2e   :  { %p603_p8 = por %p602_p7, %p601_p6 }
  0x30   :  { %p604_p9 = pnand %p603_p8, %p597_p5 }
  0x32   :  { %607 = shalt.err (!%p604_p9)
}
  0x33   :  { %45 = dma.hbm_to_vmem [thread:$0]  %s752_s2, 32, %s43_s15, [#allocation5]  }
  0x34   :  { %s608_s5 = scalar_lea.hbm %s753_s3, 512 }
  0x35   :  { %p609_p10 = scmp.ne.s32.totalorder %s753_s3, %s608_s5  ;;  %p612_p11 = scmp.lt.u32.totalorder %s608_s5, %s753_s3 }
  0x37   :  { %p614_p12 = pnand %p612_p11, %p609_p10 }
  0x39   :  { %617 = shalt.err (!%p614_p12)
}
  0x3a   :  { %s618_s10 = scalar_lea.vmem %s704_s17, 512  ;;  %p623_p0 = scmp.lt.s32.totalorder %s704_s17, %s704_s17 }
  0x3b   :  { %p619_p13 = scmp.ne.s32.totalorder %s704_s17, %s618_s10  ;;  %p624_p1 = scmp.lt.s32.totalorder %s618_s10, %s618_s10 }
  0x3d   :  { %p625_p2 = por %p624_p1, %p623_p0 }
  0x3f   :  { %p626_p3 = pnand %p625_p2, %p619_p13 }
  0x41   :  { %629 = shalt.err (!%p626_p3)
}
  0x42   :  { %57 = dma.hbm_to_vmem [thread:$0]  %s753_s3, 512, %s704_s17, [#allocation8], %s638_s27, %s638_s27, %s639_s28  }
  0x43   :  { %630 = dma.done.wait [#allocation3], 512  }
  0x44   :  { %631 = vsyncadd [#allocation3], 4294966784 }
  0x45   :  { %632 = dma.done.wait [#allocation5], 4128  }
  0x46   :  { %633 = vsyncadd [#allocation5], 4294963168 }
  0x47   :  { %634 = dma.done.wait [#allocation8], 512  }
  0x48   :  { %635 = vsyncadd [#allocation8], 4294966784  ;;  %v488_v0 = vld [vmem:[#allocation4 + $0x4] ss:$8 sps:$4 sm:$0xff]   ;;  %v490_v1 = vld [vmem:[#allocation4] ss:$8 sps:$4 sm:$0xff]   ;;  %v108_v36 = vlaneseq }
  0x49   :  { %298 = vmatprep.subr.bf16.mxu0 %v488_v0  ;;  %450 = vmatprep.subr.bf16.mxu1 %v488_v0  ;;  %v491_v2 = vld [vmem:[#allocation4 + $0x14] ss:$8 sps:$4 sm:$0xff]   ;;  %v493_v3 = vld [vmem:[#allocation4 + $0x10] ss:$8 sps:$4 sm:$0xff]   ;;  %v494_v4 = vld [vmem:[#allocation4 + $0x24] ss:$8 sps:$4 sm:$0xff]  }
  0x4a   :  { %299 = vmatpush1.bf16.msra.mxu0 %v490_v1  ;;  %466 = vmatpush1.bf16.msra.mxu1 %v490_v1  ;;  %v496_v5 = vld [vmem:[#allocation4 + $0x20] ss:$8 sps:$4 sm:$0xff]   ;;  %v497_v6 = vld [vmem:[#allocation4 + $0x34] ss:$8 sps:$4 sm:$0xff]   ;;  %v499_v7 = vld [vmem:[#allocation4 + $0x30] ss:$8 sps:$4 sm:$0xff]  }
  0x4b   :  { %300 = vmatprep.subr.bf16.mxu0 %v491_v2  ;;  %451 = vmatprep.subr.bf16.mxu1 %v491_v2  ;;  %v500_v8 = vld [vmem:[#allocation4 + $0x44] ss:$8 sps:$4 sm:$0xff]   ;;  %v502_v9 = vld [vmem:[#allocation4 + $0x40] ss:$8 sps:$4 sm:$0xff]   ;;  %v503_v10 = vld [vmem:[#allocation4 + $0x54] ss:$8 sps:$4 sm:$0xff]  }
  0x4c   :  { %v505_v11 = vld [vmem:[#allocation4 + $0x50] ss:$8 sps:$4 sm:$0xff]   ;;  %v506_v12 = vld [vmem:[#allocation4 + $0x64] ss:$8 sps:$4 sm:$0xff]   ;;  %v508_v14 = vld [vmem:[#allocation4 + $0x60] ss:$8 sps:$4 sm:$0xff]  }
  0x4d   :  { %v538_v13 = vld [vmem:[#allocation2 + $0x4] ss:$8 sps:$4 sm:$0xff]   ;;  %v541_v15 = vld [vmem:[#allocation2 + $0x14] ss:$8 sps:$4 sm:$0xff]   ;;  %v511_v17 = vld [vmem:[#allocation4 + $0x70] ss:$8 sps:$4 sm:$0xff]  }
  0x4e   :  { %301 = vmatpush1.bf16.msra.mxu0 %v493_v3  ;;  %467 = vmatpush1.bf16.msra.mxu1 %v493_v3  ;;  %v509_v16 = vld [vmem:[#allocation4 + $0x74] ss:$8 sps:$4 sm:$0xff]   ;;  %v512_v18 = vld [vmem:[#allocation4 + $0x84] ss:$8 sps:$4 sm:$0xff]   ;;  %v514_v19 = vld [vmem:[#allocation4 + $0x80] ss:$8 sps:$4 sm:$0xff]  }
  0x4f   :  { %302 = vmatprep.subr.bf16.mxu0 %v494_v4  ;;  %452 = vmatprep.subr.bf16.mxu1 %v494_v4  ;;  %v515_v20 = vld [vmem:[#allocation4 + $0x94] ss:$8 sps:$4 sm:$0xff]   ;;  %v517_v21 = vld [vmem:[#allocation4 + $0x90] ss:$8 sps:$4 sm:$0xff]   ;;  %v518_v22 = vld [vmem:[#allocation4 + $0xa4] ss:$8 sps:$4 sm:$0xff]  }
  0x50   :  { %330 = vmatprep.mubr.bf16.mxu0 %v538_v13  ;;  %340 = vmatprep.mubr.bf16.mxu1 %v541_v15  ;;  %v520_v23 = vld [vmem:[#allocation4 + $0xa0] ss:$8 sps:$4 sm:$0xff]   ;;  %v521_v24 = vld [vmem:[#allocation4 + $0xb4] ss:$8 sps:$4 sm:$0xff]   ;;  %v523_v25 = vld [vmem:[#allocation4 + $0xb0] ss:$8 sps:$4 sm:$0xff]  }
  0x51   :  { %v524_v26 = vld [vmem:[#allocation4 + $0xc4] ss:$8 sps:$4 sm:$0xff]   ;;  %v526_v27 = vld [vmem:[#allocation4 + $0xc0] ss:$8 sps:$4 sm:$0xff]   ;;  %v527_v28 = vld [vmem:[#allocation4 + $0xd4] ss:$8 sps:$4 sm:$0xff]  }
  0x52   :  { %303 = vmatpush1.bf16.msra.mxu0 %v496_v5  ;;  %468 = vmatpush1.bf16.msra.mxu1 %v496_v5  ;;  %v529_v29 = vld [vmem:[#allocation4 + $0xd0] ss:$8 sps:$4 sm:$0xff]   ;;  %v530_v30 = vld [vmem:[#allocation4 + $0xe4] ss:$8 sps:$4 sm:$0xff]   ;;  %v532_v31 = vld [vmem:[#allocation4 + $0xe0] ss:$8 sps:$4 sm:$0xff]  }
  0x53   :  { %304 = vmatprep.subr.bf16.mxu0 %v497_v6  ;;  %453 = vmatprep.subr.bf16.mxu1 %v497_v6  ;;  %v533_v32 = vld [vmem:[#allocation4 + $0xf4] ss:$8 sps:$4 sm:$0xff]   ;;  %v535_v33 = vld [vmem:[#allocation4 + $0xf0] ss:$8 sps:$4 sm:$0xff]   ;;  %v536_v34 = vld [vmem:[#allocation2] ss:$8 sps:$4 sm:$0xff]  }
  0x54   :  { %v539_v35 = vld [vmem:[#allocation2 + $0x10] ss:$8 sps:$4 sm:$0xff]   ;;  %v109_v37 = vshrl.u32 %v108_v36, 7  ;;  %v106_v39 = vld [vmem:[#allocation6] sm:$0x3]  ;;  %v351_v41 = vld [vmem:[#allocation7] sm:$0xff] }
  0x55   :  { %v353_v42 = vld [vmem:[#allocation7 + $0x10] sm:$0xff]  ;;  %v352_v45 = vld [vmem:[#allocation7 + $0x8] sm:$0xff]  ;;  %v354_v46 = vld [vmem:[#allocation7 + $0x18] sm:$0xff]  ;;  %v355_v47 = vunpack.c.l.bf16 %v351_v41  ;;  %v356_v51 = vunpack.c.h.bf16 %v351_v41 }
  0x56   :  { %305 = vmatpush1.bf16.msra.mxu0 %v499_v7  ;;  %469 = vmatpush1.bf16.msra.mxu1 %v499_v7  ;;  %v110_v38 = vsub.s32 0, %v109_v37  ;;  %v114_v40 = vsub.s32 1, %v109_v37  ;;  %v359_v48 = vunpack.c.l.bf16 %v353_v42  ;;  %v360_v52 = vunpack.c.h.bf16 %v353_v42 }
  0x57   :  { %306 = vmatprep.subr.bf16.mxu0 %v500_v8  ;;  %454 = vmatprep.subr.bf16.mxu1 %v500_v8  ;;  %v357_v57 = vunpack.c.l.bf16 %v352_v45  ;;  %v361_v58 = vunpack.c.l.bf16 %v354_v46  ;;  %v358_v63 = vunpack.c.h.bf16 %v352_v45  ;;  %v362_v0 = vunpack.c.h.bf16 %v354_v46 }
  0x58   :  { %v111_v43 = vrot.slane %v106_v39, %v110_v38  ;;  %v115_v44 = vrot.slane %v106_v39, %v114_v40 }
  0x5a   :  { %307 = vmatpush1.bf16.msra.mxu0 %v502_v9  ;;  %470 = vmatpush1.bf16.msra.mxu1 %v502_v9 }
  0x5b   :  { %308 = vmatprep.subr.bf16.mxu0 %v503_v10  ;;  %455 = vmatprep.subr.bf16.mxu1 %v503_v10 }
  0x5e   :  { %309 = vmatpush1.bf16.msra.mxu0 %v505_v11  ;;  %471 = vmatpush1.bf16.msra.mxu1 %v505_v11 }
  0x5f   :  { %310 = vmatprep.subr.bf16.mxu0 %v506_v12  ;;  %456 = vmatprep.subr.bf16.mxu1 %v506_v12 }
  0x62   :  { %311 = vmatpush1.bf16.msra.mxu0 %v508_v14  ;;  %472 = vmatpush1.bf16.msra.mxu1 %v508_v14 }
  0x63   :  { %312 = vmatprep.subr.bf16.mxu0 %v509_v16  ;;  %457 = vmatprep.subr.bf16.mxu1 %v509_v16 }
  0x66   :  { %313 = vmatpush1.bf16.msra.mxu0 %v511_v17  ;;  %473 = vmatpush1.bf16.msra.mxu1 %v511_v17 }
  0x67   :  { %314 = vmatprep.subr.bf16.mxu0 %v512_v18  ;;  %458 = vmatprep.subr.bf16.mxu1 %v512_v18 }
  0x6a   :  { %315 = vmatpush1.bf16.msra.mxu0 %v514_v19  ;;  %474 = vmatpush1.bf16.msra.mxu1 %v514_v19 }
  0x6b   :  { %316 = vmatprep.subr.bf16.mxu0 %v515_v20  ;;  %459 = vmatprep.subr.bf16.mxu1 %v515_v20 }
  0x6e   :  { %317 = vmatpush1.bf16.msra.mxu0 %v517_v21  ;;  %475 = vmatpush1.bf16.msra.mxu1 %v517_v21 }
  0x6f   :  { %318 = vmatprep.subr.bf16.mxu0 %v518_v22  ;;  %460 = vmatprep.subr.bf16.mxu1 %v518_v22 }
  0x72   :  { %319 = vmatpush1.bf16.msra.mxu0 %v520_v23  ;;  %476 = vmatpush1.bf16.msra.mxu1 %v520_v23 }
  0x73   :  { %320 = vmatprep.subr.bf16.mxu0 %v521_v24  ;;  %461 = vmatprep.subr.bf16.mxu1 %v521_v24 }
  0x76   :  { %321 = vmatpush1.bf16.msra.mxu0 %v523_v25  ;;  %477 = vmatpush1.bf16.msra.mxu1 %v523_v25 }
  0x77   :  { %322 = vmatprep.subr.bf16.mxu0 %v524_v26  ;;  %462 = vmatprep.subr.bf16.mxu1 %v524_v26 }
  0x7a   :  { %323 = vmatpush1.bf16.msra.mxu0 %v526_v27  ;;  %478 = vmatpush1.bf16.msra.mxu1 %v526_v27 }
  0x7b   :  { %324 = vmatprep.subr.bf16.mxu0 %v527_v28  ;;  %463 = vmatprep.subr.bf16.mxu1 %v527_v28 }
  0x7e   :  { %325 = vmatpush1.bf16.msra.mxu0 %v529_v29  ;;  %479 = vmatpush1.bf16.msra.mxu1 %v529_v29 }
  0x7f   :  { %326 = vmatprep.subr.bf16.mxu0 %v530_v30  ;;  %464 = vmatprep.subr.bf16.mxu1 %v530_v30 }
  0x82   :  { %327 = vmatpush1.bf16.msra.mxu0 %v532_v31  ;;  %480 = vmatpush1.bf16.msra.mxu1 %v532_v31 }
  0x83   :  { %328 = vmatprep.subr.bf16.mxu0 %v533_v32  ;;  %465 = vmatprep.subr.bf16.mxu1 %v533_v32 }
  0x86   :  { %329 = vmatpush1.bf16.msra.mxu0 %v535_v33  ;;  %481 = vmatpush1.bf16.msra.mxu1 %v535_v33 }
  0x89   :  { %331 = vmatmul.mubr.bf16.vlgmr.msra.gmra.mrb[0].mxu0 %v536_v34  ;;  %341 = vmatmul.mubr.bf16.vlgmr.msra.gmra.mrb[0].mxu1 %v539_v35 }
 0x15c   :  { %v332_v49 = vpop.f32.mrb[0].mxu0  ;;  %v342_v50 = vpop.f32.mrb[0].mxu1 }
 0x15d   :  { %v333_v53 = vadd.f32 %v332_v49, %v111_v43  ;;  %v343_v54 = vadd.f32 %v342_v50, %v111_v43  ;;  %v334_v55 = vpop.f32.mrb[1].mxu0  ;;  %v344_v56 = vpop.f32.mrb[1].mxu1 }
 0x15e   :  { %v335_v59 = vadd.f32 %v334_v55, %v115_v44  ;;  %v345_v60 = vadd.f32 %v344_v56, %v115_v44  ;;  %v336_v61 = vpop.f32.mrb[2].mxu0  ;;  %v346_v62 = vpop.f32.mrb[2].mxu1 }
 0x15f   :  { %v363_v1 = vadd.f32 %v355_v47, %v333_v53  ;;  %v367_v2 = vadd.f32 %v359_v48, %v343_v54  ;;  %v337_v3 = vadd.f32 %v336_v61, %v111_v43  ;;  %v347_v4 = vadd.f32 %v346_v62, %v111_v43  ;;  %v338_v5 = vpop.f32.mrb[3].mxu0  ;;  %v348_v6 = vpop.f32.mrb[3].mxu1 }
 0x160   :  { %v364_v7 = vadd.f32 %v356_v51, %v335_v59  ;;  %v368_v8 = vadd.f32 %v360_v52, %v345_v60  ;;  %v339_v9 = vadd.f32 %v338_v5, %v115_v44  ;;  %v349_v10 = vadd.f32 %v348_v6, %v115_v44 }
 0x161   :  { %v365_v11 = vadd.f32 %v357_v57, %v337_v3  ;;  %v369_v12 = vadd.f32 %v361_v58, %v347_v4 }
 0x162   :  { %v446_v13 = vpack.c.bf16 %v364_v7, %v363_v1  ;;  %v448_v14 = vpack.c.bf16 %v368_v8, %v367_v2  ;;  %v366_v15 = vadd.f32 %v358_v63, %v339_v9  ;;  %v370_v16 = vadd.f32 %v362_v0, %v349_v10 }
 0x164   :  { %395 = vst [vmem:[%s754_s4] sm:$0xff] %v446_v13  ;;  %397 = vst [vmem:[%s754_s4 + $0x10] sm:$0xff] %v448_v14  ;;  %v447_v17 = vpack.c.bf16 %v366_v15, %v365_v11  ;;  %v449_v18 = vpack.c.bf16 %v370_v16, %v369_v12 }
 0x166   :  { %396 = vst [vmem:[%s754_s4 + $0x8] sm:$0xff] %v447_v17  ;;  %398 = vst [vmem:[%s754_s4 + $0x18] sm:$0xff] %v449_v18 }
 0x167   :  { %403 = vsyncpa [#allocation3], 1 }
 0x168   :  { %404 = vsyncpa [#allocation5], 1 }
 0x169   :  { %405 = vsyncpa [#allocation8], 1 }

// kernel: _lambda_.13
= control target key start
LH: loop header
LB: loop body
LE: loop exit
PB: predicated region body
PF: predicated region fallthrough
CT: control target
= control target key end

     0   :  { %10 = vsyncpa [#allocation5], 0  ;;  %s1667_s0 = inlined_call_operand.vmem [shape: bf16[32,256], index: 0, kind: input, shape index: {}]   ;;  %s1668_s1 = inlined_call_operand.vmem [shape: bf16[256,768], index: 1, kind: input, shape index: {}]   ;;  %s1669_s2 = inlined_call_operand.vmem [shape: f32[1,768], index: 2, kind: input, shape index: {}]   ;;  %s1670_s3 = inlined_call_operand.vmem [shape: f32[1,256], index: 3, kind: input, shape index: {}]   ;;  %s1671_s4 = inlined_call_operand.vmem [shape: f32[1,256], index: 4, kind: input, shape index: {}]   ;;  %s1672_s5 = inlined_call_operand.hbm [shape: bf16[32,768], index: 5, kind: output, shape index: {}]  }
   0x1   :  { %12 = vsyncpa [#allocation5 + $0x1], 0  ;;  %s1406_s18 = smov 0   ;;  %s1408_s19 = smov 0  }
   0x2   :  { %s1410_s20 = smov 0   ;;  %s1412_s21 = smov 0  }
   0x3   :  { %s1414_s22 = smov 0   ;;  %s1416_s23 = smov 0  }
   0x4 LB: > { %s1084_s24 = sadd.s32 4294967295, %s1370_s23   ;;  %s1085_s25 = sadd.s32 4294967294, %s1370_s23   ;;  %s1370_s23 = sphi %s1416_s23, %s18_s23   ;;  %s1366_s22 = sphi %s1414_s22, %s1679_s22   ;;  %s1362_s21 = sphi %s1412_s21, %s1678_s21   ;;  %s1358_s20 = sphi %s1410_s20, %s1677_s20   ;;  %s1354_s19 = sphi %s1408_s19, %s1676_s19   ;;  %s1350_s18 = sphi %s1406_s18, %s1675_s18  }
   0x5   : > { %s33_s26 = sadd.s32 1, %s1366_s22  ;;  %s74_s27 = sadd.s32 1, %s1358_s20 }
   0x6   : > { %p35_p0 = scmp.ge.s32.totalorder %s33_s26, 3  ;;  %p81_p1 = scmp.ne.s32.totalorder %s1358_s20, %s1354_s19 }
   0x7   : > { %p82_p2 = scmp.eq.s32.totalorder %s1370_s23, 0  ;;  %p191_p3 = scmp.eq.s32.totalorder %s1084_s24, 2 }
   0x8   : > { %s1681_s26 = smov (%p35_p0, %s33_s26), 0  ;;  %p196_p6 = scmp.ne.s32.totalorder %s1354_s19, %s1350_s18 }
   0x9   : > { %p83_p4 = por %p82_p2, %p81_p1  ;;  %p1445_p5 = por %p191_p3, %p81_p1 }
   0xa   : > { %s70_s29 = ssub.s32 %s1366_s22, %s1681_s26  ;;  %p197_p8 = scmp.eq.s32.totalorder %s1085_s25, 2 }
   0xb   : > { %p72_p7 = scmp.eq.s32.totalorder %s70_s29, 0  ;;  %p1090_p10 = scmp.ge.s32.totalorder %s1370_s23, 3 }
   0xc   : > { %p1456_p9 = por %p197_p8, %p196_p6 }
   0xd   : > { %s1454_s30 = scalar_select %p72_p7, %s1358_s20, %s74_s27  }
   0xe   : > { %244 = sbr.rel (%p1090_p10) target bundleno = 41 (0x29), region = 28 }
  0x15   : > { %247 = sbr.rel (!%p83_p4) target bundleno = 41 (0x29), region = 32  ;;  %s249_s7 = sand.u32 (%p83_p4), 1, %s1358_s20  }
  0x16   : > { %s1140_s8 = sshll.u32 (%p83_p4), %s1366_s22, 3  ;;  %s1091_s9 = sshll.u32 (%p83_p4), %s249_s7, 8 }
  0x17   : > { %s1466_s12 = scalar_lea.vmem (%p83_p4), %s1668_s1, %s1140_s8  ;;  %s1471_s13 = scalar_lea.vmem (%p83_p4), [#allocation3], %s1091_s9 }
  0x18   : > { %v347_v0 = vld [vmem:[%s1466_s12] sm:$0xff] (%p83_p4)  ;;  %v349_v1 = vld [vmem:[%s1466_s12 + $0x18] sm:$0xff] (%p83_p4)  ;;  %v351_v2 = vld [vmem:[%s1466_s12 + $0x30] sm:$0xff] (%p83_p4) }
  0x19   : > { %348 = vst [vmem:[%s1471_s13] sm:$0xff] (%p83_p4), %v347_v0  ;;  %350 = vst [vmem:[%s1471_s13 + $0x8] sm:$0xff] (%p83_p4), %v349_v1  ;;  %v353_v3 = vld [vmem:[%s1466_s12 + $0x48] sm:$0xff] (%p83_p4)  ;;  %v355_v4 = vld [vmem:[%s1466_s12 + $0x60] sm:$0xff] (%p83_p4) }
  0x1a   : > { %352 = vst [vmem:[%s1471_s13 + $0x10] sm:$0xff] (%p83_p4), %v351_v2  ;;  %v357_v5 = vld [vmem:[%s1466_s12 + $0x78] sm:$0xff] (%p83_p4)  ;;  %354 = vst [vmem:[%s1471_s13 + $0x18] sm:$0xff] (%p83_p4), %v353_v3  ;;  %v359_v6 = vld [vmem:[%s1466_s12 + $0x90] sm:$0xff] (%p83_p4) }
  0x1b   : > { %356 = vst [vmem:[%s1471_s13 + $0x20] sm:$0xff] (%p83_p4), %v355_v4  ;;  %358 = vst [vmem:[%s1471_s13 + $0x28] sm:$0xff] (%p83_p4), %v357_v5  ;;  %v361_v7 = vld [vmem:[%s1466_s12 + $0xa8] sm:$0xff] (%p83_p4)  ;;  %v363_v8 = vld [vmem:[%s1466_s12 + $0xc0] sm:$0xff] (%p83_p4) }
  0x1c   : > { %360 = vst [vmem:[%s1471_s13 + $0x30] sm:$0xff] %v359_v6  ;;  %362 = vst [vmem:[%s1471_s13 + $0x38] sm:$0xff] %v361_v7  ;;  %v365_v9 = vld [vmem:[%s1466_s12 + $0xd8] sm:$0xff]  ;;  %v367_v10 = vld [vmem:[%s1466_s12 + $0xf0] sm:$0xff] }
  0x1d   : > { %364 = vst [vmem:[%s1471_s13 + $0x40] sm:$0xff] %v363_v8  ;;  %v369_v11 = vld [vmem:[%s1466_s12 + $0x108] sm:$0xff]  ;;  %366 = vst [vmem:[%s1471_s13 + $0x48] sm:$0xff] %v365_v9  ;;  %v371_v12 = vld [vmem:[%s1466_s12 + $0x120] sm:$0xff] }
  0x1e   : > { %368 = vst [vmem:[%s1471_s13 + $0x50] sm:$0xff] %v367_v10  ;;  %370 = vst [vmem:[%s1471_s13 + $0x58] sm:$0xff] %v369_v11  ;;  %v373_v13 = vld [vmem:[%s1466_s12 + $0x138] sm:$0xff]  ;;  %v375_v14 = vld [vmem:[%s1466_s12 + $0x150] sm:$0xff] }
  0x1f   : > { %372 = vst [vmem:[%s1471_s13 + $0x60] sm:$0xff] %v371_v12  ;;  %374 = vst [vmem:[%s1471_s13 + $0x68] sm:$0xff] %v373_v13  ;;  %v377_v15 = vld [vmem:[%s1466_s12 + $0x168] sm:$0xff]  ;;  %v379_v16 = vld [vmem:[%s1466_s12 + $0x180] sm:$0xff] }
  0x20   : > { %376 = vst [vmem:[%s1471_s13 + $0x70] sm:$0xff] %v375_v14  ;;  %v381_v17 = vld [vmem:[%s1466_s12 + $0x198] sm:$0xff]  ;;  %378 = vst [vmem:[%s1471_s13 + $0x78] sm:$0xff] %v377_v15  ;;  %v383_v18 = vld [vmem:[%s1466_s12 + $0x1b0] sm:$0xff] }
  0x21   : > { %380 = vst [vmem:[%s1471_s13 + $0x80] sm:$0xff] %v379_v16  ;;  %382 = vst [vmem:[%s1471_s13 + $0x88] sm:$0xff] %v381_v17  ;;  %v385_v19 = vld [vmem:[%s1466_s12 + $0x1c8] sm:$0xff]  ;;  %v387_v20 = vld [vmem:[%s1466_s12 + $0x1e0] sm:$0xff] }
  0x22   : > { %384 = vst [vmem:[%s1471_s13 + $0x90] sm:$0xff] %v383_v18  ;;  %386 = vst [vmem:[%s1471_s13 + $0x98] sm:$0xff] %v385_v19  ;;  %v389_v21 = vld [vmem:[%s1466_s12 + $0x1f8] sm:$0xff]  ;;  %v391_v22 = vld [vmem:[%s1466_s12 + $0x210] sm:$0xff] }
  0x23   : > { %388 = vst [vmem:[%s1471_s13 + $0xa0] sm:$0xff] %v387_v20  ;;  %v393_v23 = vld [vmem:[%s1466_s12 + $0x228] sm:$0xff]  ;;  %390 = vst [vmem:[%s1471_s13 + $0xa8] sm:$0xff] %v389_v21  ;;  %v395_v24 = vld [vmem:[%s1466_s12 + $0x240] sm:$0xff] }
  0x24   : > { %392 = vst [vmem:[%s1471_s13 + $0xb0] sm:$0xff] %v391_v22  ;;  %394 = vst [vmem:[%s1471_s13 + $0xb8] sm:$0xff] %v393_v23  ;;  %v397_v25 = vld [vmem:[%s1466_s12 + $0x258] sm:$0xff]  ;;  %v399_v26 = vld [vmem:[%s1466_s12 + $0x270] sm:$0xff] }
  0x25   : > { %396 = vst [vmem:[%s1471_s13 + $0xc0] sm:$0xff] %v395_v24  ;;  %398 = vst [vmem:[%s1471_s13 + $0xc8] sm:$0xff] %v397_v25  ;;  %v401_v27 = vld [vmem:[%s1466_s12 + $0x288] sm:$0xff]  ;;  %v403_v28 = vld [vmem:[%s1466_s12 + $0x2a0] sm:$0xff] }
  0x26   : > { %400 = vst [vmem:[%s1471_s13 + $0xd0] sm:$0xff] %v399_v26  ;;  %v405_v29 = vld [vmem:[%s1466_s12 + $0x2b8] sm:$0xff]  ;;  %402 = vst [vmem:[%s1471_s13 + $0xd8] sm:$0xff] %v401_v27  ;;  %v407_v30 = vld [vmem:[%s1466_s12 + $0x2d0] sm:$0xff] }
  0x27   : > { %404 = vst [vmem:[%s1471_s13 + $0xe0] sm:$0xff] %v403_v28  ;;  %406 = vst [vmem:[%s1471_s13 + $0xe8] sm:$0xff] %v405_v29  ;;  %v409_v31 = vld [vmem:[%s1466_s12 + $0x2e8] sm:$0xff] }
  0x28   : > { %408 = vst [vmem:[%s1471_s13 + $0xf0] sm:$0xff] %v407_v30  ;;  %410 = vst [vmem:[%s1471_s13 + $0xf8] sm:$0xff] %v409_v31 }
  0x29 PF: > { %p1094_p11 = scmp.ge.s32.totalorder %s1370_s23, 1  ;;  %p423_p12 = scmp.lt.s32.totalorder %s1370_s23, 4 }
  0x2b   : > { %p424_p13 = pnand %p1094_p11, %p423_p12 }
  0x2c   : > { %s1537_s14 = sand.u32 (!%p424_p13), 1, %s1354_s19   ;;  %s1097_s15 = sshll.u32 (!%p424_p13), %s1362_s21, 1 }
  0x2d   : > { %427 = sbr.rel (%p424_p13) target bundleno = 682 (0x2aa), region = 74  ;;  %s1095_s16 = sshll.u32 (!%p424_p13), %s1537_s14, 8 }
  0x2e   : > { %s1096_s17 = sshll.u32 (!%p424_p13), %s1537_s14, 5  ;;  %p494_p0 = scmp.lt.s32.totalorder (!%p424_p13), %s1097_s15, 5 }
  0x2f   : > { %s1548_s29 = scalar_lea.vmem (!%p424_p13), [#allocation3], %s1095_s16  ;;  %s1550_s7 = scalar_lea.vmem (!%p424_p13), [#allocation4], %s1096_s17 }
  0x30   : > { %p1098_p1 = scmp.ne.s32.totalorder (!%p424_p13), %s1362_s21, 0 }
  0x34   : > { %s1683_s15 = smov (!%p494_p0, %s1097_s15), 5  ;;  %513 = sbr.rel (%p1098_p1) target bundleno = 382 (0x17e), region = 82 }
  0x35   : > { %s496_s27 = scalar_lea.vmem %s1669_s2, %s1683_s15  ;;  %v514_v32 = vld [vmem:[%s1667_s0] sm:$0xff] (!%p1098_p1)  ;;  %v516_v33 = vld [vmem:[%s1667_s0 + $0x10] sm:$0xff] (!%p1098_p1)  ;;  %v515_v34 = vld [vmem:[%s1667_s0 + $0x8] sm:$0xff] (!%p1098_p1)  ;;  %v593_v14 = vlaneseq (!%p1098_p1) }
  0x36   : > { %v518_v35 = vunpack.c.l.bf16 (!%p1098_p1), %v514_v32  ;;  %v519_v36 = vunpack.c.h.bf16 (!%p1098_p1), %v514_v32  ;;  %v522_v37 = vunpack.c.l.bf16 (!%p1098_p1), %v516_v33  ;;  %v523_v38 = vunpack.c.h.bf16 (!%p1098_p1), %v516_v33  ;;  %v517_v39 = vld [vmem:[%s1667_s0 + $0x18] sm:$0xff] (!%p1098_p1)  ;;  %v591_v28 = vld [vmem:[%s1670_s3] sm:$0x3] (!%p1098_p1) }
  0x37   : > { %v520_v40 = vunpack.c.l.bf16 (!%p1098_p1), %v515_v34  ;;  %v521_v41 = vunpack.c.h.bf16 (!%p1098_p1), %v515_v34  ;;  %v524_v42 = vunpack.c.l.bf16 (!%p1098_p1), %v517_v39  ;;  %v525_v43 = vunpack.c.h.bf16 (!%p1098_p1), %v517_v39  ;;  %v611_v32 = vld [vmem:[%s1671_s4] sm:$0x3] (!%p1098_p1) }
  0x38   : > { %v526_v44 = vadd.f32 (!%p1098_p1), %v519_v36, %v518_v35  ;;  %v532_v45 = vadd.f32 (!%p1098_p1), %v523_v38, %v522_v37  ;;  %v594_v20 = vshrl.u32 (!%p1098_p1), %v593_v14, 7 }
  0x39   : > { %v529_v46 = vadd.f32 (!%p1098_p1), %v521_v41, %v520_v40  ;;  %v535_v47 = vadd.f32 (!%p1098_p1), %v525_v43, %v524_v42 }
  0x3a   : > { %527 = vadd.xlane.f32.xlu0 (!%p1098_p1), %v526_v44  ;;  %533 = vadd.xlane.f32.xlu1 (!%p1098_p1), %v532_v45  ;;  %v595_v25 = vsub.s32 (!%p1098_p1), 0, %v594_v20  ;;  %v599_v26 = vsub.s32 (!%p1098_p1), 1, %v594_v20 }
  0x3c   : > { %v596_v29 = vrot.slane %v591_v28, %v595_v25  ;;  %v600_v30 = vrot.slane %v591_v28, %v599_v26 }
  0x3e   : > { %530 = vadd.xlane.f32.xlu0 %v529_v46  ;;  %536 = vadd.xlane.f32.xlu1 %v535_v47 }
  0xc7   : > { %v528_v48 = vpop.xlane.xlu0 %527  ;;  %v534_v49 = vpop.xlane.xlu1 %533 }
  0xc8   : > { %v539_v50 = vmul.f32 0.00390625, %v528_v48  ;;  %v541_v51 = vmul.f32 0.00390625, %v534_v49 }
  0xca   : > { %v543_v52 = vsub.f32 %v518_v35, %v539_v50  ;;  %v544_v53 = vsub.f32 %v519_v36, %v539_v50  ;;  %v547_v54 = vsub.f32 %v522_v37, %v541_v51  ;;  %v548_v55 = vsub.f32 %v523_v38, %v541_v51 }
  0xcb   : > { %v531_v56 = vpop.xlane.xlu0 %530  ;;  %v537_v57 = vpop.xlane.xlu1 %536  ;;  %v616_v36 = vrot.slane %v611_v32, %v595_v25  ;;  %v620_v37 = vrot.slane %v611_v32, %v599_v26 }
  0xcc   : > { %v540_v58 = vmul.f32 0.00390625, %v531_v56  ;;  %v542_v59 = vmul.f32 0.00390625, %v537_v57  ;;  %v551_v60 = vmul.f32 %v543_v52, %v543_v52  ;;  %v552_v61 = vmul.f32 %v544_v53, %v544_v53 }
  0xcd   : > { %v555_v62 = vmul.f32 %v547_v54, %v547_v54  ;;  %v556_v63 = vmul.f32 %v548_v55, %v548_v55 }
  0xce   : > { %v545_v0 = vsub.f32 %v520_v40, %v540_v58  ;;  %v546_v1 = vsub.f32 %v521_v41, %v540_v58  ;;  %v549_v2 = vsub.f32 %v524_v42, %v542_v59  ;;  %v550_v3 = vsub.f32 %v525_v43, %v542_v59 }
  0xcf   : > { %v559_v4 = vadd.f32 %v552_v61, %v551_v60  ;;  %v565_v9 = vadd.f32 %v556_v63, %v555_v62 }
  0xd0   : > { %v553_v5 = vmul.f32 %v545_v0, %v545_v0  ;;  %v554_v6 = vmul.f32 %v546_v1, %v546_v1  ;;  %v557_v7 = vmul.f32 %v549_v2, %v549_v2  ;;  %v558_v8 = vmul.f32 %v550_v3, %v550_v3 }
  0xd1   : > { %560 = vadd.xlane.f32.xlu0 %v559_v4 }
  0xd2   : > { %v562_v10 = vadd.f32 %v554_v6, %v553_v5  ;;  %v568_v11 = vadd.f32 %v558_v8, %v557_v7 }
  0xd4   : > { %563 = vadd.xlane.f32.xlu1 %v562_v10 }
  0xd5   : > { %566 = vadd.xlane.f32.xlu0 %v565_v9 }
  0xd8   : > { %569 = vadd.xlane.f32.xlu1 %v568_v11 }
 0x15e   : > { %v561_v12 = vpop.xlane.xlu0 %560 }
 0x15f   : > { %v571_v13 = vmul.f32 0.00390625, %v561_v12 }
 0x161   : > { %v575_v15 = vadd.f32 1e-06, %v571_v13  ;;  %v564_v16 = vpop.xlane.xlu1 %563 }
 0x162   : > { %v572_v17 = vmul.f32 0.00390625, %v564_v16  ;;  %v567_v18 = vpop.xlane.xlu0 %566 }
 0x163   : > { %1236 = vrsqrt.f32 %v575_v15  ;;  %v573_v19 = vmul.f32 0.00390625, %v567_v18 }
 0x164   : > { %v576_v21 = vadd.f32 1e-06, %v572_v17 }
 0x165   : > { %v577_v22 = vadd.f32 1e-06, %v573_v19  ;;  %v570_v23 = vpop.xlane.xlu1 %569 }
 0x166   : > { %1238 = vrsqrt.f32 %v576_v21  ;;  %v574_v24 = vmul.f32 0.00390625, %v570_v23 }
 0x167   : > { %1240 = vrsqrt.f32 %v577_v22 }
 0x168   : > { %v578_v27 = vadd.f32 1e-06, %v574_v24 }
 0x16a   : > { %1242 = vrsqrt.f32 %v578_v27 }
 0x16d   : > { %v1237_v31 = vpop.eup %1236 }
 0x16e   : > { %v583_v33 = vmul.f32 %v1237_v31, %v543_v52  ;;  %v584_v34 = vmul.f32 %v1237_v31, %v544_v53 }
 0x170   : > { %v1239_v35 = vpop.eup %1238  ;;  %v603_v38 = vmul.f32 %v596_v29, %v583_v33  ;;  %v604_v39 = vmul.f32 %v600_v30, %v584_v34 }
 0x171   : > { %v1241_v40 = vpop.eup %1240  ;;  %v585_v41 = vmul.f32 %v1239_v35, %v545_v0  ;;  %v586_v42 = vmul.f32 %v1239_v35, %v546_v1 }
 0x172   : > { %v587_v43 = vmul.f32 %v1241_v40, %v547_v54  ;;  %v588_v44 = vmul.f32 %v1241_v40, %v548_v55  ;;  %v623_v48 = vadd.f32 %v616_v36, %v603_v38  ;;  %v624_v49 = vadd.f32 %v620_v37, %v604_v39 }
 0x173   : > { %v605_v45 = vmul.f32 %v596_v29, %v585_v41  ;;  %v606_v46 = vmul.f32 %v600_v30, %v586_v42 }
 0x174   : > { %v1243_v47 = vpop.eup %1242  ;;  %v607_v50 = vmul.f32 %v596_v29, %v587_v43  ;;  %v608_v51 = vmul.f32 %v600_v30, %v588_v44 }
 0x175   : > { %v625_v56 = vadd.f32 %v616_v36, %v605_v45  ;;  %v626_v52 = vadd.f32 %v620_v37, %v606_v46  ;;  %v589_v53 = vmul.f32 %v1243_v47, %v549_v2  ;;  %v590_v57 = vmul.f32 %v1243_v47, %v550_v3 }
 0x176   : > { %v627_v62 = vadd.f32 %v616_v36, %v607_v50  ;;  %v628_v54 = vadd.f32 %v620_v37, %v608_v51 }
 0x177   : > { %v631_v58 = vpack.c.bf16 %v625_v56, %v623_v48  ;;  %v632_v59 = vpack.c.bf16 %v626_v52, %v624_v49  ;;  %v609_v60 = vmul.f32 %v596_v29, %v589_v53  ;;  %v610_v61 = vmul.f32 %v600_v30, %v590_v57 }
 0x179   : > { %635 = vst [vmem:[#allocation2] sm:$0xff] %v631_v58  ;;  %636 = vst [vmem:[#allocation2 + $0x8] sm:$0xff] %v632_v59  ;;  %v629_v55 = vadd.f32 %v616_v36, %v609_v60  ;;  %v630_v63 = vadd.f32 %v620_v37, %v610_v61 }
 0x17b   : > { %v633_v0 = vpack.c.bf16 %v629_v55, %v627_v62  ;;  %v634_v1 = vpack.c.bf16 %v630_v63, %v628_v54 }
 0x17d   : > { %637 = vst [vmem:[#allocation2 + $0x10] sm:$0xff] %v633_v0  ;;  %638 = vst [vmem:[#allocation2 + $0x18] sm:$0xff] %v634_v1 }
 0x17e PF: > { %v1244_v2 = vld [vmem:[%s1548_s29 + $0x4] ss:$8 sps:$4 sm:$0xff]   ;;  %v1246_v3 = vld [vmem:[%s1548_s29] ss:$8 sps:$4 sm:$0xff]   ;;  %v1247_v4 = vld [vmem:[%s1548_s29 + $0x14] ss:$8 sps:$4 sm:$0xff]   ;;  %v677_v38 = vlaneseq }
 0x17f   : > { %847 = vmatprep.subr.bf16.mxu0 %v1244_v2  ;;  %1146 = vmatprep.subr.bf16.mxu1 %v1244_v2  ;;  %v1249_v5 = vld [vmem:[%s1548_s29 + $0x10] ss:$8 sps:$4 sm:$0xff]   ;;  %v1250_v6 = vld [vmem:[%s1548_s29 + $0x24] ss:$8 sps:$4 sm:$0xff]   ;;  %v1252_v7 = vld [vmem:[%s1548_s29 + $0x20] ss:$8 sps:$4 sm:$0xff]  }
 0x180   : > { %848 = vmatpush1.bf16.msra.mxu0 %v1246_v3  ;;  %1162 = vmatpush1.bf16.msra.mxu1 %v1246_v3  ;;  %v1253_v8 = vld [vmem:[%s1548_s29 + $0x34] ss:$8 sps:$4 sm:$0xff]   ;;  %v1255_v9 = vld [vmem:[%s1548_s29 + $0x30] ss:$8 sps:$4 sm:$0xff]   ;;  %v1256_v10 = vld [vmem:[%s1548_s29 + $0x44] ss:$8 sps:$4 sm:$0xff]  }
 0x181   : > { %849 = vmatprep.subr.bf16.mxu0 %v1247_v4  ;;  %1147 = vmatprep.subr.bf16.mxu1 %v1247_v4  ;;  %v1258_v11 = vld [vmem:[%s1548_s29 + $0x40] ss:$8 sps:$4 sm:$0xff]   ;;  %v1259_v12 = vld [vmem:[%s1548_s29 + $0x54] ss:$8 sps:$4 sm:$0xff]   ;;  %v1261_v13 = vld [vmem:[%s1548_s29 + $0x50] ss:$8 sps:$4 sm:$0xff]  }
 0x182   : > { %v1262_v14 = vld [vmem:[%s1548_s29 + $0x64] ss:$8 sps:$4 sm:$0xff]   ;;  %v1264_v17 = vld [vmem:[%s1548_s29 + $0x60] ss:$8 sps:$4 sm:$0xff]   ;;  %v1265_v18 = vld [vmem:[%s1548_s29 + $0x74] ss:$8 sps:$4 sm:$0xff]  }
 0x183   : > { %v640_v15 = vld [vmem:[#allocation2 + $0x8] sm:$0xff]  ;;  %v1267_v19 = vld [vmem:[%s1548_s29 + $0x70] ss:$8 sps:$4 sm:$0xff]   ;;  %v1271_v22 = vld [vmem:[%s1548_s29 + $0x94] ss:$8 sps:$4 sm:$0xff]   ;;  %v678_v39 = vshrl.u32 %v677_v38, 7 }
 0x184   : > { %850 = vmatpush1.bf16.msra.mxu0 %v1249_v5  ;;  %1163 = vmatpush1.bf16.msra.mxu1 %v1249_v5  ;;  %v642_v16 = vld [vmem:[#allocation2 + $0x18] sm:$0xff]  ;;  %v1268_v20 = vld [vmem:[%s1548_s29 + $0x84] ss:$8 sps:$4 sm:$0xff]   ;;  %v1270_v21 = vld [vmem:[%s1548_s29 + $0x80] ss:$8 sps:$4 sm:$0xff]   ;;  %s945_s15 = sshll.u32 %s1550_s7, 4  ;;  %s1615_s15 = int_to_ptr.vmem [resolvable:$true] %s945_s15 }
 0x185   : > { %851 = vmatprep.subr.bf16.mxu0 %v1250_v6  ;;  %1148 = vmatprep.subr.bf16.mxu1 %v1250_v6  ;;  %v1273_v23 = vld [vmem:[%s1548_s29 + $0x90] ss:$8 sps:$4 sm:$0xff]   ;;  %v1274_v24 = vld [vmem:[%s1548_s29 + $0xa4] ss:$8 sps:$4 sm:$0xff]   ;;  %v1276_v25 = vld [vmem:[%s1548_s29 + $0xa0] ss:$8 sps:$4 sm:$0xff]  }
 0x186   : > { %879 = vmatprep.mubr.bf16.mxu0 %v640_v15  ;;  %889 = vmatprep.mubr.bf16.mxu1 %v642_v16  ;;  %v1277_v26 = vld [vmem:[%s1548_s29 + $0xb4] ss:$8 sps:$4 sm:$0xff]   ;;  %v1279_v27 = vld [vmem:[%s1548_s29 + $0xb0] ss:$8 sps:$4 sm:$0xff]   ;;  %v1280_v28 = vld [vmem:[%s1548_s29 + $0xc4] ss:$8 sps:$4 sm:$0xff]  }
 0x187   : > { %v1282_v29 = vld [vmem:[%s1548_s29 + $0xc0] ss:$8 sps:$4 sm:$0xff]   ;;  %v1283_v30 = vld [vmem:[%s1548_s29 + $0xd4] ss:$8 sps:$4 sm:$0xff]   ;;  %v1285_v31 = vld [vmem:[%s1548_s29 + $0xd0] ss:$8 sps:$4 sm:$0xff]  }
 0x188   : > { %852 = vmatpush1.bf16.msra.mxu0 %v1252_v7  ;;  %1164 = vmatpush1.bf16.msra.mxu1 %v1252_v7  ;;  %v1286_v32 = vld [vmem:[%s1548_s29 + $0xe4] ss:$8 sps:$4 sm:$0xff]   ;;  %v1288_v33 = vld [vmem:[%s1548_s29 + $0xe0] ss:$8 sps:$4 sm:$0xff]   ;;  %v1289_v34 = vld [vmem:[%s1548_s29 + $0xf4] ss:$8 sps:$4 sm:$0xff]  }
 0x189   : > { %853 = vmatprep.subr.bf16.mxu0 %v1253_v8  ;;  %1149 = vmatprep.subr.bf16.mxu1 %v1253_v8  ;;  %v1291_v35 = vld [vmem:[%s1548_s29 + $0xf0] ss:$8 sps:$4 sm:$0xff]   ;;  %v639_v36 = vld [vmem:[#allocation2] sm:$0xff]  ;;  %v679_v40 = vsub.s32 0, %v678_v39  ;;  %v683_v42 = vsub.s32 1, %v678_v39  ;;  %s1145_s29 = sshll.u32 %s1362_s21, 7 }
 0x18a   : > { %v641_v37 = vld [vmem:[#allocation2 + $0x10] sm:$0xff]  ;;  %v675_v41 = vld [vmem:[%s496_s27] sm:$0x3]  ;;  %s1613_s12 = scalar_lea.hbm %s1672_s5, %s1145_s29  ;;  %s929_s13 = scalar_lea.sflag [#allocation5], %s1537_s14 }
 0x18b   : > { %v680_v43 = vrot.slane %v675_v41, %v679_v40  ;;  %v684_v44 = vrot.slane %v675_v41, %v683_v42  ;;  %s1292_s16 = scalar_lea.vmem %s1615_s15, 512  ;;  %s1372_s17 = smov [#allocation4]  }
 0x18c   : > { %854 = vmatpush1.bf16.msra.mxu0 %v1255_v9  ;;  %1165 = vmatpush1.bf16.msra.mxu1 %v1255_v9  ;;  %p1293_p2 = scmp.ne.s32.totalorder %s1615_s15, %s1292_s16  ;;  %s1296_s24 = sshll.u32 %s1372_s17, 4  ;;  %s1297_s24 = int_to_ptr.vmem [resolvable:$false] %s1296_s24 }
 0x18d   : > { %855 = vmatprep.subr.bf16.mxu0 %v1256_v10  ;;  %1150 = vmatprep.subr.bf16.mxu1 %v1256_v10  ;;  %s1298_s25 = scalar_lea.vmem %s1297_s24, 1024  ;;  %p1299_p6 = scmp.lt.s32.totalorder %s1615_s15, %s1297_s24 }
 0x18e   : > { %p1294_p3 = pnand %p1293_p2, %p1445_p5  ;;  %p1300_p7 = scmp.lt.s32.totalorder %s1298_s25, %s1292_s16 }
 0x190   : > { %856 = vmatpush1.bf16.msra.mxu0 %v1258_v11  ;;  %1166 = vmatpush1.bf16.msra.mxu1 %v1258_v11  ;;  %p1295_p4 = pneg %p1294_p3  ;;  %p1301_p8 = por %p1300_p7, %p1299_p6 }
 0x191   : > { %857 = vmatprep.subr.bf16.mxu0 %v1259_v12  ;;  %1151 = vmatprep.subr.bf16.mxu1 %v1259_v12 }
 0x192   : > { %p1302_p10 = pnand %p1301_p8, %p1295_p4 }
 0x194   : > { %858 = vmatpush1.bf16.msra.mxu0 %v1261_v13  ;;  %1167 = vmatpush1.bf16.msra.mxu1 %v1261_v13 }
 0x195   : > { %859 = vmatprep.subr.bf16.mxu0 %v1262_v14  ;;  %1152 = vmatprep.subr.bf16.mxu1 %v1262_v14 }
 0x198   : > { %860 = vmatpush1.bf16.msra.mxu0 %v1264_v17  ;;  %1168 = vmatpush1.bf16.msra.mxu1 %v1264_v17 }
 0x199   : > { %861 = vmatprep.subr.bf16.mxu0 %v1265_v18  ;;  %1153 = vmatprep.subr.bf16.mxu1 %v1265_v18 }
 0x19c   : > { %862 = vmatpush1.bf16.msra.mxu0 %v1267_v19  ;;  %1169 = vmatpush1.bf16.msra.mxu1 %v1267_v19 }
 0x19d   : > { %863 = vmatprep.subr.bf16.mxu0 %v1268_v20  ;;  %1154 = vmatprep.subr.bf16.mxu1 %v1268_v20 }
 0x1a0   : > { %864 = vmatpush1.bf16.msra.mxu0 %v1270_v21  ;;  %1170 = vmatpush1.bf16.msra.mxu1 %v1270_v21 }
 0x1a1   : > { %865 = vmatprep.subr.bf16.mxu0 %v1271_v22  ;;  %1155 = vmatprep.subr.bf16.mxu1 %v1271_v22 }
 0x1a4   : > { %866 = vmatpush1.bf16.msra.mxu0 %v1273_v23  ;;  %1171 = vmatpush1.bf16.msra.mxu1 %v1273_v23 }
 0x1a5   : > { %867 = vmatprep.subr.bf16.mxu0 %v1274_v24  ;;  %1156 = vmatprep.subr.bf16.mxu1 %v1274_v24 }
 0x1a8   : > { %868 = vmatpush1.bf16.msra.mxu0 %v1276_v25  ;;  %1172 = vmatpush1.bf16.msra.mxu1 %v1276_v25 }
 0x1a9   : > { %869 = vmatprep.subr.bf16.mxu0 %v1277_v26  ;;  %1157 = vmatprep.subr.bf16.mxu1 %v1277_v26 }
 0x1ac   : > { %870 = vmatpush1.bf16.msra.mxu0 %v1279_v27  ;;  %1173 = vmatpush1.bf16.msra.mxu1 %v1279_v27 }
 0x1ad   : > { %871 = vmatprep.subr.bf16.mxu0 %v1280_v28  ;;  %1158 = vmatprep.subr.bf16.mxu1 %v1280_v28 }
 0x1b0   : > { %872 = vmatpush1.bf16.msra.mxu0 %v1282_v29  ;;  %1174 = vmatpush1.bf16.msra.mxu1 %v1282_v29 }
 0x1b1   : > { %873 = vmatprep.subr.bf16.mxu0 %v1283_v30  ;;  %1159 = vmatprep.subr.bf16.mxu1 %v1283_v30 }
 0x1b4   : > { %874 = vmatpush1.bf16.msra.mxu0 %v1285_v31  ;;  %1175 = vmatpush1.bf16.msra.mxu1 %v1285_v31 }
 0x1b5   : > { %875 = vmatprep.subr.bf16.mxu0 %v1286_v32  ;;  %1160 = vmatprep.subr.bf16.mxu1 %v1286_v32 }
 0x1b8   : > { %876 = vmatpush1.bf16.msra.mxu0 %v1288_v33  ;;  %1176 = vmatpush1.bf16.msra.mxu1 %v1288_v33 }
 0x1b9   : > { %877 = vmatprep.subr.bf16.mxu0 %v1289_v34  ;;  %1161 = vmatprep.subr.bf16.mxu1 %v1289_v34 }
 0x1bc   : > { %878 = vmatpush1.bf16.msra.mxu0 %v1291_v35  ;;  %1177 = vmatpush1.bf16.msra.mxu1 %v1291_v35 }
 0x1bf   : > { %880 = vmatmul.mubr.bf16.vlgmr.msra.gmra.mrb[0].mxu0 %v639_v36  ;;  %890 = vmatmul.mubr.bf16.vlgmr.msra.gmra.mrb[0].mxu1 %v641_v37 }
 0x292   : > { %v881_v45 = vpop.f32.mrb[0].mxu0  ;;  %v891_v46 = vpop.f32.mrb[0].mxu1 }
 0x293   : > { %v882_v47 = vadd.f32 %v881_v45, %v680_v43  ;;  %v892_v48 = vadd.f32 %v891_v46, %v680_v43  ;;  %v883_v49 = vpop.f32.mrb[1].mxu0  ;;  %v893_v50 = vpop.f32.mrb[1].mxu1 }
 0x294   : > { %v884_v51 = vadd.f32 %v883_v49, %v684_v44  ;;  %v894_v56 = vadd.f32 %v893_v50, %v684_v44  ;;  %v885_v52 = vpop.f32.mrb[2].mxu0  ;;  %v895_v53 = vpop.f32.mrb[2].mxu1 }
 0x295   : > { %v886_v57 = vadd.f32 %v885_v52, %v680_v43  ;;  %v896_v58 = vadd.f32 %v895_v53, %v680_v43  ;;  %v887_v59 = vpop.f32.mrb[3].mxu0  ;;  %v897_v60 = vpop.f32.mrb[3].mxu1 }
 0x296   : > { %v1141_v61 = vpack.c.bf16 %v884_v51, %v882_v47  ;;  %v1143_v62 = vpack.c.bf16 %v894_v56, %v892_v48  ;;  %v888_v54 = vadd.f32 %v887_v59, %v684_v44  ;;  %v898_v55 = vadd.f32 %v897_v60, %v684_v44 }
 0x298   : > { %924 = vst [vmem:[%s1550_s7] sm:$0xff] %v1141_v61  ;;  %926 = vst [vmem:[%s1550_s7 + $0x10] sm:$0xff] %v1143_v62  ;;  %v1142_v63 = vpack.c.bf16 %v888_v54, %v886_v57  ;;  %v1144_v0 = vpack.c.bf16 %v898_v55, %v896_v58 }
 0x29a   : > { %925 = vst [vmem:[%s1550_s7 + $0x8] sm:$0xff] %v1142_v63  ;;  %927 = vst [vmem:[%s1550_s7 + $0x18] sm:$0xff] %v1144_v0 }
 0x29b   : > { %1305 = shalt.err (!%p1302_p10)
}
 0x29c   : > { %s1306_s7 = scalar_lea.hbm %s1613_s12, 512  ;;  %s1310_s10 = scalar_lea.hbm %s1672_s5, 1536 }
 0x29d   : > { %p1307_p11 = scmp.ne.s32.totalorder %s1613_s12, %s1306_s7  ;;  %p1311_p0 = scmp.lt.u32.totalorder %s1613_s12, %s1672_s5 }
 0x29e   : > { %p1312_p1 = scmp.lt.u32.totalorder %s1310_s10, %s1306_s7  ;;  %p1314_p3 = scmp.lt.u32.totalorder %s1306_s7, %s1613_s12 }
 0x29f   : > { %p1308_p12 = pnand %p1307_p11, %p1445_p5 }
 0x2a0   : > { %p1313_p2 = por %p1312_p1, %p1311_p0 }
 0x2a1   : > { %p1309_p13 = pneg %p1308_p12 }
 0x2a2   : > { %p1315_p4 = por %p1314_p3, %p1313_p2 }
 0x2a4   : > { %p1316_p6 = pnand %p1315_p4, %p1309_p13 }
 0x2a6   : > { %1319 = shalt.err (!%p1316_p6)
}
 0x2a7   : > { %s1373_s21 = smov 128   ;;  %s1374_s27 = smov 384  }
 0x2a8   : > { %s1375_s16 = smov 8  }
 0x2a9   : > { %1178 = dma.vmem_to_hbm [thread:$0]  (%p1445_p5), %s1615_s15, 512, %s1613_s12, %s929_s13, %s1373_s21, %s1374_s27, %s1375_s16  }
 0x2aa PF: > { %p1184_p7 = scmp.ge.s32.totalorder %s1370_s23, 2  ;;  %s960_s17 = sand.u32 1, %s1350_s18  }
 0x2ab   : > { %s961_s24 = scalar_lea.sflag [#allocation5], %s960_s17 }
 0x2ac   : > { %p1181_p8 = pnand %p1184_p7, %p1456_p9 }
 0x2ae   : > { %1345 = dma.done.wait (!%p1181_p8), %s961_s24, 512  }
 0x2af   : > { %1347 = vsyncadd (!%p1181_p8), %s961_s24, 4294966784  ;;  %s18_s23 = sadd.s32 1, %s1370_s23   ;;  %s1675_s18 = smov %s1354_s19 }
 0x2b0   : > { %p15_p10 = scmp.ge.s32.totalorder %s18_s23, 5   ;;  %s1676_s19 = smov %s1358_s20 }
 0x2b1   : > { %s1677_s20 = smov %s1454_s30  ;;  %s1678_s21 = smov %s1366_s22 }
 0x2b2   : > { %s1679_s22 = smov %s1681_s26  ;;  %17 = sbr.rel (!%p15_p10) target bundleno = 4 (0x4), region = 134 }
 0x2b9   :  { %966 = vsyncpa [#allocation5], 1 }
 0x2ba   :  { %968 = vsyncpa [#allocation5 + $0x1], 1 }

// kernel: _lambda_.23
= control target key start
LH: loop header
LB: loop body
LE: loop exit
PB: predicated region body
PF: predicated region fallthrough
CT: control target
= control target key end

     0   :  { %s254_s0 = inlined_call_operand.vmem [shape: bf16[32,256], index: 0, kind: input, shape index: {}]   ;;  %s255_s1 = inlined_call_operand.vmem [shape: f32[1,256], index: 1, kind: input, shape index: {}]   ;;  %s256_s2 = inlined_call_operand.vmem [shape: f32[1,256], index: 2, kind: input, shape index: {}]   ;;  %s257_s3 = inlined_call_operand.hbm [shape: f32[32,256], index: 3, kind: output, shape index: {}]  }
   0x1   :  { %v15_v0 = vld [vmem:[%s254_s0] sm:$0xff]  ;;  %v17_v1 = vld [vmem:[%s254_s0 + $0x10] sm:$0xff]  ;;  %v16_v2 = vld [vmem:[%s254_s0 + $0x8] sm:$0xff] }
   0x2   :  { %v19_v3 = vunpack.c.l.bf16 %v15_v0  ;;  %v20_v4 = vunpack.c.h.bf16 %v15_v0  ;;  %v23_v5 = vunpack.c.l.bf16 %v17_v1  ;;  %v24_v6 = vunpack.c.h.bf16 %v17_v1  ;;  %v18_v7 = vld [vmem:[%s254_s0 + $0x18] sm:$0xff] }
   0x3   :  { %8 = vsyncpa [#allocation3], 0  ;;  %v21_v8 = vunpack.c.l.bf16 %v16_v2  ;;  %v22_v9 = vunpack.c.h.bf16 %v16_v2  ;;  %v25_v10 = vunpack.c.l.bf16 %v18_v7  ;;  %v26_v11 = vunpack.c.h.bf16 %v18_v7  ;;  %v92_v60 = vld [vmem:[%s255_s1] sm:$0x3]  ;;  %s191_s1 = smov [#allocation2]  }
   0x4   :  { %v27_v12 = vadd.f32 %v20_v4, %v19_v3  ;;  %v33_v13 = vadd.f32 %v24_v6, %v23_v5  ;;  %v94_v46 = vlaneseq  ;;  %v112_v61 = vld [vmem:[%s256_s2] sm:$0x3]  ;;  %s145_s2 = sshll.u32 %s191_s1, 4  ;;  %s146_s2 = int_to_ptr.vmem [resolvable:$true] %s145_s2 }
   0x5   :  { %v30_v14 = vadd.f32 %v22_v9, %v21_v8  ;;  %v36_v15 = vadd.f32 %v26_v11, %v25_v10  ;;  %s167_s23 = scalar_lea.vmem %s146_s2, 1024  ;;  %p172_p1 = scmp.lt.s32.totalorder %s146_s2, %s146_s2 }
   0x6   :  { %28 = vadd.xlane.f32.xlu0 %v27_v12  ;;  %34 = vadd.xlane.f32.xlu1 %v33_v13  ;;  %v95_v52 = vshrl.u32 %v94_v46, 7  ;;  %p168_p0 = scmp.ne.s32.totalorder %s146_s2, %s167_s23  ;;  %p173_p2 = scmp.lt.s32.totalorder %s167_s23, %s167_s23 }
   0x8   :  { %v96_v57 = vsub.s32 0, %v95_v52  ;;  %v100_v58 = vsub.s32 1, %v95_v52  ;;  %p174_p3 = por %p173_p2, %p172_p1 }
   0xa   :  { %31 = vadd.xlane.f32.xlu0 %v30_v14  ;;  %37 = vadd.xlane.f32.xlu1 %v36_v15  ;;  %v97_v62 = vrot.slane %v92_v60, %v96_v57  ;;  %v101_v63 = vrot.slane %v92_v60, %v100_v58  ;;  %v117_v1 = vrot.slane %v112_v61, %v96_v57  ;;  %p175_p4 = pnand %p174_p3, %p168_p0 }
   0xb   :  { %v121_v2 = vrot.slane %v112_v61, %v100_v58 }
  0x93   :  { %v29_v16 = vpop.xlane.xlu0 %28  ;;  %v35_v17 = vpop.xlane.xlu1 %34 }
  0x94   :  { %v40_v18 = vmul.f32 0.00390625, %v29_v16  ;;  %v42_v19 = vmul.f32 0.00390625, %v35_v17 }
  0x96   :  { %v44_v20 = vsub.f32 %v19_v3, %v40_v18  ;;  %v45_v21 = vsub.f32 %v20_v4, %v40_v18  ;;  %v226_v22 = vsub.f32 %v23_v5, %v42_v19  ;;  %v228_v23 = vsub.f32 %v24_v6, %v42_v19 }
  0x97   :  { %v32_v24 = vpop.xlane.xlu0 %31  ;;  %v38_v25 = vpop.xlane.xlu1 %37 }
  0x98   :  { %v41_v26 = vmul.f32 0.00390625, %v32_v24  ;;  %v43_v27 = vmul.f32 0.00390625, %v38_v25  ;;  %v52_v28 = vmul.f32 %v44_v20, %v44_v20  ;;  %v53_v29 = vmul.f32 %v45_v21, %v45_v21 }
  0x99   :  { %v56_v30 = vmul.f32 %v226_v22, %v226_v22  ;;  %v57_v31 = vmul.f32 %v228_v23, %v228_v23 }
  0x9a   :  { %v46_v32 = vsub.f32 %v21_v8, %v41_v26  ;;  %v47_v33 = vsub.f32 %v22_v9, %v41_v26  ;;  %v50_v34 = vsub.f32 %v25_v10, %v43_v27  ;;  %v51_v35 = vsub.f32 %v26_v11, %v43_v27 }
  0x9b   :  { %v60_v36 = vadd.f32 %v53_v29, %v52_v28  ;;  %v66_v41 = vadd.f32 %v57_v31, %v56_v30 }
  0x9c   :  { %v54_v37 = vmul.f32 %v46_v32, %v46_v32  ;;  %v55_v38 = vmul.f32 %v47_v33, %v47_v33  ;;  %v58_v39 = vmul.f32 %v50_v34, %v50_v34  ;;  %v59_v40 = vmul.f32 %v51_v35, %v51_v35 }
  0x9d   :  { %61 = vadd.xlane.f32.xlu0 %v60_v36 }
  0x9e   :  { %v63_v42 = vadd.f32 %v55_v38, %v54_v37  ;;  %v69_v43 = vadd.f32 %v59_v40, %v58_v39 }
  0xa0   :  { %64 = vadd.xlane.f32.xlu1 %v63_v42 }
  0xa1   :  { %67 = vadd.xlane.f32.xlu0 %v66_v41 }
  0xa4   :  { %70 = vadd.xlane.f32.xlu1 %v69_v43 }
 0x12a   :  { %v62_v44 = vpop.xlane.xlu0 %61 }
 0x12b   :  { %v72_v45 = vmul.f32 0.00390625, %v62_v44 }
 0x12d   :  { %v76_v47 = vadd.f32 1e-06, %v72_v45  ;;  %v65_v48 = vpop.xlane.xlu1 %64 }
 0x12e   :  { %v73_v49 = vmul.f32 0.00390625, %v65_v48  ;;  %v68_v50 = vpop.xlane.xlu0 %67 }
 0x12f   :  { %159 = vrsqrt.f32 %v76_v47  ;;  %v74_v51 = vmul.f32 0.00390625, %v68_v50 }
 0x130   :  { %v77_v53 = vadd.f32 1e-06, %v73_v49 }
 0x131   :  { %v78_v54 = vadd.f32 1e-06, %v74_v51  ;;  %v71_v55 = vpop.xlane.xlu1 %70 }
 0x132   :  { %161 = vrsqrt.f32 %v77_v53  ;;  %v75_v56 = vmul.f32 0.00390625, %v71_v55 }
 0x133   :  { %163 = vrsqrt.f32 %v78_v54 }
 0x134   :  { %v79_v59 = vadd.f32 1e-06, %v75_v56 }
 0x136   :  { %165 = vrsqrt.f32 %v79_v59 }
 0x139   :  { %v160_v0 = vpop.eup %159 }
 0x13a   :  { %v84_v3 = vmul.f32 %v160_v0, %v44_v20  ;;  %v85_v4 = vmul.f32 %v160_v0, %v45_v21 }
 0x13c   :  { %v162_v5 = vpop.eup %161  ;;  %v104_v6 = vmul.f32 %v97_v62, %v84_v3  ;;  %v105_v7 = vmul.f32 %v101_v63, %v85_v4 }
 0x13d   :  { %v164_v8 = vpop.eup %163  ;;  %v86_v9 = vmul.f32 %v162_v5, %v46_v32  ;;  %v87_v10 = vmul.f32 %v162_v5, %v47_v33 }
 0x13e   :  { %v124_v11 = vadd.f32 %v117_v1, %v104_v6  ;;  %v125_v12 = vadd.f32 %v121_v2, %v105_v7  ;;  %v88_v13 = vmul.f32 %v164_v8, %v226_v22  ;;  %v89_v14 = vmul.f32 %v164_v8, %v228_v23 }
 0x13f   :  { %v106_v15 = vmul.f32 %v97_v62, %v86_v9  ;;  %v107_v16 = vmul.f32 %v101_v63, %v87_v10 }
 0x140   :  { %v166_v17 = vpop.eup %165  ;;  %132 = vst [vmem:[#allocation2] sm:$0xff] %v124_v11  ;;  %133 = vst [vmem:[#allocation2 + $0x8] sm:$0xff] %v125_v12  ;;  %v108_v18 = vmul.f32 %v97_v62, %v88_v13  ;;  %v109_v19 = vmul.f32 %v101_v63, %v89_v14 }
 0x141   :  { %v126_v20 = vadd.f32 %v117_v1, %v106_v15  ;;  %v127_v21 = vadd.f32 %v121_v2, %v107_v16  ;;  %v90_v24 = vmul.f32 %v166_v17, %v50_v34  ;;  %v91_v25 = vmul.f32 %v166_v17, %v51_v35 }
 0x142   :  { %v128_v26 = vadd.f32 %v117_v1, %v108_v18  ;;  %v129_v27 = vadd.f32 %v121_v2, %v109_v19 }
 0x143   :  { %134 = vst [vmem:[#allocation2 + $0x10] sm:$0xff] %v126_v20  ;;  %135 = vst [vmem:[#allocation2 + $0x18] sm:$0xff] %v127_v21  ;;  %v110_v22 = vmul.f32 %v97_v62, %v90_v24  ;;  %v111_v28 = vmul.f32 %v101_v63, %v91_v25 }
 0x144   :  { %136 = vst [vmem:[#allocation2 + $0x20] sm:$0xff] %v128_v26  ;;  %137 = vst [vmem:[#allocation2 + $0x28] sm:$0xff] %v129_v27 }
 0x145   :  { %v130_v23 = vadd.f32 %v117_v1, %v110_v22  ;;  %v131_v29 = vadd.f32 %v121_v2, %v111_v28 }
 0x147   :  { %138 = vst [vmem:[#allocation2 + $0x30] sm:$0xff] %v130_v23  ;;  %139 = vst [vmem:[#allocation2 + $0x38] sm:$0xff] %v131_v29 }
 0x148   :  { %178 = shalt.err (!%p175_p4)
}
 0x149   :  { %s179_s26 = scalar_lea.hbm %s257_s3, 1024 }
 0x14a   :  { %p180_p5 = scmp.ne.s32.totalorder %s257_s3, %s179_s26  ;;  %p183_p6 = scmp.lt.u32.totalorder %s179_s26, %s257_s3 }
 0x14c   :  { %p185_p7 = pnand %p183_p6, %p180_p5 }
 0x14e   :  { %188 = shalt.err (!%p185_p7)
}
 0x14f   :  { %s192_s4 = smov 256   ;;  %s193_s5 = smov 16  }
 0x150   :  { %151 = dma.vmem_to_hbm [thread:$0]  %s146_s2, 1024, %s257_s3, [#allocation3], %s192_s4, %s192_s4, %s193_s5  }
 0x151   :  { %189 = dma.done.wait [#allocation3], 1024  }
 0x152   :  { %190 = vsyncadd [#allocation3], 4294966272 }
 0x153   :  { %155 = vsyncpa [#allocation3], 1 }

// kernel: _lambda_.16
= control target key start
LH: loop header
LB: loop body
LE: loop exit
PB: predicated region body
PF: predicated region fallthrough
CT: control target
= control target key end

     0   :  { %s2439_s0 = inlined_call_operand.vmem [shape: bf16[32,256], index: 0, kind: input, shape index: {}]   ;;  %s2440_s1 = inlined_call_operand.hbm [shape: bf16[256,1024], index: 1, kind: input, shape index: {}]   ;;  %s2441_s2 = inlined_call_operand.hbm [shape: f32[1,1024], index: 2, kind: input, shape index: {}]   ;;  %s2442_s3 = inlined_call_operand.hbm [shape: f32[1,256], index: 3, kind: input, shape index: {}]   ;;  %s2443_s4 = inlined_call_operand.hbm [shape: f32[1,256], index: 4, kind: input, shape index: {}]   ;;  %s2444_s5 = inlined_call_operand.vmem [shape: bf16[32,1024], index: 5, kind: output, shape index: {}]  }
   0x1   :  { %2450 = sst [smem:[#allocation16_spill]] %s2440_s1 }
   0x2   :  { %2451 = sst [smem:[#allocation17_spill]] %s2442_s3 }
   0x3   :  { %2452 = sst [smem:[#allocation18_spill]] %s2443_s4 }
   0x4   :  { %10 = vsyncpa [#allocation4], 0 }
   0x5   :  { %12 = vsyncpa [#allocation4 + $0x1], 0 }
   0x6   :  { %13 = vsyncpa [#allocation6], 0 }
   0x7   :  { %15 = vsyncpa [#allocation6 + $0x1], 0 }
   0x8   :  { %16 = vsyncpa [#allocation9], 0  ;;  %s1972_s18 = smov 0   ;;  %s1974_s19 = smov 0  }
   0x9   :  { %s1976_s20 = smov 0   ;;  %s1978_s21 = smov 0  }
   0xa   :  { %s1980_s22 = smov 0   ;;  %s1982_s23 = smov 0  }
   0xb LB: > { %s2001_s24 = sadd.s32 4294967295, %s1933_s23   ;;  %s78_s25 = sadd.s32 1, %s1921_s20  ;;  %s1933_s23 = sphi %s1982_s23, %s22_s23   ;;  %s1929_s22 = sphi %s1980_s22, %s2476_s22   ;;  %s1925_s21 = sphi %s1978_s21, %s2475_s21   ;;  %s1921_s20 = sphi %s1976_s20, %s2474_s20   ;;  %s1917_s19 = sphi %s1974_s19, %s2473_s19   ;;  %s1913_s18 = sphi %s1972_s18, %s2472_s18  }
   0xc   : > { %p85_p0 = scmp.ne.s32.totalorder %s1921_s20, %s1917_s19  ;;  %p86_p1 = scmp.eq.s32.totalorder %s1933_s23, 0 }
   0xd   : > { %p91_p2 = scmp.ne.s32.totalorder %s1917_s19, %s1913_s18  ;;  %p2445_p3 = scmp.eq.s32.totalorder %s2001_s24, 0 }
   0xe   : > { %p2009_p4 = por %p86_p1, %p85_p0  ;;  %p195_p5 = scmp.eq.s32.totalorder %s2001_s24, 1 }
   0xf   : > { %p2016_p6 = por %p2445_p3, %p91_p2  ;;  %p1429_p7 = scmp.ge.s32.totalorder %s1933_s23, 1 }
  0x10   : > { %p2021_p8 = por %p195_p5, %p85_p0  ;;  %p208_p9 = scmp.lt.s32.totalorder %s1933_s23, 3 }
  0x11   : > { %s2454_s27 = scalar_select %p2016_p6, 1, 0 }
  0x12   : > { %s2455_s28 = scalar_select %p2021_p8, 1, 0 }
  0x13   : > { %p2026_p10 = pnand %p1429_p7, %p208_p9  ;;  %s1935_s30 = smov [#allocation7]  }
  0x14   : > { %s239_s6 = sshll.u32 %s1935_s30, 4  ;;  %p1563_p12 = scmp.lt.s32.totalorder %s1933_s23, 2  ;;  %s240_s6 = int_to_ptr.vmem [resolvable:$true] %s239_s6 }
  0x15   : > { %s2456_s29 = scalar_select %p2026_p10, 1, 0 }
  0x16   : > { %p1547_p11 = pneg %p2026_p10  ;;  %p2041_p0 = pnand %p1563_p12, %p2009_p4 }
  0x17   : > { %s1936_s9 = smov [#allocation8]   ;;  %s2459_s3 = sld [smem:[#allocation17_spill]] }
  0x18   : > { %p2035_p13 = pnand %p1547_p11, %p2445_p3  ;;  %s253_s10 = sshll.u32 %s1936_s9, 4  ;;  %s254_s10 = int_to_ptr.vmem [resolvable:$true] %s253_s10 }
  0x19   : > { %s2458_s8 = scalar_select %p2041_p0, 1, 0 }
  0x1a   : > { %p1757_p2 = pneg %p2035_p13 }
  0x1d   : > { %s1755_s13 = scalar_lea.hbm %s2459_s3, 32 }
  0x1e   : > { %p1756_p1 = scmp.ne.s32.totalorder %s2459_s3, %s1755_s13  ;;  %p1762_p4 = scmp.lt.u32.totalorder %s1755_s13, %s2459_s3 }
  0x20   : > { %p1758_p5 = pnand %p1757_p2, %p1756_p1 }
  0x22   : > { %p1759_p7 = pneg %p1758_p5 }
  0x24   : > { %p1764_p9 = pnand %p1762_p4, %p1759_p7 }
  0x26   : > { %1767 = shalt.err (!%p1764_p9)
}
  0x27   : > { %s1768_s18 = scalar_lea.vmem %s240_s6, 32  ;;  %p1776_p8 = scmp.lt.s32.totalorder %s240_s6, %s240_s6 }
  0x28   : > { %p1769_p11 = scmp.ne.s32.totalorder %s240_s6, %s1768_s18  ;;  %p1777_p6 = scmp.lt.s32.totalorder %s1768_s18, %s1768_s18 }
  0x2a   : > { %p1771_p12 = pnand %p1769_p11, %p1757_p2  ;;  %p1778_p10 = por %p1777_p6, %p1776_p8 }
  0x2c   : > { %p1772_p3 = pneg %p1771_p12 }
  0x2e   : > { %p1779_p0 = pnand %p1778_p10, %p1772_p3 }
  0x30   : > { %1782 = shalt.err (!%p1779_p0)
}
  0x31   : > { %1550 = dma.hbm_to_vmem [thread:$0]  (!%p2035_p13), %s2459_s3, 32, %s240_s6, [#allocation6]  }
  0x32   : > { %s37_s9 = sadd.s32 1, %s1929_s22  ;;  %s2460_s4 = sld [smem:[#allocation18_spill]] }
  0x38   : > { %s1783_s13 = scalar_lea.hbm %s2460_s4, 32 }
  0x39   : > { %p1784_p6 = scmp.ne.s32.totalorder %s2460_s4, %s1783_s13  ;;  %p1790_p10 = scmp.lt.u32.totalorder %s1783_s13, %s2460_s4 }
  0x3b   : > { %p1786_p3 = pnand %p1784_p6, %p1757_p2 }
  0x3d   : > { %p1787_p8 = pneg %p1786_p3 }
  0x3f   : > { %p1792_p0 = pnand %p1790_p10, %p1787_p8 }
  0x41   : > { %1795 = shalt.err (!%p1792_p0)
}
  0x42   : > { %s1796_s6 = scalar_lea.vmem %s254_s10, 32  ;;  %p1804_p4 = scmp.lt.s32.totalorder %s254_s10, %s254_s10 }
  0x43   : > { %p1797_p1 = scmp.ne.s32.totalorder %s254_s10, %s1796_s6  ;;  %p1805_p9 = scmp.lt.s32.totalorder %s1796_s6, %s1796_s6 }
  0x45   : > { %p1799_p5 = pnand %p1797_p1, %p1757_p2  ;;  %p1806_p11 = por %p1805_p9, %p1804_p4 }
  0x47   : > { %p1800_p7 = pneg %p1799_p5 }
  0x49   : > { %p1807_p12 = pnand %p1806_p11, %p1800_p7 }
  0x4b   : > { %1810 = shalt.err (!%p1807_p12)
}
  0x4c   : > { %1553 = dma.hbm_to_vmem [thread:$0]  (!%p2035_p13), %s2460_s4, 32, %s254_s10, [#allocation9]  }
  0x4d   : > { %p39_p6 = scmp.ge.s32.totalorder %s37_s9, 2  ;;  %s2089_s30 = sand.u32 1, %s1921_s20  }
  0x4e   : > { %s1434_s11 = sshll.u32 %s2089_s30, 9  ;;  %s1524_s7 = sshll.u32 %s1929_s22, 8 }
  0x4f   : > { %s2478_s9 = smov (%p39_p6, %s37_s9), 0  ;;  %s2462_s1 = sld [smem:[#allocation16_spill]] }
  0x50   : > { %2461 = sst [smem:[#allocation15_spill]] %s2478_s9  ;;  %s74_s12 = ssub.s32 %s1929_s22, %s2478_s9 }
  0x51   : > { %p76_p13 = scmp.eq.s32.totalorder %s74_s12, 0  ;;  %s268_s10 = scalar_lea.vmem [#allocation3], %s1434_s11 }
  0x52   : > { %s278_s16 = sshll.u32 %s268_s10, 4  ;;  %s265_s6 = scalar_lea.sflag [#allocation4], %s2089_s30  ;;  %s2102_s16 = int_to_ptr.vmem [resolvable:$true] %s278_s16 }
  0x53   : > { %s2107_s17 = scalar_select %p76_p13, %s1921_s20, %s78_s25  }
  0x54   : > { %p2463_p3 = scmp.ne.s32.totalorder %s2458_s8, 0 }
  0x55   : > { %s2100_s15 = scalar_lea.hbm %s2462_s1, %s1524_s7  ;;  %s1816_s12 = scalar_lea.hbm %s2462_s1, 16384 }
  0x56   : > { %s1811_s18 = scalar_lea.hbm %s2100_s15, 8192  ;;  %p1813_p8 = pneg %p2463_p3 }
  0x57   : > { %p1812_p2 = scmp.ne.s32.totalorder %s2100_s15, %s1811_s18  ;;  %p1817_p1 = scmp.lt.u32.totalorder %s2100_s15, %s2462_s1 }
  0x58   : > { %p1818_p5 = scmp.lt.u32.totalorder %s1816_s12, %s1811_s18  ;;  %p1820_p4 = scmp.lt.u32.totalorder %s1811_s18, %s2100_s15 }
  0x59   : > { %p1814_p10 = pnand %p1813_p8, %p1812_p2 }
  0x5a   : > { %p1819_p7 = por %p1818_p5, %p1817_p1 }
  0x5b   : > { %p1815_p0 = pneg %p1814_p10 }
  0x5c   : > { %p1821_p9 = por %p1820_p4, %p1819_p7 }
  0x5e   : > { %p1822_p11 = pnand %p1821_p9, %p1815_p0 }
  0x60   : > { %1825 = shalt.err (!%p1822_p11)
}
  0x61   : > { %s1826_s25 = scalar_lea.vmem %s2102_s16, 8192  ;;  %s1937_s14 = smov [#allocation3]  }
  0x62   : > { %p1827_p12 = scmp.ne.s32.totalorder %s2102_s16, %s1826_s25  ;;  %s1831_s10 = sshll.u32 %s1937_s14, 4  ;;  %s1832_s10 = int_to_ptr.vmem [resolvable:$false] %s1831_s10 }
  0x63   : > { %s1833_s26 = scalar_lea.vmem %s1832_s10, 16384  ;;  %p1834_p2 = scmp.lt.s32.totalorder %s2102_s16, %s1832_s10 }
  0x64   : > { %p1829_p6 = pnand %p1827_p12, %p1813_p8  ;;  %p1835_p10 = scmp.lt.s32.totalorder %s1833_s26, %s1826_s25 }
  0x66   : > { %p1830_p13 = pneg %p1829_p6  ;;  %p1836_p1 = por %p1835_p10, %p1834_p2 }
  0x68   : > { %p1837_p5 = pnand %p1836_p1, %p1830_p13 }
  0x6a   : > { %1840 = shalt.err (!%p1837_p5)
}
  0x6b   : > { %s1938_s18 = smov 512   ;;  %s1939_s7 = smov 256  }
  0x6c   : > { %s1940_s12 = smov 16   ;;  %s288_s11 = sand.u32 1, %s1933_s23  }
  0x6d   : > { %1557 = dma.hbm_to_vmem [thread:$0]  (!%p2463_p3), %s2100_s15, 8192, %s2102_s16, %s265_s6, %s1938_s18, %s1939_s7, %s1940_s12  }
  0x6e   : > { %s1437_s13 = sshll.u32 %s2089_s30, 2  ;;  %s1525_s25 = sshll.u32 %s1929_s22, 6 }
  0x6f   : > { %s292_s14 = scalar_lea.vmem [#allocation5], %s1437_s13  ;;  %s2143_s3 = scalar_lea.hbm %s2441_s2, %s1525_s25 }
  0x70   : > { %s300_s10 = sshll.u32 %s292_s14, 4  ;;  %s289_s4 = scalar_lea.sflag [#allocation6], %s288_s11  ;;  %s301_s10 = int_to_ptr.vmem [resolvable:$true] %s300_s10 }
  0x71   : > { %s1841_s9 = scalar_lea.hbm %s2143_s3, 64  ;;  %s1846_s16 = scalar_lea.hbm %s2441_s2, 128 }
  0x72   : > { %p1842_p0 = scmp.ne.s32.totalorder %s2143_s3, %s1841_s9  ;;  %p1847_p9 = scmp.lt.u32.totalorder %s2143_s3, %s2441_s2 }
  0x73   : > { %p1848_p11 = scmp.lt.u32.totalorder %s1846_s16, %s1841_s9  ;;  %p1850_p6 = scmp.lt.u32.totalorder %s1841_s9, %s2143_s3 }
  0x74   : > { %p1844_p7 = pnand %p1842_p0, %p1813_p8 }
  0x75   : > { %p1849_p12 = por %p1848_p11, %p1847_p9 }
  0x76   : > { %p1845_p4 = pneg %p1844_p7 }
  0x77   : > { %p1851_p13 = por %p1850_p6, %p1849_p12 }
  0x79   : > { %p1852_p2 = pnand %p1851_p13, %p1845_p4 }
  0x7b   : > { %1855 = shalt.err (!%p1852_p2)
}
  0x7c   : > { %s1856_s18 = scalar_lea.vmem %s301_s10, 64  ;;  %s1941_s7 = smov [#allocation5]  }
  0x7d   : > { %p1857_p10 = scmp.ne.s32.totalorder %s301_s10, %s1856_s18  ;;  %s1861_s12 = sshll.u32 %s1941_s7, 4  ;;  %s1862_s12 = int_to_ptr.vmem [resolvable:$false] %s1861_s12 }
  0x7e   : > { %s1863_s11 = scalar_lea.vmem %s1862_s12, 128  ;;  %p1864_p0 = scmp.lt.s32.totalorder %s301_s10, %s1862_s12 }
  0x7f   : > { %p1859_p1 = pnand %p1857_p10, %p1813_p8  ;;  %p1865_p7 = scmp.lt.s32.totalorder %s1863_s11, %s1856_s18 }
  0x81   : > { %p1860_p5 = pneg %p1859_p1  ;;  %p1866_p9 = por %p1865_p7, %p1864_p0 }
  0x83   : > { %p1867_p11 = pnand %p1866_p9, %p1860_p5 }
  0x85   : > { %1870 = shalt.err (!%p1867_p11)
}
  0x86   : > { %1560 = dma.hbm_to_vmem [thread:$0]  (!%p2463_p3), %s2143_s3, 64, %s301_s10, %s289_s4  }
  0x87   : > { %p2464_p4 = scmp.ne.s32.totalorder %s2456_s29, 0 }
  0x88   : > { %s311_s9 = sand.u32 (!%p2464_p4), 1, %s1917_s19   ;;  %p2465_p8 = scmp.ne.s32.totalorder (!%p2464_p4), %s2454_s27, 0 }
  0x89   : > { %309 = sbr.rel (%p2464_p4) target bundleno = 828 (0x33c), region = 40  ;;  %s1441_s13 = sshll.u32 (!%p2464_p4), %s311_s9, 9 }
  0x8a   : > { %s312_s25 = scalar_lea.sflag (!%p2464_p4), [#allocation4], %s311_s9  ;;  %s2167_s14 = scalar_lea.vmem (!%p2464_p4), [#allocation3], %s1441_s13 }
  0x90   : > { %1896 = dma.done.wait (%p2465_p8), %s312_s25, 8192  }
  0x91   : > { %1898 = vsyncadd (%p2465_p8), %s312_s25, 4294959104  ;;  %s320_s8 = sand.u32 1, %s2001_s24   ;;  %s1442_s26 = sshll.u32 %s311_s9, 2 }
  0x92   : > { %s321_s3 = scalar_lea.sflag [#allocation6], %s320_s8  ;;  %s2174_s4 = scalar_lea.vmem [#allocation5], %s1442_s26 }
  0x93   : > { %1900 = dma.done.wait (%p2465_p8), %s321_s3, 64  }
  0x94   : > { %1902 = vsyncadd (%p2465_p8), %s321_s3, 4294967232  ;;  %p2466_p3 = scmp.eq.s32.totalorder %s2001_s24, 0 }
  0x96   : > { %1904 = dma.done.wait (%p2466_p3), [#allocation6], 32   ;;  %p2467_p12 = pmov %p2466_p3 }
  0x97   : > { %p2468_p6 = pmov %p2466_p3 }
  0x98   : > { %1906 = vsyncadd (%p2467_p12), [#allocation6], 4294967264 }
  0x99   : > { %1908 = dma.done.wait (%p2468_p6), [#allocation9], 32   ;;  %p2469_p13 = pmov %p2466_p3 }
  0x9a   : > { %s1445_s29 = sshll.u32 %s311_s9, 6  ;;  %p1446_p2 = scmp.ne.s32.totalorder %s1925_s21, 0 }
  0x9b   : > { %1910 = vsyncadd (%p2469_p13), [#allocation9], 4294967264  ;;  %s2188_s10 = scalar_lea.vmem [#allocation10], %s1445_s29  ;;  %v396_v0 = vld [vmem:[%s2439_s0] sm:$0xff] (!%p1446_p2)  ;;  %v398_v1 = vld [vmem:[%s2439_s0 + $0x10] sm:$0xff] (!%p1446_p2)  ;;  %v475_v46 = vlaneseq (!%p1446_p2) }
  0x9c   : > { %395 = sbr.rel (%p1446_p2) target bundleno = 484 (0x1e4), region = 60  ;;  %v397_v2 = vld [vmem:[%s2439_s0 + $0x8] sm:$0xff] (!%p1446_p2)  ;;  %v400_v3 = vunpack.c.l.bf16 (!%p1446_p2), %v396_v0  ;;  %v401_v4 = vunpack.c.h.bf16 (!%p1446_p2), %v396_v0  ;;  %v404_v5 = vunpack.c.l.bf16 (!%p1446_p2), %v398_v1  ;;  %v405_v6 = vunpack.c.h.bf16 (!%p1446_p2), %v398_v1  ;;  %v399_v7 = vld [vmem:[%s2439_s0 + $0x18] sm:$0xff] (!%p1446_p2) }
  0x9d   : > { %v402_v8 = vunpack.c.l.bf16 (!%p1446_p2), %v397_v2  ;;  %v403_v9 = vunpack.c.h.bf16 (!%p1446_p2), %v397_v2  ;;  %v406_v10 = vunpack.c.l.bf16 (!%p1446_p2), %v399_v7  ;;  %v407_v11 = vunpack.c.h.bf16 (!%p1446_p2), %v399_v7  ;;  %v473_v60 = vld [vmem:[#allocation7] sm:$0x3] (!%p1446_p2)  ;;  %v493_v0 = vld [vmem:[#allocation8] sm:$0x3] (!%p1446_p2) }
  0x9e   : > { %v408_v12 = vadd.f32 (!%p1446_p2), %v401_v4, %v400_v3  ;;  %v414_v13 = vadd.f32 (!%p1446_p2), %v405_v6, %v404_v5  ;;  %v476_v52 = vshrl.u32 (!%p1446_p2), %v475_v46, 7 }
  0x9f   : > { %v411_v14 = vadd.f32 (!%p1446_p2), %v403_v9, %v402_v8  ;;  %v417_v15 = vadd.f32 (!%p1446_p2), %v407_v11, %v406_v10 }
  0xa0   : > { %409 = vadd.xlane.f32.xlu0 (!%p1446_p2), %v408_v12  ;;  %415 = vadd.xlane.f32.xlu1 (!%p1446_p2), %v414_v13  ;;  %v477_v57 = vsub.s32 (!%p1446_p2), 0, %v476_v52  ;;  %v481_v58 = vsub.s32 (!%p1446_p2), 1, %v476_v52 }
  0xa2   : > { %v478_v61 = vrot.slane (!%p1446_p2), %v473_v60, %v477_v57  ;;  %v482_v62 = vrot.slane (!%p1446_p2), %v473_v60, %v481_v58 }
  0xa4   : > { %412 = vadd.xlane.f32.xlu0 %v411_v14  ;;  %418 = vadd.xlane.f32.xlu1 %v417_v15 }
 0x12d   : > { %v410_v16 = vpop.xlane.xlu0 %409  ;;  %v416_v17 = vpop.xlane.xlu1 %415 }
 0x12e   : > { %v421_v18 = vmul.f32 0.00390625, %v410_v16  ;;  %v423_v19 = vmul.f32 0.00390625, %v416_v17 }
 0x130   : > { %v425_v20 = vsub.f32 %v400_v3, %v421_v18  ;;  %v426_v21 = vsub.f32 %v401_v4, %v421_v18  ;;  %v429_v22 = vsub.f32 %v404_v5, %v423_v19  ;;  %v430_v23 = vsub.f32 %v405_v6, %v423_v19 }
 0x131   : > { %v413_v24 = vpop.xlane.xlu0 %412  ;;  %v419_v25 = vpop.xlane.xlu1 %418  ;;  %v498_v4 = vrot.slane %v493_v0, %v477_v57  ;;  %v502_v5 = vrot.slane %v493_v0, %v481_v58 }
 0x132   : > { %v422_v26 = vmul.f32 0.00390625, %v413_v24  ;;  %v424_v27 = vmul.f32 0.00390625, %v419_v25  ;;  %v433_v28 = vmul.f32 %v425_v20, %v425_v20  ;;  %v434_v29 = vmul.f32 %v426_v21, %v426_v21 }
 0x133   : > { %v437_v30 = vmul.f32 %v429_v22, %v429_v22  ;;  %v438_v31 = vmul.f32 %v430_v23, %v430_v23 }
 0x134   : > { %v427_v32 = vsub.f32 %v402_v8, %v422_v26  ;;  %v428_v33 = vsub.f32 %v403_v9, %v422_v26  ;;  %v431_v34 = vsub.f32 %v406_v10, %v424_v27  ;;  %v432_v35 = vsub.f32 %v407_v11, %v424_v27 }
 0x135   : > { %v441_v36 = vadd.f32 %v434_v29, %v433_v28  ;;  %v447_v41 = vadd.f32 %v438_v31, %v437_v30 }
 0x136   : > { %v435_v37 = vmul.f32 %v427_v32, %v427_v32  ;;  %v436_v38 = vmul.f32 %v428_v33, %v428_v33  ;;  %v439_v39 = vmul.f32 %v431_v34, %v431_v34  ;;  %v440_v40 = vmul.f32 %v432_v35, %v432_v35 }
 0x137   : > { %442 = vadd.xlane.f32.xlu0 %v441_v36 }
 0x138   : > { %v444_v42 = vadd.f32 %v436_v38, %v435_v37  ;;  %v450_v43 = vadd.f32 %v440_v40, %v439_v39 }
 0x13a   : > { %445 = vadd.xlane.f32.xlu1 %v444_v42 }
 0x13b   : > { %448 = vadd.xlane.f32.xlu0 %v447_v41 }
 0x13e   : > { %451 = vadd.xlane.f32.xlu1 %v450_v43 }
 0x1c4   : > { %v443_v44 = vpop.xlane.xlu0 %442 }
 0x1c5   : > { %v453_v45 = vmul.f32 0.00390625, %v443_v44 }
 0x1c7   : > { %v457_v47 = vadd.f32 1e-06, %v453_v45  ;;  %v446_v48 = vpop.xlane.xlu1 %445 }
 0x1c8   : > { %v454_v49 = vmul.f32 0.00390625, %v446_v48  ;;  %v449_v50 = vpop.xlane.xlu0 %448 }
 0x1c9   : > { %1619 = vrsqrt.f32 %v457_v47  ;;  %v455_v51 = vmul.f32 0.00390625, %v449_v50 }
 0x1ca   : > { %v458_v53 = vadd.f32 1e-06, %v454_v49 }
 0x1cb   : > { %v459_v54 = vadd.f32 1e-06, %v455_v51  ;;  %v452_v55 = vpop.xlane.xlu1 %451 }
 0x1cc   : > { %1621 = vrsqrt.f32 %v458_v53  ;;  %v456_v56 = vmul.f32 0.00390625, %v452_v55 }
 0x1cd   : > { %1623 = vrsqrt.f32 %v459_v54 }
 0x1ce   : > { %v460_v59 = vadd.f32 1e-06, %v456_v56 }
 0x1d0   : > { %1625 = vrsqrt.f32 %v460_v59 }
 0x1d3   : > { %v1620_v63 = vpop.eup %1619 }
 0x1d4   : > { %v465_v1 = vmul.f32 %v1620_v63, %v425_v20  ;;  %v466_v2 = vmul.f32 %v1620_v63, %v426_v21 }
 0x1d6   : > { %v1622_v3 = vpop.eup %1621  ;;  %v485_v6 = vmul.f32 %v478_v61, %v465_v1  ;;  %v486_v7 = vmul.f32 %v482_v62, %v466_v2 }
 0x1d7   : > { %v1624_v8 = vpop.eup %1623  ;;  %v467_v9 = vmul.f32 %v1622_v3, %v427_v32  ;;  %v468_v10 = vmul.f32 %v1622_v3, %v428_v33 }
 0x1d8   : > { %v469_v11 = vmul.f32 %v1624_v8, %v429_v22  ;;  %v470_v12 = vmul.f32 %v1624_v8, %v430_v23  ;;  %v505_v16 = vadd.f32 %v498_v4, %v485_v6  ;;  %v506_v17 = vadd.f32 %v502_v5, %v486_v7 }
 0x1d9   : > { %v487_v13 = vmul.f32 %v478_v61, %v467_v9  ;;  %v488_v14 = vmul.f32 %v482_v62, %v468_v10 }
 0x1da   : > { %v1626_v15 = vpop.eup %1625  ;;  %v489_v18 = vmul.f32 %v478_v61, %v469_v11  ;;  %v490_v19 = vmul.f32 %v482_v62, %v470_v12 }
 0x1db   : > { %v507_v24 = vadd.f32 %v498_v4, %v487_v13  ;;  %v508_v20 = vadd.f32 %v502_v5, %v488_v14  ;;  %v471_v21 = vmul.f32 %v1626_v15, %v431_v34  ;;  %v472_v25 = vmul.f32 %v1626_v15, %v432_v35 }
 0x1dc   : > { %v509_v30 = vadd.f32 %v498_v4, %v489_v18  ;;  %v510_v22 = vadd.f32 %v502_v5, %v490_v19 }
 0x1dd   : > { %v513_v26 = vpack.c.bf16 %v507_v24, %v505_v16  ;;  %v514_v27 = vpack.c.bf16 %v508_v20, %v506_v17  ;;  %v491_v28 = vmul.f32 %v478_v61, %v471_v21  ;;  %v492_v29 = vmul.f32 %v482_v62, %v472_v25 }
 0x1df   : > { %517 = vst [vmem:[#allocation2] sm:$0xff] %v513_v26  ;;  %518 = vst [vmem:[#allocation2 + $0x8] sm:$0xff] %v514_v27  ;;  %v511_v23 = vadd.f32 %v498_v4, %v491_v28  ;;  %v512_v31 = vadd.f32 %v502_v5, %v492_v29 }
 0x1e1   : > { %v515_v32 = vpack.c.bf16 %v511_v23, %v509_v30  ;;  %v516_v33 = vpack.c.bf16 %v512_v31, %v510_v22 }
 0x1e3   : > { %519 = vst [vmem:[#allocation2 + $0x10] sm:$0xff] %v515_v32  ;;  %520 = vst [vmem:[#allocation2 + $0x18] sm:$0xff] %v516_v33 }
 0x1e4 PF: > { %v1627_v34 = vld [vmem:[%s2167_s14 + $0x4] ss:$16 sps:$4 sm:$0xff]   ;;  %v1629_v35 = vld [vmem:[%s2167_s14 + $0xc] ss:$16 sps:$4 sm:$0xff]   ;;  %v1631_v36 = vld [vmem:[%s2167_s14] ss:$16 sps:$4 sm:$0xff]  }
 0x1e5   : > { %931 = vmatprep.subr.bf16.mxu0 %v1627_v34  ;;  %v1632_v37 = vld [vmem:[%s2167_s14 + $0x8] ss:$16 sps:$4 sm:$0xff]   ;;  %984 = vmatprep.subr.bf16.mxu1 %v1629_v35  ;;  %v1633_v38 = vld [vmem:[%s2167_s14 + $0x24] ss:$16 sps:$4 sm:$0xff]   ;;  %v1635_v39 = vld [vmem:[%s2167_s14 + $0x2c] ss:$16 sps:$4 sm:$0xff]  }
 0x1e6   : > { %932 = vmatpush1.bf16.msra.mxu0 %v1631_v36  ;;  %985 = vmatpush1.bf16.msra.mxu1 %v1632_v37  ;;  %v1637_v40 = vld [vmem:[%s2167_s14 + $0x20] ss:$16 sps:$4 sm:$0xff]   ;;  %v1638_v41 = vld [vmem:[%s2167_s14 + $0x28] ss:$16 sps:$4 sm:$0xff]   ;;  %v1639_v42 = vld [vmem:[%s2167_s14 + $0x44] ss:$16 sps:$4 sm:$0xff]  }
 0x1e7   : > { %933 = vmatprep.subr.bf16.mxu0 %v1633_v38  ;;  %986 = vmatprep.subr.bf16.mxu1 %v1635_v39  ;;  %v1641_v43 = vld [vmem:[%s2167_s14 + $0x4c] ss:$16 sps:$4 sm:$0xff]   ;;  %v1643_v44 = vld [vmem:[%s2167_s14 + $0x40] ss:$16 sps:$4 sm:$0xff]   ;;  %v1644_v45 = vld [vmem:[%s2167_s14 + $0x48] ss:$16 sps:$4 sm:$0xff]   ;;  %v591_v38 = vlaneseq }
 0x1e8   : > { %v1645_v46 = vld [vmem:[%s2167_s14 + $0x64] ss:$16 sps:$4 sm:$0xff]   ;;  %v1647_v47 = vld [vmem:[%s2167_s14 + $0x6c] ss:$16 sps:$4 sm:$0xff]   ;;  %v1649_v48 = vld [vmem:[%s2167_s14 + $0x60] ss:$16 sps:$4 sm:$0xff]  }
 0x1e9   : > { %v1650_v49 = vld [vmem:[%s2167_s14 + $0x68] ss:$16 sps:$4 sm:$0xff]   ;;  %v1651_v50 = vld [vmem:[%s2167_s14 + $0x84] ss:$16 sps:$4 sm:$0xff]   ;;  %v1653_v51 = vld [vmem:[%s2167_s14 + $0x8c] ss:$16 sps:$4 sm:$0xff]  }
 0x1ea   : > { %934 = vmatpush1.bf16.msra.mxu0 %v1637_v40  ;;  %987 = vmatpush1.bf16.msra.mxu1 %v1638_v41  ;;  %v1655_v52 = vld [vmem:[%s2167_s14 + $0x80] ss:$16 sps:$4 sm:$0xff]   ;;  %v1656_v53 = vld [vmem:[%s2167_s14 + $0x88] ss:$16 sps:$4 sm:$0xff]   ;;  %v1657_v54 = vld [vmem:[%s2167_s14 + $0xa4] ss:$16 sps:$4 sm:$0xff]  }
 0x1eb   : > { %935 = vmatprep.subr.bf16.mxu0 %v1639_v42  ;;  %988 = vmatprep.subr.bf16.mxu1 %v1641_v43  ;;  %v1659_v55 = vld [vmem:[%s2167_s14 + $0xac] ss:$16 sps:$4 sm:$0xff]   ;;  %v1661_v56 = vld [vmem:[%s2167_s14 + $0xa0] ss:$16 sps:$4 sm:$0xff]   ;;  %v1662_v57 = vld [vmem:[%s2167_s14 + $0xa8] ss:$16 sps:$4 sm:$0xff]  }
 0x1ec   : > { %v1663_v58 = vld [vmem:[%s2167_s14 + $0xc4] ss:$16 sps:$4 sm:$0xff]   ;;  %v1665_v59 = vld [vmem:[%s2167_s14 + $0xcc] ss:$16 sps:$4 sm:$0xff]   ;;  %v1667_v60 = vld [vmem:[%s2167_s14 + $0xc0] ss:$16 sps:$4 sm:$0xff]  }
 0x1ed   : > { %v1668_v61 = vld [vmem:[%s2167_s14 + $0xc8] ss:$16 sps:$4 sm:$0xff]   ;;  %v1669_v62 = vld [vmem:[%s2167_s14 + $0xe4] ss:$16 sps:$4 sm:$0xff]   ;;  %v1671_v63 = vld [vmem:[%s2167_s14 + $0xec] ss:$16 sps:$4 sm:$0xff]  }
 0x1ee   : > { %936 = vmatpush1.bf16.msra.mxu0 %v1643_v44  ;;  %989 = vmatpush1.bf16.msra.mxu1 %v1644_v45  ;;  %v1673_v0 = vld [vmem:[%s2167_s14 + $0xe0] ss:$16 sps:$4 sm:$0xff]   ;;  %v1674_v1 = vld [vmem:[%s2167_s14 + $0xe8] ss:$16 sps:$4 sm:$0xff]   ;;  %v1675_v2 = vld [vmem:[%s2167_s14 + $0x104] ss:$16 sps:$4 sm:$0xff]  }
 0x1ef   : > { %937 = vmatprep.subr.bf16.mxu0 %v1645_v46  ;;  %990 = vmatprep.subr.bf16.mxu1 %v1647_v47  ;;  %v1677_v3 = vld [vmem:[%s2167_s14 + $0x10c] ss:$16 sps:$4 sm:$0xff]   ;;  %v1679_v4 = vld [vmem:[%s2167_s14 + $0x100] ss:$16 sps:$4 sm:$0xff]   ;;  %v1680_v5 = vld [vmem:[%s2167_s14 + $0x108] ss:$16 sps:$4 sm:$0xff]  }
 0x1f0   : > { %v1681_v6 = vld [vmem:[%s2167_s14 + $0x124] ss:$16 sps:$4 sm:$0xff]   ;;  %v1683_v7 = vld [vmem:[%s2167_s14 + $0x12c] ss:$16 sps:$4 sm:$0xff]   ;;  %v1685_v8 = vld [vmem:[%s2167_s14 + $0x120] ss:$16 sps:$4 sm:$0xff]  }
 0x1f1   : > { %v1686_v9 = vld [vmem:[%s2167_s14 + $0x128] ss:$16 sps:$4 sm:$0xff]   ;;  %v1687_v10 = vld [vmem:[%s2167_s14 + $0x144] ss:$16 sps:$4 sm:$0xff]   ;;  %v1689_v11 = vld [vmem:[%s2167_s14 + $0x14c] ss:$16 sps:$4 sm:$0xff]  }
 0x1f2   : > { %938 = vmatpush1.bf16.msra.mxu0 %v1649_v48  ;;  %991 = vmatpush1.bf16.msra.mxu1 %v1650_v49  ;;  %v1691_v12 = vld [vmem:[%s2167_s14 + $0x140] ss:$16 sps:$4 sm:$0xff]   ;;  %v1692_v13 = vld [vmem:[%s2167_s14 + $0x148] ss:$16 sps:$4 sm:$0xff]   ;;  %v1693_v14 = vld [vmem:[%s2167_s14 + $0x164] ss:$16 sps:$4 sm:$0xff]  }
 0x1f3   : > { %939 = vmatprep.subr.bf16.mxu0 %v1651_v50  ;;  %992 = vmatprep.subr.bf16.mxu1 %v1653_v51  ;;  %v1695_v15 = vld [vmem:[%s2167_s14 + $0x16c] ss:$16 sps:$4 sm:$0xff]   ;;  %v1697_v17 = vld [vmem:[%s2167_s14 + $0x160] ss:$16 sps:$4 sm:$0xff]   ;;  %v1698_v18 = vld [vmem:[%s2167_s14 + $0x168] ss:$16 sps:$4 sm:$0xff]  }
 0x1f4   : > { %v522_v16 = vld [vmem:[#allocation2 + $0x8] sm:$0xff]  ;;  %v1699_v19 = vld [vmem:[%s2167_s14 + $0x184] ss:$16 sps:$4 sm:$0xff]   ;;  %v1703_v20 = vld [vmem:[%s2167_s14 + $0x180] ss:$16 sps:$4 sm:$0xff]   ;;  %v592_v39 = vshrl.u32 %v591_v38, 7 }
 0x1f5   : > { %963 = vmatprep.mubr.bf16.mxu0 %v522_v16  ;;  %1016 = vmatprep.mubr.bf16.mxu1 %v522_v16  ;;  %v1701_v24 = vld [vmem:[%s2167_s14 + $0x18c] ss:$16 sps:$4 sm:$0xff]   ;;  %v1704_v21 = vld [vmem:[%s2167_s14 + $0x188] ss:$16 sps:$4 sm:$0xff]   ;;  %v1705_v25 = vld [vmem:[%s2167_s14 + $0x1a4] ss:$16 sps:$4 sm:$0xff]  }
 0x1f6   : > { %940 = vmatpush1.bf16.msra.mxu0 %v1655_v52  ;;  %993 = vmatpush1.bf16.msra.mxu1 %v1656_v53  ;;  %v1707_v26 = vld [vmem:[%s2167_s14 + $0x1ac] ss:$16 sps:$4 sm:$0xff]   ;;  %v1709_v27 = vld [vmem:[%s2167_s14 + $0x1a0] ss:$16 sps:$4 sm:$0xff]   ;;  %v1710_v28 = vld [vmem:[%s2167_s14 + $0x1a8] ss:$16 sps:$4 sm:$0xff]  }
 0x1f7   : > { %941 = vmatprep.subr.bf16.mxu0 %v1657_v54  ;;  %994 = vmatprep.subr.bf16.mxu1 %v1659_v55  ;;  %v1711_v29 = vld [vmem:[%s2167_s14 + $0x1c4] ss:$16 sps:$4 sm:$0xff]   ;;  %v1713_v30 = vld [vmem:[%s2167_s14 + $0x1cc] ss:$16 sps:$4 sm:$0xff]   ;;  %v1715_v22 = vld [vmem:[%s2167_s14 + $0x1c0] ss:$16 sps:$4 sm:$0xff]  }
 0x1f8   : > { %v1716_v23 = vld [vmem:[%s2167_s14 + $0x1c8] ss:$16 sps:$4 sm:$0xff]   ;;  %v1717_v31 = vld [vmem:[%s2167_s14 + $0x1e4] ss:$16 sps:$4 sm:$0xff]   ;;  %v1719_v32 = vld [vmem:[%s2167_s14 + $0x1ec] ss:$16 sps:$4 sm:$0xff]  }
 0x1f9   : > { %v1721_v33 = vld [vmem:[%s2167_s14 + $0x1e0] ss:$16 sps:$4 sm:$0xff]   ;;  %v1722_v34 = vld [vmem:[%s2167_s14 + $0x1e8] ss:$16 sps:$4 sm:$0xff]   ;;  %v593_v40 = vsub.s32 0, %v592_v39  ;;  %v601_v41 = vsub.s32 2, %v592_v39 }
 0x1fa   : > { %942 = vmatpush1.bf16.msra.mxu0 %v1661_v56  ;;  %995 = vmatpush1.bf16.msra.mxu1 %v1662_v57  ;;  %v521_v35 = vld [vmem:[#allocation2] sm:$0xff]  ;;  %v524_v36 = vld [vmem:[#allocation2 + $0x18] sm:$0xff]  ;;  %v523_v37 = vld [vmem:[#allocation2 + $0x10] sm:$0xff]  ;;  %v597_v43 = vsub.s32 1, %v592_v39  ;;  %v605_v44 = vsub.s32 3, %v592_v39  ;;  %p2470_p10 = scmp.ne.s32.totalorder %s2455_s28, 0 }
 0x1fb   : > { %943 = vmatprep.subr.bf16.mxu0 %v1663_v58  ;;  %996 = vmatprep.subr.bf16.mxu1 %v1665_v59  ;;  %v589_v42 = vld [vmem:[%s2174_s4] sm:$0xf]  ;;  %s1534_s7 = sshll.u32 (%p2470_p10), %s1925_s21, 4 }
 0x1fc   : > { %v2268_v45 = vrot.slane %v589_v42, %v593_v40  ;;  %v2270_v46 = vrot.slane %v589_v42, %v601_v41  ;;  %v2272_v47 = vrot.slane %v589_v42, %v597_v43  ;;  %v2274_v48 = vrot.slane %v589_v42, %v605_v44  ;;  %s1249_s9 = scalar_lea.vmem (%p2470_p10), %s2444_s5, %s1534_s7 }
 0x1fe   : > { %944 = vmatpush1.bf16.msra.mxu0 %v1667_v60  ;;  %997 = vmatpush1.bf16.msra.mxu1 %v1668_v61 }
 0x1ff   : > { %945 = vmatprep.subr.bf16.mxu0 %v1669_v62  ;;  %998 = vmatprep.subr.bf16.mxu1 %v1671_v63 }
 0x202   : > { %946 = vmatpush1.bf16.msra.mxu0 %v1673_v0  ;;  %999 = vmatpush1.bf16.msra.mxu1 %v1674_v1 }
 0x203   : > { %947 = vmatprep.subr.bf16.mxu0 %v1675_v2  ;;  %1000 = vmatprep.subr.bf16.mxu1 %v1677_v3 }
 0x206   : > { %948 = vmatpush1.bf16.msra.mxu0 %v1679_v4  ;;  %1001 = vmatpush1.bf16.msra.mxu1 %v1680_v5 }
 0x207   : > { %949 = vmatprep.subr.bf16.mxu0 %v1681_v6  ;;  %1002 = vmatprep.subr.bf16.mxu1 %v1683_v7 }
 0x20a   : > { %950 = vmatpush1.bf16.msra.mxu0 %v1685_v8  ;;  %1003 = vmatpush1.bf16.msra.mxu1 %v1686_v9 }
 0x20b   : > { %951 = vmatprep.subr.bf16.mxu0 %v1687_v10  ;;  %1004 = vmatprep.subr.bf16.mxu1 %v1689_v11 }
 0x20e   : > { %952 = vmatpush1.bf16.msra.mxu0 %v1691_v12  ;;  %1005 = vmatpush1.bf16.msra.mxu1 %v1692_v13 }
 0x20f   : > { %953 = vmatprep.subr.bf16.mxu0 %v1693_v14  ;;  %1006 = vmatprep.subr.bf16.mxu1 %v1695_v15 }
 0x212   : > { %954 = vmatpush1.bf16.msra.mxu0 %v1697_v17  ;;  %1007 = vmatpush1.bf16.msra.mxu1 %v1698_v18 }
 0x213   : > { %955 = vmatprep.subr.bf16.mxu0 %v1699_v19  ;;  %1008 = vmatprep.subr.bf16.mxu1 %v1701_v24 }
 0x216   : > { %956 = vmatpush1.bf16.msra.mxu0 %v1703_v20  ;;  %1009 = vmatpush1.bf16.msra.mxu1 %v1704_v21 }
 0x217   : > { %957 = vmatprep.subr.bf16.mxu0 %v1705_v25  ;;  %1010 = vmatprep.subr.bf16.mxu1 %v1707_v26 }
 0x21a   : > { %958 = vmatpush1.bf16.msra.mxu0 %v1709_v27  ;;  %1011 = vmatpush1.bf16.msra.mxu1 %v1710_v28 }
 0x21b   : > { %959 = vmatprep.subr.bf16.mxu0 %v1711_v29  ;;  %1012 = vmatprep.subr.bf16.mxu1 %v1713_v30 }
 0x21e   : > { %960 = vmatpush1.bf16.msra.mxu0 %v1715_v22  ;;  %1013 = vmatpush1.bf16.msra.mxu1 %v1716_v23 }
 0x21f   : > { %961 = vmatprep.subr.bf16.mxu0 %v1717_v31  ;;  %1014 = vmatprep.subr.bf16.mxu1 %v1719_v32 }
 0x222   : > { %962 = vmatpush1.bf16.msra.mxu0 %v1721_v33  ;;  %1015 = vmatpush1.bf16.msra.mxu1 %v1722_v34 }
 0x225   : > { %964 = vmatmul.mubr.bf16.vlgmr.msra.gmra.mrb[0].mxu0 %v521_v35  ;;  %1017 = vmatmul.mubr.bf16.vlgmr.msra.gmra.mrb[0].mxu1 %v521_v35 }
 0x226   : > { %973 = vmatprep.mubr.bf16.mxu0 %v524_v36  ;;  %1026 = vmatprep.mubr.bf16.mxu1 %v524_v36 }
 0x22d   : > { %974 = vmatmul.mubr.bf16.gmra.mrb[4].mxu0 %v523_v37  ;;  %1027 = vmatmul.mubr.bf16.gmra.mrb[4].mxu1 %v523_v37 }
 0x2f8   : > { %v965_v49 = vpop.f32.mrb[0].mxu0  ;;  %v1018_v50 = vpop.f32.mrb[0].mxu1 }
 0x2f9   : > { %v2277_v51 = vadd.f32 %v965_v49, %v2268_v45  ;;  %v2280_v52 = vadd.f32 %v1018_v50, %v2270_v46  ;;  %v967_v53 = vpop.f32.mrb[1].mxu0  ;;  %v1020_v54 = vpop.f32.mrb[1].mxu1 }
 0x2fa   : > { %v2283_v55 = vadd.f32 %v967_v53, %v2272_v47  ;;  %v2286_v56 = vadd.f32 %v1020_v54, %v2274_v48  ;;  %v969_v57 = vpop.f32.mrb[2].mxu0  ;;  %v1022_v58 = vpop.f32.mrb[2].mxu1 }
 0x2fb   : > { %v1053_v59 = vmul.f32 0.044715, %v2277_v51  ;;  %v1055_v60 = vmul.f32 0.044715, %v2280_v52  ;;  %v2295_v1 = vadd.f32 %v969_v57, %v2268_v45  ;;  %v2298_v2 = vadd.f32 %v1022_v58, %v2270_v46  ;;  %v971_v3 = vpop.f32.mrb[3].mxu0  ;;  %v1024_v4 = vpop.f32.mrb[3].mxu1 }
 0x2fc   : > { %v1054_v61 = vmul.f32 0.044715, %v2283_v55  ;;  %v1056_v62 = vmul.f32 0.044715, %v2286_v56  ;;  %v2303_v7 = vadd.f32 %v971_v3, %v2272_v47  ;;  %v2315_v19 = vadd.f32 %v1024_v4, %v2274_v48 }
 0x2fd   : > { %v1069_v63 = vmul.f32 %v1053_v59, %v2277_v51  ;;  %v1071_v0 = vmul.f32 %v1055_v60, %v2280_v52  ;;  %v1057_v10 = vmul.f32 0.044715, %v2295_v1  ;;  %v1059_v13 = vmul.f32 0.044715, %v2298_v2 }
 0x2fe   : > { %v1070_v5 = vmul.f32 %v1054_v61, %v2283_v55  ;;  %v1072_v6 = vmul.f32 %v1056_v62, %v2286_v56  ;;  %v1058_v27 = vmul.f32 0.044715, %v2303_v7  ;;  %v1060_v38 = vmul.f32 0.044715, %v2315_v19 }
 0x2ff   : > { %v1085_v8 = vmul.f32 %v1069_v63, %v2277_v51  ;;  %v1087_v9 = vmul.f32 %v1071_v0, %v2280_v52  ;;  %v1073_v18 = vmul.f32 %v1057_v10, %v2295_v1  ;;  %v1075_v26 = vmul.f32 %v1059_v13, %v2298_v2 }
 0x300   : > { %v1086_v11 = vmul.f32 %v1070_v5, %v2283_v55  ;;  %v1088_v12 = vmul.f32 %v1072_v6, %v2286_v56  ;;  %v975_v14 = vpop.f32.mrb[4].mxu0  ;;  %v1028_v15 = vpop.f32.mrb[4].mxu1  ;;  %v1074_v35 = vmul.f32 %v1058_v27, %v2303_v7  ;;  %v1076_v44 = vmul.f32 %v1060_v38, %v2315_v19 }
 0x301   : > { %v1101_v16 = vadd.f32 %v1085_v8, %v2277_v51  ;;  %v1103_v17 = vadd.f32 %v1087_v9, %v2280_v52  ;;  %v977_v24 = vpop.f32.mrb[5].mxu0  ;;  %v1030_v20 = vpop.f32.mrb[5].mxu1  ;;  %v1089_v23 = vmul.f32 %v1073_v18, %v2295_v1  ;;  %v1091_v34 = vmul.f32 %v1075_v26, %v2298_v2 }
 0x302   : > { %v1102_v21 = vadd.f32 %v1086_v11, %v2283_v55  ;;  %v1104_v25 = vadd.f32 %v1088_v12, %v2286_v56  ;;  %v979_v28 = vpop.f32.mrb[6].mxu0  ;;  %v2321_v29 = vpop.f32.mrb[6].mxu1  ;;  %v2333_v39 = vadd.f32 %v975_v14, %v2268_v45  ;;  %v1090_v41 = vmul.f32 %v1074_v35, %v2303_v7 }
 0x303   : > { %v1117_v30 = vmul.f32 0.7978846, %v1101_v16  ;;  %v1119_v22 = vmul.f32 0.7978846, %v1103_v17  ;;  %v2324_v31 = vpop.f32.mrb[7].mxu0  ;;  %v2328_v36 = vpop.f32.mrb[7].mxu1  ;;  %v1105_v37 = vadd.f32 %v1089_v23, %v2295_v1  ;;  %v1107_v40 = vadd.f32 %v1091_v34, %v2298_v2 }
 0x304   : > { %v1118_v32 = vmul.f32 0.7978846, %v1102_v21  ;;  %v1120_v33 = vmul.f32 0.7978846, %v1104_v25  ;;  %v2338_v42 = vadd.f32 %v1028_v15, %v2270_v46  ;;  %v1106_v50 = vadd.f32 %v1090_v41, %v2303_v7 }
 0x305   : > { %1723 = vtanh.f32 %v1117_v30  ;;  %v1121_v43 = vmul.f32 0.7978846, %v1105_v37  ;;  %v1123_v49 = vmul.f32 0.7978846, %v1107_v40  ;;  %v1061_v53 = vmul.f32 0.044715, %v2333_v39 }
 0x306   : > { %1725 = vtanh.f32 %v1119_v22  ;;  %v1037_v54 = vmul.f32 0.5, %v2277_v51  ;;  %v1092_v57 = vmul.f32 %v1076_v44, %v2315_v19  ;;  %v1063_v58 = vmul.f32 0.044715, %v2338_v42 }
 0x307   : > { %1727 = vtanh.f32 %v1118_v32  ;;  %v1122_v59 = vmul.f32 0.7978846, %v1106_v50  ;;  %v1077_v60 = vmul.f32 %v1061_v53, %v2333_v39  ;;  %v2348_v61 = vadd.f32 %v977_v24, %v2272_v47 }
 0x308   : > { %1729 = vtanh.f32 %v1120_v33  ;;  %v1108_v62 = vadd.f32 %v1092_v57, %v2315_v19  ;;  %v1079_v63 = vmul.f32 %v1063_v58, %v2338_v42  ;;  %v2353_v0 = vadd.f32 %v1030_v20, %v2274_v48 }
 0x309   : > { %1731 = vtanh.f32 %v1121_v43  ;;  %v2356_v51 = vadd.f32 %v979_v28, %v2268_v45  ;;  %v1039_v3 = vmul.f32 0.5, %v2280_v52  ;;  %v1093_v4 = vmul.f32 %v1077_v60, %v2333_v39 }
 0x30a   : > { %1733 = vtanh.f32 %v1123_v49  ;;  %v1062_v5 = vmul.f32 0.044715, %v2348_v61  ;;  %v1038_v6 = vmul.f32 0.5, %v2283_v55  ;;  %v1124_v8 = vmul.f32 0.7978846, %v1108_v62 }
 0x30b   : > { %1735 = vtanh.f32 %v1122_v59  ;;  %v1095_v9 = vmul.f32 %v1079_v63, %v2338_v42  ;;  %v1064_v10 = vmul.f32 0.044715, %v2353_v0  ;;  %v1040_v11 = vmul.f32 0.5, %v2286_v56 }
 0x30c   : > { %v1109_v12 = vadd.f32 %v1093_v4, %v2333_v39  ;;  %v1078_v45 = vmul.f32 %v1062_v5, %v2348_v61  ;;  %v1065_v52 = vmul.f32 0.044715, %v2356_v51  ;;  %v1041_v14 = vmul.f32 0.5, %v2295_v1 }
 0x30d   : > { %1737 = vtanh.f32 %v1124_v8  ;;  %v1111_v15 = vadd.f32 %v1095_v9, %v2338_v42  ;;  %v1080_v55 = vmul.f32 %v1064_v10, %v2353_v0  ;;  %v2376_v1 = vadd.f32 %v2321_v29, %v2270_v46 }
 0x30e   : > { %v1125_v18 = vmul.f32 0.7978846, %v1109_v12  ;;  %v1094_v24 = vmul.f32 %v1078_v45, %v2348_v61  ;;  %v1081_v56 = vmul.f32 %v1065_v52, %v2356_v51  ;;  %v1042_v41 = vmul.f32 0.5, %v2303_v7 }
 0x30f   : > { %v1724_v13 = vpop.eup %1723  ;;  %v1127_v25 = vmul.f32 0.7978846, %v1111_v15  ;;  %v1096_v26 = vmul.f32 %v1080_v55, %v2353_v0  ;;  %v1067_v44 = vmul.f32 0.044715, %v2376_v1  ;;  %v1043_v60 = vmul.f32 0.5, %v2298_v2 }
 0x310   : > { %v1726_v16 = vpop.eup %1725  ;;  %v1149_v17 = vadd.f32 1.0, %v1724_v13  ;;  %1739 = vtanh.f32 %v1125_v18  ;;  %v1110_v22 = vadd.f32 %v1094_v24, %v2348_v61  ;;  %v1097_v46 = vmul.f32 %v1081_v56, %v2356_v51 }
 0x311   : > { %v1728_v20 = vpop.eup %1727  ;;  %v1151_v21 = vadd.f32 1.0, %v1726_v16  ;;  %1741 = vtanh.f32 %v1127_v25  ;;  %v1112_v34 = vadd.f32 %v1096_v26, %v2353_v0  ;;  %v1083_v62 = vmul.f32 %v1067_v44, %v2376_v1 }
 0x312   : > { %v1730_v27 = vpop.eup %1729  ;;  %v1165_v28 = vmul.f32 %v1149_v17, %v1037_v54  ;;  %v1150_v30 = vadd.f32 1.0, %v1728_v20  ;;  %v1126_v40 = vmul.f32 0.7978846, %v1110_v22  ;;  %v1113_v59 = vadd.f32 %v1097_v46, %v2356_v51 }
 0x313   : > { %v1732_v23 = vpop.eup %1731  ;;  %v1167_v32 = vmul.f32 %v1151_v21, %v1039_v3  ;;  %v1152_v33 = vadd.f32 1.0, %v1730_v27  ;;  %v1128_v43 = vmul.f32 0.7978846, %v1112_v34  ;;  %v982_v7 = vadd.f32 %v2324_v31, %v2272_v47 }
 0x314   : > { %v1734_v35 = vpop.eup %1733  ;;  %v1166_v37 = vmul.f32 %v1150_v30, %v1038_v6  ;;  %v1153_v38 = vadd.f32 1.0, %v1732_v23  ;;  %1743 = vtanh.f32 %v1126_v40  ;;  %v1035_v63 = vadd.f32 %v2328_v36, %v2274_v48 }
 0x315   : > { %v1168_v29 = vmul.f32 %v1152_v33, %v1040_v11  ;;  %v1736_v49 = vpop.eup %1735  ;;  %v1155_v54 = vadd.f32 1.0, %v1734_v35  ;;  %1745 = vtanh.f32 %v1128_v43  ;;  %v1044_v6 = vmul.f32 0.5, %v2315_v19 }
 0x316   : > { %v1526_v50 = vpack.c.bf16 %v1166_v37, %v1165_v28  ;;  %v1169_v53 = vmul.f32 %v1153_v38, %v1041_v14  ;;  %v1154_v58 = vadd.f32 1.0, %v1736_v49  ;;  %v1099_v9 = vmul.f32 %v1083_v62, %v2376_v1 }
 0x317   : > { %v1527_v57 = vpack.c.bf16 %v1168_v29, %v1167_v32  ;;  %v1738_v3 = vpop.eup %1737  ;;  %v1171_v5 = vmul.f32 %v1155_v54, %v1043_v60  ;;  %v1129_v2 = vmul.f32 0.7978846, %v1113_v59  ;;  %v1066_v11 = vmul.f32 0.044715, %v982_v7 }
 0x318   : > { %1229 = vst [vmem:[%s2188_s10] sm:$0xff] %v1526_v50  ;;  %v1170_v4 = vmul.f32 %v1154_v58, %v1042_v41  ;;  %v1156_v8 = vadd.f32 1.0, %v1738_v3  ;;  %v1068_v12 = vmul.f32 0.044715, %v1035_v63  ;;  %v1115_v31 = vadd.f32 %v1099_v9, %v2376_v1 }
 0x319   : > { %1230 = vst [vmem:[%s2188_s10 + $0x8] sm:$0xff] %v1527_v57  ;;  %v1082_v52 = vmul.f32 %v1066_v11, %v982_v7  ;;  %v1045_v55 = vmul.f32 0.5, %v2333_v39  ;;  %1747 = vtanh.f32 %v1129_v2  ;;  %v1047_v24 = vmul.f32 0.5, %v2338_v42 }
 0x31a   : > { %v1528_v10 = vpack.c.bf16 %v1170_v4, %v1169_v53  ;;  %v1740_v45 = vpop.eup %1739  ;;  %v1172_v47 = vmul.f32 %v1156_v8, %v1044_v6  ;;  %v1084_v13 = vmul.f32 %v1068_v12, %v1035_v63  ;;  %v1131_v19 = vmul.f32 0.7978846, %v1115_v31 }
 0x31b   : > { %v1742_v48 = vpop.eup %1741  ;;  %v1157_v36 = vadd.f32 1.0, %v1740_v45  ;;  %v1098_v16 = vmul.f32 %v1082_v52, %v982_v7  ;;  %v1046_v56 = vmul.f32 0.5, %v2348_v61  ;;  %v1048_v39 = vmul.f32 0.5, %v2353_v0 }
 0x31c   : > { %1231 = vst [vmem:[%s2188_s10 + $0x10] sm:$0xff] %v1528_v10  ;;  %v1529_v14 = vpack.c.bf16 %v1172_v47, %v1171_v5  ;;  %v1159_v15 = vadd.f32 1.0, %v1742_v48  ;;  %v1100_v17 = vmul.f32 %v1084_v13, %v1035_v63  ;;  %1749 = vtanh.f32 %v1131_v19 }
 0x31d   : > { %v1173_v21 = vmul.f32 %v1157_v36, %v1045_v55  ;;  %v1114_v26 = vadd.f32 %v1098_v16, %v982_v7  ;;  %v1049_v40 = vmul.f32 0.5, %v2356_v51  ;;  %v1051_v46 = vmul.f32 0.5, %v2376_v1 }
 0x31e   : > { %v1744_v18 = vpop.eup %1743  ;;  %1232 = vst [vmem:[%s2188_s10 + $0x18] sm:$0xff] %v1529_v14  ;;  %v1116_v27 = vadd.f32 %v1100_v17, %v1035_v63  ;;  %v1175_v28 = vmul.f32 %v1159_v15, %v1047_v24  ;;  %v1050_v43 = vmul.f32 0.5, %v982_v7  ;;  %v1052_v50 = vmul.f32 0.5, %v1035_v63 }
 0x31f   : > { %v1746_v20 = vpop.eup %1745  ;;  %v1158_v25 = vadd.f32 1.0, %v1744_v18  ;;  %v1130_v23 = vmul.f32 0.7978846, %v1114_v26  ;;  %v1262_v51 = vld [vmem:[%s2188_s10] sm:$0xff] (%p2470_p10) }
 0x320   : > { %v1160_v30 = vadd.f32 1.0, %v1746_v20  ;;  %v1132_v32 = vmul.f32 0.7978846, %v1116_v27  ;;  %v1264_v1 = vld [vmem:[%s2188_s10 + $0x8] sm:$0xff] (%p2470_p10)  ;;  %1263 = vst [vmem:[%s1249_s9] sm:$0xff] (%p2470_p10), %v1262_v51 }
 0x321   : > { %v1174_v22 = vmul.f32 %v1158_v25, %v1046_v56  ;;  %1751 = vtanh.f32 %v1130_v23  ;;  %1265 = vst [vmem:[%s1249_s9 + $0x8] sm:$0xff] (%p2470_p10), %v1264_v1 }
 0x322   : > { %v1176_v33 = vmul.f32 %v1160_v30, %v1048_v39  ;;  %1753 = vtanh.f32 %v1132_v32 }
 0x323   : > { %v1530_v34 = vpack.c.bf16 %v1174_v22, %v1173_v21  ;;  %v1748_v61 = vpop.eup %1747  ;;  %v1266_v60 = vld [vmem:[%s2188_s10 + $0x10] sm:$0xff] (%p2470_p10) }
 0x324   : > { %v1531_v42 = vpack.c.bf16 %v1176_v33, %v1175_v28  ;;  %v1161_v37 = vadd.f32 1.0, %v1748_v61  ;;  %1267 = vst [vmem:[%s1249_s9 + $0x20] sm:$0xff] (%p2470_p10), %v1266_v60 }
 0x325   : > { %1233 = vst [vmem:[%s2188_s10 + $0x20] sm:$0xff] %v1530_v34  ;;  %v1268_v62 = vld [vmem:[%s2188_s10 + $0x18] sm:$0xff] (%p2470_p10) }
 0x326   : > { %1234 = vst [vmem:[%s2188_s10 + $0x28] sm:$0xff] %v1531_v42  ;;  %v1750_v35 = vpop.eup %1749  ;;  %v1177_v41 = vmul.f32 %v1161_v37, %v1049_v40  ;;  %1269 = vst [vmem:[%s1249_s9 + $0x28] sm:$0xff] (%p2470_p10), %v1268_v62 }
 0x327   : > { %v1163_v38 = vadd.f32 1.0, %v1750_v35 }
 0x329   : > { %v1179_v49 = vmul.f32 %v1163_v38, %v1051_v46 }
 0x32b   : > { %v1752_v0 = vpop.eup %1751 }
 0x32c   : > { %v1754_v29 = vpop.eup %1753  ;;  %v1162_v44 = vadd.f32 1.0, %v1752_v0  ;;  %v1270_v7 = vld [vmem:[%s2188_s10 + $0x20] sm:$0xff] (%p2470_p10) }
 0x32d   : > { %v1164_v53 = vadd.f32 1.0, %v1754_v29  ;;  %1243 = sbr.rel (!%p2470_p10) target bundleno = 828 (0x33c), region = 64  ;;  %v1272_v63 = vld [vmem:[%s2188_s10 + $0x28] sm:$0xff] (%p2470_p10)  ;;  %1271 = vst [vmem:[%s1249_s9 + $0x40] sm:$0xff] (%p2470_p10), %v1270_v7 }
 0x32e   : > { %v1178_v54 = vmul.f32 %v1162_v44, %v1050_v43  ;;  %1273 = vst [vmem:[%s1249_s9 + $0x48] sm:$0xff] (%p2470_p10), %v1272_v63 }
 0x32f   : > { %v1180_v57 = vmul.f32 %v1164_v53, %v1052_v50 }
 0x330   : > { %v1532_v58 = vpack.c.bf16 %v1178_v54, %v1177_v41 }
 0x331   : > { %v1533_v59 = vpack.c.bf16 %v1180_v57, %v1179_v49 }
 0x332   : > { %1235 = vst [vmem:[%s2188_s10 + $0x30] sm:$0xff] %v1532_v58 }
 0x333   : > { %1236 = vst [vmem:[%s2188_s10 + $0x38] sm:$0xff] %v1533_v59 }
 0x339   : > { %v1274_v3 = vld [vmem:[%s2188_s10 + $0x30] sm:$0xff] }
 0x33a   : > { %v1276_v4 = vld [vmem:[%s2188_s10 + $0x38] sm:$0xff]  ;;  %1275 = vst [vmem:[%s1249_s9 + $0x60] sm:$0xff] %v1274_v3 }
 0x33b   : > { %1277 = vst [vmem:[%s1249_s9 + $0x68] sm:$0xff] %v1276_v4 }
 0x33c PF: > { %s22_s23 = sadd.s32 1, %s1933_s23   ;;  %s2471_s28 = sld [smem:[#allocation15_spill]] }
 0x33d   : > { %p19_p1 = scmp.ge.s32.totalorder %s22_s23, 4   ;;  %s2472_s18 = smov %s1917_s19 }
 0x33e   : > { %s2473_s19 = smov %s1921_s20  ;;  %s2474_s20 = smov %s2107_s17 }
 0x33f   : > { %s2475_s21 = smov %s1929_s22  ;;  %21 = sbr.rel (!%p19_p1) target bundleno = 11 (0xb), region = 133 }
 0x342   : > { %s2476_s22 = smov %s2471_s28 }
 0x346   :  { %1293 = vsyncpa [#allocation4], 1 }
 0x347   :  { %1295 = vsyncpa [#allocation4 + $0x1], 1 }
 0x348   :  { %1296 = vsyncpa [#allocation6], 1 }
 0x349   :  { %1298 = vsyncpa [#allocation6 + $0x1], 1 }
 0x34a   :  { %1299 = vsyncpa [#allocation9], 1 }

// kernel: _lambda_.17
= control target key start
LH: loop header
LB: loop body
LE: loop exit
PB: predicated region body
PF: predicated region fallthrough
CT: control target
= control target key end

     0   :  { %s1495_s15 = smov 0   ;;  %s1497_s16 = smov 0   ;;  %s1665_s0 = inlined_call_operand.vmem [shape: bf16[32,1024], index: 0, kind: input, shape index: {}]   ;;  %s1666_s1 = inlined_call_operand.vmem [shape: bf16[1024,256], index: 1, kind: input, shape index: {}]   ;;  %s1667_s2 = inlined_call_operand.vmem [shape: f32[1,256], index: 2, kind: input, shape index: {}]   ;;  %s1668_s3 = inlined_call_operand.vmem [shape: bf16[32,256], index: 3, kind: input, shape index: {}]   ;;  %s1669_s4 = inlined_call_operand.vmem [shape: bf16[32,256], index: 4, kind: output, shape index: {}]  }
   0x1   :  { %s1499_s17 = smov 0   ;;  %s1501_s18 = smov 0  }
   0x2   :  { %s1503_s19 = smov 0  }
   0x3 LB: > { %s26_s20 = sadd.s32 1, %s1463_s18  ;;  %p49_p1 = scmp.ne.s32.totalorder %s1455_s16, %s1451_s15  ;;  %s1467_s19 = sphi %s1503_s19, %s14_s19   ;;  %s1463_s18 = sphi %s1501_s18, %s1673_s18   ;;  %s1459_s17 = sphi %s1499_s17, %s1672_s17   ;;  %s1455_s16 = sphi %s1497_s16, %s1671_s16   ;;  %s1451_s15 = sphi %s1495_s15, %s1670_s15  }
   0x4   : > { %p27_p0 = scmp.ge.s32.totalorder %s26_s20, 2  ;;  %p50_p2 = scmp.eq.s32.totalorder %s1467_s19, 0 }
   0x5   : > { %s42_s22 = sadd.s32 1, %s1455_s16  ;;  %p1175_p5 = scmp.ge.s32.totalorder %s1467_s19, 2 }
   0x6   : > { %s1675_s20 = smov (%p27_p0, %s26_s20), 0  ;;  %p51_p3 = por %p50_p2, %p49_p1 }
   0x7   : > { %s38_s21 = ssub.s32 %s1463_s18, %s1675_s20  ;;  %208 = sbr.rel (%p1175_p5) target bundleno = 22 (0x16), region = 24 }
   0x8   : > { %p40_p4 = scmp.eq.s32.totalorder %s38_s21, 0 }
   0xa   : > { %s1530_s23 = scalar_select %p40_p4, %s1455_s16, %s42_s22  }
   0xe   : > { %211 = sbr.rel (!%p51_p3) target bundleno = 22 (0x16), region = 28  ;;  %s213_s24 = sand.u32 (%p51_p3), 1, %s1455_s16  }
   0xf   : > { %s1266_s25 = sshll.u32 (%p51_p3), %s1463_s18, 4  ;;  %s1176_s26 = sshll.u32 (%p51_p3), %s213_s24, 6 }
  0x10   : > { %s221_s29 = scalar_lea.vmem (%p51_p3), %s1665_s0, %s1266_s25  ;;  %s215_s30 = scalar_lea.vmem (%p51_p3), [#allocation3], %s1176_s26 }
  0x11   : > { %v234_v0 = vld [vmem:[%s221_s29] sm:$0xff] (%p51_p3)  ;;  %v236_v1 = vld [vmem:[%s221_s29 + $0x8] sm:$0xff] (%p51_p3) }
  0x12   : > { %v238_v2 = vld [vmem:[%s221_s29 + $0x20] sm:$0xff] (%p51_p3)  ;;  %235 = vst [vmem:[%s215_s30] sm:$0xff] (%p51_p3), %v234_v0  ;;  %237 = vst [vmem:[%s215_s30 + $0x8] sm:$0xff] (%p51_p3), %v236_v1  ;;  %v240_v3 = vld [vmem:[%s221_s29 + $0x28] sm:$0xff] (%p51_p3) }
  0x13   : > { %239 = vst [vmem:[%s215_s30 + $0x10] sm:$0xff] (%p51_p3), %v238_v2  ;;  %v242_v4 = vld [vmem:[%s221_s29 + $0x40] sm:$0xff] (%p51_p3)  ;;  %v244_v5 = vld [vmem:[%s221_s29 + $0x48] sm:$0xff] (%p51_p3)  ;;  %241 = vst [vmem:[%s215_s30 + $0x18] sm:$0xff] (%p51_p3), %v240_v3 }
  0x14   : > { %243 = vst [vmem:[%s215_s30 + $0x20] sm:$0xff] (%p51_p3), %v242_v4  ;;  %245 = vst [vmem:[%s215_s30 + $0x28] sm:$0xff] (%p51_p3), %v244_v5  ;;  %v246_v6 = vld [vmem:[%s221_s29 + $0x60] sm:$0xff] (%p51_p3)  ;;  %v248_v7 = vld [vmem:[%s221_s29 + $0x68] sm:$0xff] (%p51_p3) }
  0x15   : > { %247 = vst [vmem:[%s215_s30 + $0x30] sm:$0xff] %v246_v6  ;;  %249 = vst [vmem:[%s215_s30 + $0x38] sm:$0xff] %v248_v7 }
  0x16 PF: > { %p1179_p6 = scmp.ge.s32.totalorder %s1467_s19, 1  ;;  %p269_p7 = scmp.lt.s32.totalorder %s1467_s19, 3 }
  0x18   : > { %p270_p8 = pnand %p1179_p6, %p269_p7 }
  0x19   : > { %s1181_s5 = sshll.u32 (!%p270_p8), %s1459_s17, 6  ;;  %s276_s6 = sand.u32 (!%p270_p8), 1, %s1451_s15  }
  0x1a   : > { %273 = sbr.rel (%p270_p8) target bundleno = 347 (0x15b), region = 55  ;;  %p334_p9 = scmp.lt.s32.totalorder (!%p270_p8), %s1181_s5, 127 }
  0x1b   : > { %s1180_s7 = sshll.u32 (!%p270_p8), %s276_s6, 6  ;;  %p1256_p10 = scmp.ne.s32.totalorder (!%p270_p8), %s1459_s17, 0 }
  0x1c   : > { %s1542_s8 = scalar_lea.vmem (!%p270_p8), [#allocation3], %s1180_s7 }
  0x1d   : > { %v1419_v8 = vld [vmem:[%s1542_s8 + $0x4] ss:$16 sps:$4 sm:$0xff] (!%p270_p8)   ;;  %v1422_v9 = vld [vmem:[%s1542_s8 + $0xc] ss:$16 sps:$4 sm:$0xff] (!%p270_p8)  }
  0x1e   : > { %837 = vmatprep.mubr.bf16.mxu1 (!%p270_p8), %v1419_v8  ;;  %890 = vmatprep.mubr.bf16.mxu0 (!%p270_p8), %v1422_v9 }
  0x21   : > { %s1677_s5 = smov (!%p334_p9, %s1181_s5), 127 }
  0x22   : > { %s1267_s9 = sshll.u32 %s1677_s5, 3 }
  0x23   : > { %s1549_s12 = scalar_lea.vmem %s1666_s1, %s1267_s9 }
  0x24   : > { %v1321_v10 = vld [vmem:[%s1549_s12 + $0x4] ss:$8 sps:$4 sm:$0xff]   ;;  %v1325_v12 = vld [vmem:[%s1549_s12] ss:$8 sps:$4 sm:$0xff]   ;;  %v1327_v14 = vld [vmem:[%s1549_s12 + $0x14] ss:$8 sps:$4 sm:$0xff]  }
  0x25   : > { %v1323_v11 = vld [vmem:[%s1549_s12 + $0x104] ss:$8 sps:$4 sm:$0xff]   ;;  %805 = vmatprep.subr.bf16.mxu1 %v1321_v10  ;;  %v1326_v13 = vld [vmem:[%s1549_s12 + $0x100] ss:$8 sps:$4 sm:$0xff]   ;;  %v1329_v15 = vld [vmem:[%s1549_s12 + $0x114] ss:$8 sps:$4 sm:$0xff]  }
  0x26   : > { %858 = vmatprep.subr.bf16.mxu0 %v1323_v11  ;;  %806 = vmatpush1.bf16.msra.mxu1 %v1325_v12  ;;  %v1331_v16 = vld [vmem:[%s1549_s12 + $0x10] ss:$8 sps:$4 sm:$0xff]   ;;  %v1333_v18 = vld [vmem:[%s1549_s12 + $0x24] ss:$8 sps:$4 sm:$0xff]   ;;  %v1337_v20 = vld [vmem:[%s1549_s12 + $0x20] ss:$8 sps:$4 sm:$0xff]  }
  0x27   : > { %859 = vmatpush1.bf16.msra.mxu0 %v1326_v13  ;;  %807 = vmatprep.subr.bf16.mxu1 %v1327_v14  ;;  %v1332_v17 = vld [vmem:[%s1549_s12 + $0x110] ss:$8 sps:$4 sm:$0xff]   ;;  %v1335_v19 = vld [vmem:[%s1549_s12 + $0x124] ss:$8 sps:$4 sm:$0xff]   ;;  %v1338_v21 = vld [vmem:[%s1549_s12 + $0x120] ss:$8 sps:$4 sm:$0xff]  }
  0x28   : > { %860 = vmatprep.subr.bf16.mxu0 %v1329_v15  ;;  %v1339_v22 = vld [vmem:[%s1549_s12 + $0x34] ss:$8 sps:$4 sm:$0xff]   ;;  %v1343_v24 = vld [vmem:[%s1549_s12 + $0x30] ss:$8 sps:$4 sm:$0xff]   ;;  %v1345_v26 = vld [vmem:[%s1549_s12 + $0x44] ss:$8 sps:$4 sm:$0xff]  }
  0x29   : > { %v1341_v23 = vld [vmem:[%s1549_s12 + $0x134] ss:$8 sps:$4 sm:$0xff]   ;;  %v1344_v25 = vld [vmem:[%s1549_s12 + $0x130] ss:$8 sps:$4 sm:$0xff]   ;;  %v1347_v27 = vld [vmem:[%s1549_s12 + $0x144] ss:$8 sps:$4 sm:$0xff]  }
  0x2a   : > { %808 = vmatpush1.bf16.msra.mxu1 %v1331_v16  ;;  %v1349_v28 = vld [vmem:[%s1549_s12 + $0x40] ss:$8 sps:$4 sm:$0xff]   ;;  %v1351_v30 = vld [vmem:[%s1549_s12 + $0x54] ss:$8 sps:$4 sm:$0xff]   ;;  %v1355_v32 = vld [vmem:[%s1549_s12 + $0x50] ss:$8 sps:$4 sm:$0xff]  }
  0x2b   : > { %861 = vmatpush1.bf16.msra.mxu0 %v1332_v17  ;;  %809 = vmatprep.subr.bf16.mxu1 %v1333_v18  ;;  %v1350_v29 = vld [vmem:[%s1549_s12 + $0x140] ss:$8 sps:$4 sm:$0xff]   ;;  %v1353_v31 = vld [vmem:[%s1549_s12 + $0x154] ss:$8 sps:$4 sm:$0xff]   ;;  %v1356_v33 = vld [vmem:[%s1549_s12 + $0x150] ss:$8 sps:$4 sm:$0xff]  }
  0x2c   : > { %862 = vmatprep.subr.bf16.mxu0 %v1335_v19  ;;  %v1357_v34 = vld [vmem:[%s1549_s12 + $0x64] ss:$8 sps:$4 sm:$0xff]   ;;  %v1361_v36 = vld [vmem:[%s1549_s12 + $0x60] ss:$8 sps:$4 sm:$0xff]   ;;  %v1363_v38 = vld [vmem:[%s1549_s12 + $0x74] ss:$8 sps:$4 sm:$0xff]  }
  0x2d   : > { %v1359_v35 = vld [vmem:[%s1549_s12 + $0x164] ss:$8 sps:$4 sm:$0xff]   ;;  %v1362_v37 = vld [vmem:[%s1549_s12 + $0x160] ss:$8 sps:$4 sm:$0xff]   ;;  %v1365_v39 = vld [vmem:[%s1549_s12 + $0x174] ss:$8 sps:$4 sm:$0xff]  }
  0x2e   : > { %810 = vmatpush1.bf16.msra.mxu1 %v1337_v20  ;;  %v1367_v40 = vld [vmem:[%s1549_s12 + $0x70] ss:$8 sps:$4 sm:$0xff]   ;;  %v1369_v42 = vld [vmem:[%s1549_s12 + $0x84] ss:$8 sps:$4 sm:$0xff]   ;;  %v1373_v44 = vld [vmem:[%s1549_s12 + $0x80] ss:$8 sps:$4 sm:$0xff]  }
  0x2f   : > { %863 = vmatpush1.bf16.msra.mxu0 %v1338_v21  ;;  %811 = vmatprep.subr.bf16.mxu1 %v1339_v22  ;;  %v1368_v41 = vld [vmem:[%s1549_s12 + $0x170] ss:$8 sps:$4 sm:$0xff]   ;;  %v1371_v43 = vld [vmem:[%s1549_s12 + $0x184] ss:$8 sps:$4 sm:$0xff]   ;;  %v1374_v45 = vld [vmem:[%s1549_s12 + $0x180] ss:$8 sps:$4 sm:$0xff]  }
  0x30   : > { %864 = vmatprep.subr.bf16.mxu0 %v1341_v23  ;;  %v1375_v46 = vld [vmem:[%s1549_s12 + $0x94] ss:$8 sps:$4 sm:$0xff]   ;;  %v1379_v48 = vld [vmem:[%s1549_s12 + $0x90] ss:$8 sps:$4 sm:$0xff]   ;;  %v1381_v50 = vld [vmem:[%s1549_s12 + $0xa4] ss:$8 sps:$4 sm:$0xff]  }
  0x31   : > { %v1377_v47 = vld [vmem:[%s1549_s12 + $0x194] ss:$8 sps:$4 sm:$0xff]   ;;  %v1380_v49 = vld [vmem:[%s1549_s12 + $0x190] ss:$8 sps:$4 sm:$0xff]   ;;  %v1383_v51 = vld [vmem:[%s1549_s12 + $0x1a4] ss:$8 sps:$4 sm:$0xff]  }
  0x32   : > { %812 = vmatpush1.bf16.msra.mxu1 %v1343_v24  ;;  %v1385_v52 = vld [vmem:[%s1549_s12 + $0xa0] ss:$8 sps:$4 sm:$0xff]   ;;  %v1387_v54 = vld [vmem:[%s1549_s12 + $0xb4] ss:$8 sps:$4 sm:$0xff]   ;;  %v1391_v56 = vld [vmem:[%s1549_s12 + $0xb0] ss:$8 sps:$4 sm:$0xff]  }
  0x33   : > { %865 = vmatpush1.bf16.msra.mxu0 %v1344_v25  ;;  %813 = vmatprep.subr.bf16.mxu1 %v1345_v26  ;;  %v1386_v53 = vld [vmem:[%s1549_s12 + $0x1a0] ss:$8 sps:$4 sm:$0xff]   ;;  %v1389_v55 = vld [vmem:[%s1549_s12 + $0x1b4] ss:$8 sps:$4 sm:$0xff]   ;;  %v1392_v57 = vld [vmem:[%s1549_s12 + $0x1b0] ss:$8 sps:$4 sm:$0xff]  }
  0x34   : > { %866 = vmatprep.subr.bf16.mxu0 %v1347_v27  ;;  %v1393_v58 = vld [vmem:[%s1549_s12 + $0xc4] ss:$8 sps:$4 sm:$0xff]   ;;  %v1397_v60 = vld [vmem:[%s1549_s12 + $0xc0] ss:$8 sps:$4 sm:$0xff]   ;;  %v1399_v62 = vld [vmem:[%s1549_s12 + $0xd4] ss:$8 sps:$4 sm:$0xff]  }
  0x35   : > { %v1395_v59 = vld [vmem:[%s1549_s12 + $0x1c4] ss:$8 sps:$4 sm:$0xff]   ;;  %v1398_v61 = vld [vmem:[%s1549_s12 + $0x1c0] ss:$8 sps:$4 sm:$0xff]   ;;  %v1401_v63 = vld [vmem:[%s1549_s12 + $0x1d4] ss:$8 sps:$4 sm:$0xff]  }
  0x36   : > { %814 = vmatpush1.bf16.msra.mxu1 %v1349_v28  ;;  %v1403_v0 = vld [vmem:[%s1549_s12 + $0xd0] ss:$8 sps:$4 sm:$0xff]   ;;  %v1405_v2 = vld [vmem:[%s1549_s12 + $0xe4] ss:$8 sps:$4 sm:$0xff]   ;;  %v1409_v4 = vld [vmem:[%s1549_s12 + $0xe0] ss:$8 sps:$4 sm:$0xff]  }
  0x37   : > { %867 = vmatpush1.bf16.msra.mxu0 %v1350_v29  ;;  %815 = vmatprep.subr.bf16.mxu1 %v1351_v30  ;;  %v1404_v1 = vld [vmem:[%s1549_s12 + $0x1d0] ss:$8 sps:$4 sm:$0xff]   ;;  %v1407_v3 = vld [vmem:[%s1549_s12 + $0x1e4] ss:$8 sps:$4 sm:$0xff]   ;;  %v1410_v5 = vld [vmem:[%s1549_s12 + $0x1e0] ss:$8 sps:$4 sm:$0xff]  }
  0x38   : > { %868 = vmatprep.subr.bf16.mxu0 %v1353_v31  ;;  %v1411_v6 = vld [vmem:[%s1549_s12 + $0xf4] ss:$8 sps:$4 sm:$0xff]   ;;  %v1415_v8 = vld [vmem:[%s1549_s12 + $0xf0] ss:$8 sps:$4 sm:$0xff]  }
  0x39   : > { %v1413_v7 = vld [vmem:[%s1549_s12 + $0x1f4] ss:$8 sps:$4 sm:$0xff]   ;;  %v1416_v9 = vld [vmem:[%s1549_s12 + $0x1f0] ss:$8 sps:$4 sm:$0xff]  }
  0x3a   : > { %816 = vmatpush1.bf16.msra.mxu1 %v1355_v32  ;;  %v1417_v10 = vld [vmem:[%s1542_s8] ss:$16 sps:$4 sm:$0xff]   ;;  %v1420_v11 = vld [vmem:[%s1542_s8 + $0x8] ss:$16 sps:$4 sm:$0xff]   ;;  %v1423_v12 = vld [vmem:[%s1542_s8 + $0x24] ss:$16 sps:$4 sm:$0xff]  }
  0x3b   : > { %869 = vmatpush1.bf16.msra.mxu0 %v1356_v33  ;;  %817 = vmatprep.subr.bf16.mxu1 %v1357_v34  ;;  %v1425_v13 = vld [vmem:[%s1542_s8 + $0x2c] ss:$16 sps:$4 sm:$0xff]   ;;  %v1427_v14 = vld [vmem:[%s1542_s8 + $0x20] ss:$16 sps:$4 sm:$0xff]   ;;  %v1428_v15 = vld [vmem:[%s1542_s8 + $0x28] ss:$16 sps:$4 sm:$0xff]  }
  0x3c   : > { %870 = vmatprep.subr.bf16.mxu0 %v1359_v35 }
  0x3e   : > { %818 = vmatpush1.bf16.msra.mxu1 %v1361_v36 }
  0x3f   : > { %871 = vmatpush1.bf16.msra.mxu0 %v1362_v37  ;;  %819 = vmatprep.subr.bf16.mxu1 %v1363_v38 }
  0x40   : > { %872 = vmatprep.subr.bf16.mxu0 %v1365_v39 }
  0x42   : > { %820 = vmatpush1.bf16.msra.mxu1 %v1367_v40  ;;  %v1469_v40 = vmov (!%p1256_p10), 0.0  }
  0x43   : > { %873 = vmatpush1.bf16.msra.mxu0 %v1368_v41  ;;  %821 = vmatprep.subr.bf16.mxu1 %v1369_v42  ;;  %915 = vst [vmem:[#allocation2] sm:$0xff] (!%p1256_p10), %v1469_v40  ;;  %916 = vst [vmem:[#allocation2 + $0x8] sm:$0xff] (!%p1256_p10), %v1469_v40 }
  0x44   : > { %874 = vmatprep.subr.bf16.mxu0 %v1371_v43  ;;  %917 = vst [vmem:[#allocation2 + $0x10] sm:$0xff] (!%p1256_p10), %v1469_v40  ;;  %918 = vst [vmem:[#allocation2 + $0x18] sm:$0xff] (!%p1256_p10), %v1469_v40 }
  0x45   : > { %919 = vst [vmem:[#allocation2 + $0x20] sm:$0xff] (!%p1256_p10), %v1469_v40  ;;  %920 = vst [vmem:[#allocation2 + $0x28] sm:$0xff] (!%p1256_p10), %v1469_v40 }
  0x46   : > { %822 = vmatpush1.bf16.msra.mxu1 %v1373_v44  ;;  %921 = vst [vmem:[#allocation2 + $0x30] sm:$0xff] (!%p1256_p10), %v1469_v40  ;;  %922 = vst [vmem:[#allocation2 + $0x38] sm:$0xff] (!%p1256_p10), %v1469_v40 }
  0x47   : > { %875 = vmatpush1.bf16.msra.mxu0 %v1374_v45  ;;  %823 = vmatprep.subr.bf16.mxu1 %v1375_v46 }
  0x48   : > { %876 = vmatprep.subr.bf16.mxu0 %v1377_v47 }
  0x4a   : > { %824 = vmatpush1.bf16.msra.mxu1 %v1379_v48 }
  0x4b   : > { %877 = vmatpush1.bf16.msra.mxu0 %v1380_v49  ;;  %825 = vmatprep.subr.bf16.mxu1 %v1381_v50 }
  0x4c   : > { %878 = vmatprep.subr.bf16.mxu0 %v1383_v51 }
  0x4e   : > { %826 = vmatpush1.bf16.msra.mxu1 %v1385_v52 }
  0x4f   : > { %879 = vmatpush1.bf16.msra.mxu0 %v1386_v53  ;;  %827 = vmatprep.subr.bf16.mxu1 %v1387_v54 }
  0x50   : > { %880 = vmatprep.subr.bf16.mxu0 %v1389_v55 }
  0x52   : > { %828 = vmatpush1.bf16.msra.mxu1 %v1391_v56 }
  0x53   : > { %881 = vmatpush1.bf16.msra.mxu0 %v1392_v57  ;;  %829 = vmatprep.subr.bf16.mxu1 %v1393_v58 }
  0x54   : > { %882 = vmatprep.subr.bf16.mxu0 %v1395_v59 }
  0x56   : > { %830 = vmatpush1.bf16.msra.mxu1 %v1397_v60 }
  0x57   : > { %883 = vmatpush1.bf16.msra.mxu0 %v1398_v61  ;;  %831 = vmatprep.subr.bf16.mxu1 %v1399_v62 }
  0x58   : > { %884 = vmatprep.subr.bf16.mxu0 %v1401_v63 }
  0x5a   : > { %832 = vmatpush1.bf16.msra.mxu1 %v1403_v0 }
  0x5b   : > { %885 = vmatpush1.bf16.msra.mxu0 %v1404_v1  ;;  %833 = vmatprep.subr.bf16.mxu1 %v1405_v2 }
  0x5c   : > { %886 = vmatprep.subr.bf16.mxu0 %v1407_v3 }
  0x5e   : > { %834 = vmatpush1.bf16.msra.mxu1 %v1409_v4 }
  0x5f   : > { %887 = vmatpush1.bf16.msra.mxu0 %v1410_v5  ;;  %835 = vmatprep.subr.bf16.mxu1 %v1411_v6 }
  0x60   : > { %888 = vmatprep.subr.bf16.mxu0 %v1413_v7 }
  0x62   : > { %836 = vmatpush1.bf16.msra.mxu1 %v1415_v8 }
  0x63   : > { %889 = vmatpush1.bf16.msra.mxu0 %v1416_v9 }
  0x65   : > { %838 = vmatmul.mubr.bf16.vlgmr.msra.gmra.mrb[0].mxu1 %v1417_v10 }
  0x66   : > { %891 = vmatmul.mubr.bf16.vlgmr.msra.gmra.mrb[0].mxu0 %v1420_v11  ;;  %847 = vmatprep.mubr.bf16.mxu1 %v1423_v12 }
  0x67   : > { %900 = vmatprep.mubr.bf16.mxu0 %v1425_v13 }
  0x6d   : > { %848 = vmatmul.mubr.bf16.gmra.mrb[4].mxu1 %v1427_v14 }
  0x6e   : > { %901 = vmatmul.mubr.bf16.gmra.mrb[4].mxu0 %v1428_v15 }
 0x138   : > { %v839_v16 = vpop.f32.mrb[0].mxu1 }
 0x139   : > { %v892_v17 = vpop.f32.mrb[0].mxu0  ;;  %v841_v19 = vpop.f32.mrb[1].mxu1 }
 0x13a   : > { %v893_v18 = vadd.f32 %v892_v17, %v839_v16  ;;  %v894_v20 = vpop.f32.mrb[1].mxu0  ;;  %v843_v22 = vpop.f32.mrb[2].mxu1 }
 0x13b   : > { %v895_v21 = vadd.f32 %v894_v20, %v841_v19  ;;  %v896_v23 = vpop.f32.mrb[2].mxu0  ;;  %v845_v25 = vpop.f32.mrb[3].mxu1 }
 0x13c   : > { %v897_v24 = vadd.f32 %v896_v23, %v843_v22  ;;  %v898_v26 = vpop.f32.mrb[3].mxu0 }
 0x13d   : > { %v899_v27 = vadd.f32 %v898_v26, %v845_v25 }
 0x13f   : > { %914 = sbr.rel (%p1256_p10) target bundleno = 326 (0x146), region = 63 }
 0x140   : > { %v849_v28 = vpop.f32.mrb[4].mxu1 }
 0x141   : > { %v902_v29 = vpop.f32.mrb[4].mxu0  ;;  %v851_v31 = vpop.f32.mrb[5].mxu1 }
 0x142   : > { %v903_v30 = vadd.f32 %v902_v29, %v849_v28  ;;  %v904_v32 = vpop.f32.mrb[5].mxu0  ;;  %v853_v34 = vpop.f32.mrb[6].mxu1 }
 0x143   : > { %v905_v33 = vadd.f32 %v904_v32, %v851_v31  ;;  %v906_v35 = vpop.f32.mrb[6].mxu0  ;;  %v855_v37 = vpop.f32.mrb[7].mxu1 }
 0x144   : > { %v907_v36 = vadd.f32 %v906_v35, %v853_v34  ;;  %v908_v38 = vpop.f32.mrb[7].mxu0 }
 0x145   : > { %v909_v39 = vadd.f32 %v908_v38, %v855_v37 }
 0x146 PF: > { %v923_v41 = vld [vmem:[#allocation2] sm:$0xff]  ;;  %v924_v42 = vld [vmem:[#allocation2 + $0x8] sm:$0xff]  ;;  %v925_v43 = vld [vmem:[#allocation2 + $0x10] sm:$0xff]  ;;  %p1257_p11 = scmp.ne.s32.totalorder %s1459_s17, 1 }
 0x147   : > { %v931_v44 = vadd.f32 %v923_v41, %v893_v18  ;;  %v932_v45 = vadd.f32 %v924_v42, %v895_v21  ;;  %v933_v46 = vadd.f32 %v925_v43, %v897_v24  ;;  %v926_v47 = vld [vmem:[#allocation2 + $0x18] sm:$0xff]  ;;  %v927_v48 = vld [vmem:[#allocation2 + $0x20] sm:$0xff]  ;;  %v928_v49 = vld [vmem:[#allocation2 + $0x28] sm:$0xff]  ;;  %v961_v57 = vlaneseq (!%p1257_p11) }
 0x148   : > { %v934_v50 = vadd.f32 %v926_v47, %v899_v27  ;;  %v935_v51 = vadd.f32 %v927_v48, %v903_v30  ;;  %v936_v52 = vadd.f32 %v928_v49, %v905_v33  ;;  %v929_v53 = vld [vmem:[#allocation2 + $0x30] sm:$0xff]  ;;  %v930_v54 = vld [vmem:[#allocation2 + $0x38] sm:$0xff]  ;;  %950 = sbr.rel (%p1257_p11) target bundleno = 347 (0x15b), region = 67  ;;  %v979_v59 = vld [vmem:[%s1668_s3] sm:$0xff] (!%p1257_p11) }
 0x149   : > { %939 = vst [vmem:[#allocation2] sm:$0xff] %v931_v44  ;;  %940 = vst [vmem:[#allocation2 + $0x8] sm:$0xff] %v932_v45  ;;  %v937_v55 = vadd.f32 %v929_v53, %v907_v36  ;;  %v938_v56 = vadd.f32 %v930_v54, %v909_v39  ;;  %v962_v58 = vshrl.u32 (!%p1257_p11), %v961_v57, 7  ;;  %v959_v61 = vld [vmem:[%s1667_s2] sm:$0x3] (!%p1257_p11)  ;;  %v980_v62 = vld [vmem:[%s1668_s3 + $0x8] sm:$0xff] (!%p1257_p11)  ;;  %v983_v4 = vunpack.c.l.bf16 (!%p1257_p11), %v979_v59 }
 0x14a   : > { %941 = vst [vmem:[#allocation2 + $0x10] sm:$0xff] %v933_v46  ;;  %942 = vst [vmem:[#allocation2 + $0x18] sm:$0xff] %v934_v50  ;;  %v981_v2 = vld [vmem:[%s1668_s3 + $0x10] sm:$0xff] (!%p1257_p11)  ;;  %v982_v3 = vld [vmem:[%s1668_s3 + $0x18] sm:$0xff] (!%p1257_p11)  ;;  %v984_v5 = vunpack.c.h.bf16 (!%p1257_p11), %v979_v59  ;;  %v985_v11 = vunpack.c.l.bf16 (!%p1257_p11), %v980_v62  ;;  %v986_v12 = vunpack.c.h.bf16 (!%p1257_p11), %v980_v62 }
 0x14b   : > { %943 = vst [vmem:[#allocation2 + $0x20] sm:$0xff] %v935_v51  ;;  %944 = vst [vmem:[#allocation2 + $0x28] sm:$0xff] %v936_v52  ;;  %v963_v0 = vsub.s32 (!%p1257_p11), 0, %v962_v58  ;;  %v967_v1 = vsub.s32 (!%p1257_p11), 1, %v962_v58  ;;  %v987_v16 = vunpack.c.l.bf16 (!%p1257_p11), %v981_v2  ;;  %v988_v17 = vunpack.c.h.bf16 (!%p1257_p11), %v981_v2 }
 0x14c   : > { %945 = vst [vmem:[#allocation2 + $0x30] sm:$0xff] %v937_v55  ;;  %946 = vst [vmem:[#allocation2 + $0x38] sm:$0xff] %v938_v56  ;;  %v989_v18 = vunpack.c.l.bf16 (!%p1257_p11), %v982_v3  ;;  %v990_v19 = vunpack.c.h.bf16 (!%p1257_p11), %v982_v3 }
 0x14d   : > { %v964_v9 = vrot.slane (!%p1257_p11), %v959_v61, %v963_v0  ;;  %v968_v10 = vrot.slane (!%p1257_p11), %v959_v61, %v967_v1 }
 0x150   : > { %v951_v60 = vld [vmem:[#allocation2] sm:$0xff]  ;;  %v952_v63 = vld [vmem:[#allocation2 + $0x8] sm:$0xff] }
 0x151   : > { %v953_v6 = vld [vmem:[#allocation2 + $0x10] sm:$0xff]  ;;  %v954_v7 = vld [vmem:[#allocation2 + $0x18] sm:$0xff]  ;;  %v971_v20 = vadd.f32 %v964_v9, %v951_v60  ;;  %v972_v21 = vadd.f32 %v968_v10, %v952_v63 }
 0x152   : > { %v955_v8 = vld [vmem:[#allocation2 + $0x20] sm:$0xff]  ;;  %v956_v13 = vld [vmem:[#allocation2 + $0x28] sm:$0xff]  ;;  %v973_v22 = vadd.f32 %v964_v9, %v953_v6  ;;  %v974_v23 = vadd.f32 %v968_v10, %v954_v7 }
 0x153   : > { %v957_v14 = vld [vmem:[#allocation2 + $0x30] sm:$0xff]  ;;  %v958_v15 = vld [vmem:[#allocation2 + $0x38] sm:$0xff]  ;;  %v975_v24 = vadd.f32 %v964_v9, %v955_v8  ;;  %v976_v25 = vadd.f32 %v968_v10, %v956_v13  ;;  %v991_v28 = vadd.f32 %v983_v4, %v971_v20  ;;  %v992_v29 = vadd.f32 %v984_v5, %v972_v21 }
 0x154   : > { %v977_v26 = vadd.f32 %v964_v9, %v957_v14  ;;  %v978_v27 = vadd.f32 %v968_v10, %v958_v15  ;;  %v993_v30 = vadd.f32 %v985_v11, %v973_v22  ;;  %v994_v31 = vadd.f32 %v986_v12, %v974_v23 }
 0x155   : > { %v995_v32 = vadd.f32 %v987_v16, %v975_v24  ;;  %v996_v33 = vadd.f32 %v988_v17, %v976_v25  ;;  %v1268_v36 = vpack.c.bf16 %v992_v29, %v991_v28 }
 0x156   : > { %v997_v34 = vadd.f32 %v989_v18, %v977_v26  ;;  %v998_v35 = vadd.f32 %v990_v19, %v978_v27  ;;  %v1269_v37 = vpack.c.bf16 %v994_v31, %v993_v30 }
 0x157   : > { %v1270_v38 = vpack.c.bf16 %v996_v33, %v995_v32  ;;  %1023 = vst [vmem:[%s1669_s4] sm:$0xff] %v1268_v36 }
 0x158   : > { %v1271_v39 = vpack.c.bf16 %v998_v35, %v997_v34  ;;  %1024 = vst [vmem:[%s1669_s4 + $0x8] sm:$0xff] %v1269_v37 }
 0x159   : > { %1025 = vst [vmem:[%s1669_s4 + $0x10] sm:$0xff] %v1270_v38 }
 0x15a   : > { %1026 = vst [vmem:[%s1669_s4 + $0x18] sm:$0xff] %v1271_v39 }
 0x15b PF: > { %s14_s19 = sadd.s32 1, %s1467_s19   ;;  %s1670_s15 = smov %s1455_s16 }
 0x15c   : > { %p11_p12 = scmp.ge.s32.totalorder %s14_s19, 4   ;;  %s1671_s16 = smov %s1530_s23 }
 0x15d   : > { %s1672_s17 = smov %s1463_s18  ;;  %s1673_s18 = smov %s1675_s20 }
 0x15e   :  { %13 = sbr.rel (!%p11_p12) target bundleno = 3 (0x3), region = 111 }

</bundles_post_ra>
